<compile_context>
chip_gen: v7x
topology: tpu7x:2x2x1
jax: 0.10.0
libtpu: 0.0.40
codegen_flags: <defaults>
</compile_context>

<pallas_src>
import jax
import jax.numpy as jnp
from jax.experimental import pallas as pl
from jax.experimental.pallas import tpu as pltpu


# --- Model dimensions (from the PyTorch module) -----------------------------
DIMS = [6, 200, 300, 400, 500, 600, 700, 800]
NEG_SLOPE = 0.01  # nn.LeakyReLU default


def _cdiv(a, b):
    return -(-a // b)


def _round_up(n, m):
    return _cdiv(n, m) * m


# Hidden dims padded to multiples of 128 (lane-friendly); first K (6) and the
# final output width (800) are left unpadded so the output store needs no
# wrapper-side slice.
PADDED = [DIMS[0]] + [_round_up(d, 128) for d in DIMS[1:-1]] + [DIMS[-1]]

TB_MAX = 512  # good on v6e (amortizes step overhead), safe on v7x/v5e VMEM


def _choose_tb(batch):
    """Batch tile: >=2 grid steps (v7x megacore) and balanced tiles."""
    n_steps = max(2, _cdiv(batch, TB_MAX))
    tb = _round_up(_cdiv(batch, n_steps), 8)
    return max(8, min(tb, TB_MAX))


# --- Pallas kernel -----------------------------------------------------------
def mlp_kernel(x_ref,
               w1, b1, w2, b2, w3, b3, w4, b4, w5, b5, w6, b6, w7, b7,
               o_ref):
    def layer(h_bf16, w_ref, b_ref, activate):
        # bf16 x bf16 MXU matmul with f32 accumulation; bias + LeakyReLU in f32.
        y = jnp.dot(h_bf16, w_ref[...], preferred_element_type=jnp.float32)
        y = y + b_ref[...]                      # (1, out) broadcasts over rows
        if activate:
            y = jnp.where(y >= 0, y, NEG_SLOPE * y)
            return y.astype(jnp.bfloat16)       # carry activations in bf16
        return y                                # final layer stays f32

    h = x_ref[...].astype(jnp.bfloat16)
    h = layer(h, w1, b1, True)
    h = layer(h, w2, b2, True)
    h = layer(h, w3, b3, True)
    h = layer(h, w4, b4, True)
    h = layer(h, w5, b5, True)
    h = layer(h, w6, b6, True)
    h = layer(h, w7, b7, False)                 # final linear, no activation
    o_ref[...] = h.astype(o_ref.dtype)


# --- One-time parameter preparation (OUTSIDE the jitted hot path) ------------
def prepare_params(params):
    """params: list of (W (in,out) f32, b (out,) f32) per layer.

    Returns a flat tuple (w1,b1,...,w7,b7): weights cast to bf16 and zero-
    padded to the PADDED dims (numerically exact), biases as (1, padded_out)
    f32. Call ONCE at init; the per-call forward does no weight prep.
    """
    packed = []
    for li, (w, b) in enumerate(params):
        din, dout = DIMS[li], DIMS[li + 1]
        pin, pout = PADDED[li], PADDED[li + 1]
        w_bf16 = jnp.asarray(w, jnp.float32).astype(jnp.bfloat16)
        wp = jnp.zeros((pin, pout), jnp.bfloat16).at[:din, :dout].set(w_bf16)
        bp = jnp.zeros((1, pout), jnp.float32).at[0, :dout].set(
            jnp.asarray(b, jnp.float32))
        packed.append(wp)
        packed.append(bp)
    return tuple(packed)


# --- Forward wrapper ----------------------------------------------------------
@jax.jit
def mlp_forward(x, packed_params):
    """x: (B, 6) float32. packed_params: output of prepare_params()."""
    B = x.shape[0]
    x2 = x.reshape(B, -1).astype(jnp.float32)

    TB = _choose_tb(B)
    grid = (_cdiv(B, TB),)   # ragged final block handled by Pallas (masked store)

    # x / out tiles move with the grid; weights & biases use a constant
    # index_map so they are loaded once and stay resident in VMEM.
    in_specs = [pl.BlockSpec((TB, DIMS[0]), lambda i: (i, 0))]
    for p in packed_params:
        in_specs.append(pl.BlockSpec(p.shape, lambda i: (0, 0)))
    out_spec = pl.BlockSpec((TB, DIMS[-1]), lambda i: (i, 0))

    out = pl.pallas_call(
        mlp_kernel,
        out_shape=jax.ShapeDtypeStruct((B, DIMS[-1]), jnp.float32),
        grid=grid,
        in_specs=in_specs,
        out_specs=out_spec,
        compiler_params=pltpu.CompilerParams(
            dimension_semantics=("parallel",),   # v7x: 2 TCs split the batch
            vmem_limit_bytes=48 << 20),          # ~15-20 MiB actual; < v7x 64 MiB
    )(x2, *packed_params)

    return out


# --- Deterministic parameter init (xavier_uniform weights, uniform biases) ---
def init_params(key):
    params = []
    for li in range(len(DIMS) - 1):
        din, dout = DIMS[li], DIMS[li + 1]
        key, kw, kb = jax.random.split(key, 3)
        bound_w = jnp.sqrt(6.0 / (din + dout))        # xavier_uniform
        w = jax.random.uniform(kw, (din, dout), jnp.float32, -bound_w, bound_w)
        bound_b = 1.0 / jnp.sqrt(din)                 # PyTorch Linear bias init
        b = jax.random.uniform(kb, (dout,), jnp.float32, -bound_b, bound_b)
        params.append((w, b))
    return params


# --- References --------------------------------------------------------------
def reference_forward_f32(x, params):
    """Full-f32 reference (PyTorch-module semantics)."""
    h = x.reshape(x.shape[0], -1).astype(jnp.float32)
    for li, (w, b) in enumerate(params):
        h = h @ w + b
        if li < len(params) - 1:
            h = jnp.where(h >= 0, h, NEG_SLOPE * h)
    return h


def reference_forward_bf16(x, params):
    """Mirrors the kernel numerics: bf16 operands & carried activations,
    f32 accumulation, f32 bias + LeakyReLU."""
    h = x.reshape(x.shape[0], -1).astype(jnp.bfloat16)
    for li, (w, b) in enumerate(params):
        y = jnp.dot(h, jnp.asarray(w, jnp.float32).astype(jnp.bfloat16),
                    preferred_element_type=jnp.float32) + b
        if li < len(params) - 1:
            y = jnp.where(y >= 0, y, NEG_SLOPE * y).astype(jnp.bfloat16)
        h = y
    return h


if __name__ == "__main__":
    key = jax.random.PRNGKey(0)
    kp, kx = jax.random.split(key)
    params = init_params(kp)
    packed = prepare_params(params)   # one-time, outside the jitted forward

    # Small batch, deliberately NOT a multiple of the tile so the ragged
    # trailing block (masked store, no host pad/slice) is exercised.
    batch = 20
    x = jax.random.normal(kx, (batch, 6), jnp.float32)

    out = jax.block_until_ready(mlp_forward(x, packed))
    assert out.shape == (batch, 800), out.shape

    # Tight check vs a reference with the same bf16-weight / bf16-activation
    # numerics (f32 accumulation).
    ref_bf16 = reference_forward_bf16(x, params)
    max_err = float(jnp.max(jnp.abs(out - ref_bf16)))
    assert jnp.allclose(out, ref_bf16, atol=2e-2, rtol=2e-2), max_err

    # Looser sanity check vs the full-f32 PyTorch-equivalent reference
    # (weights and carried activations are bf16, so tolerance is relaxed).
    ref_f32 = reference_forward_f32(x, params)
    scale = float(jnp.maximum(jnp.max(jnp.abs(ref_f32)), 1.0))
    assert float(jnp.max(jnp.abs(out - ref_f32))) <= 1e-1 * scale, \
        float(jnp.max(jnp.abs(out - ref_f32)))

    print("KERNEL_OK")
</pallas_src>

<mosaic_0001>
module attributes {stable_mosaic.version = 11 : i64} {
  func.func @mlp_kernel(%arg0: i32, %arg1: memref<16x6xf32, #tpu.memory_space<vmem>>, %arg2: memref<6x256xbf16, #tpu.memory_space<vmem>>, %arg3: memref<1x256xf32, #tpu.memory_space<vmem>>, %arg4: memref<256x384xbf16, #tpu.memory_space<vmem>>, %arg5: memref<1x384xf32, #tpu.memory_space<vmem>>, %arg6: memref<384x512xbf16, #tpu.memory_space<vmem>>, %arg7: memref<1x512xf32, #tpu.memory_space<vmem>>, %arg8: memref<512x512xbf16, #tpu.memory_space<vmem>>, %arg9: memref<1x512xf32, #tpu.memory_space<vmem>>, %arg10: memref<512x640xbf16, #tpu.memory_space<vmem>>, %arg11: memref<1x640xf32, #tpu.memory_space<vmem>>, %arg12: memref<640x768xbf16, #tpu.memory_space<vmem>>, %arg13: memref<1x768xf32, #tpu.memory_space<vmem>>, %arg14: memref<768x800xbf16, #tpu.memory_space<vmem>>, %arg15: memref<1x800xf32, #tpu.memory_space<vmem>>, %arg16: memref<16x800xf32, #tpu.memory_space<vmem>>) attributes {dimension_semantics = [#tpu.dimension_semantics<parallel>], iteration_bounds = array<i64: 2>, scalar_prefetch = 0 : i64, scratch_operands = 0 : i64, tpu.core_type = #tpu.core_type<tc>, window_params = [{transform_indices = @transform_0, window_bounds = array<i64: 16, 6>}, {pipeline_mode = #tpu.pipeline_mode<synchronous>, transform_indices = @transform_1, window_bounds = array<i64: 6, 256>}, {pipeline_mode = #tpu.pipeline_mode<synchronous>, transform_indices = @transform_2, window_bounds = array<i64: 1, 256>}, {pipeline_mode = #tpu.pipeline_mode<synchronous>, transform_indices = @transform_3, window_bounds = array<i64: 256, 384>}, {pipeline_mode = #tpu.pipeline_mode<synchronous>, transform_indices = @transform_4, window_bounds = array<i64: 1, 384>}, {pipeline_mode = #tpu.pipeline_mode<synchronous>, transform_indices = @transform_5, window_bounds = array<i64: 384, 512>}, {pipeline_mode = #tpu.pipeline_mode<synchronous>, transform_indices = @transform_6, window_bounds = array<i64: 1, 512>}, {pipeline_mode = #tpu.pipeline_mode<synchronous>, transform_indices = @transform_7, window_bounds = array<i64: 512, 512>}, {pipeline_mode = #tpu.pipeline_mode<synchronous>, transform_indices = @transform_8, window_bounds = array<i64: 1, 512>}, {pipeline_mode = #tpu.pipeline_mode<synchronous>, transform_indices = @transform_9, window_bounds = array<i64: 512, 640>}, {pipeline_mode = #tpu.pipeline_mode<synchronous>, transform_indices = @transform_10, window_bounds = array<i64: 1, 640>}, {pipeline_mode = #tpu.pipeline_mode<synchronous>, transform_indices = @transform_11, window_bounds = array<i64: 640, 768>}, {pipeline_mode = #tpu.pipeline_mode<synchronous>, transform_indices = @transform_12, window_bounds = array<i64: 1, 768>}, {pipeline_mode = #tpu.pipeline_mode<synchronous>, transform_indices = @transform_13, window_bounds = array<i64: 768, 800>}, {pipeline_mode = #tpu.pipeline_mode<synchronous>, transform_indices = @transform_14, window_bounds = array<i64: 1, 800>}, {transform_indices = @transform_15, window_bounds = array<i64: 16, 800>}]} {
    %c0 = arith.constant 0 : index
    %c0_0 = arith.constant 0 : index
    %0 = vector.load %arg1[%c0, %c0_0] : memref<16x6xf32, #tpu.memory_space<vmem>>, vector<16x6xf32>
    %1 = arith.truncf %0 : vector<16x6xf32> to vector<16x6xbf16>
    %c0_1 = arith.constant 0 : index
    %c0_2 = arith.constant 0 : index
    %2 = vector.load %arg2[%c0_1, %c0_2] : memref<6x256xbf16, #tpu.memory_space<vmem>>, vector<6x256xbf16>
    %cst = arith.constant dense<0.000000e+00> : vector<16x256xf32>
    %3 = tpu.matmul %1, %2, %cst {dimension_numbers = #tpu.dot_dimension_numbers<[1], [0], [0], [1], [0, 0, 1, 1], [], []>} : vector<16x6xbf16>, vector<6x256xbf16>, vector<16x256xf32> -> vector<16x256xf32>
    %c0_3 = arith.constant 0 : index
    %c0_4 = arith.constant 0 : index
    %4 = vector.load %arg3[%c0_3, %c0_4] : memref<1x256xf32, #tpu.memory_space<vmem>>, vector<1x256xf32>
    %5 = vector.broadcast %4 : vector<1x256xf32> to vector<16x256xf32>
    %6 = arith.addf %3, %5 : vector<16x256xf32>
    %cst_5 = arith.constant 0.000000e+00 : f32
    %7 = vector.broadcast %cst_5 : f32 to vector<16x256xf32>
    %8 = arith.cmpf oge, %6, %7 : vector<16x256xf32>
    %cst_6 = arith.constant 0.00999999977 : f32
    %9 = vector.broadcast %cst_6 : f32 to vector<16x256xf32>
    %10 = arith.mulf %9, %6 : vector<16x256xf32>
    %11 = arith.select %8, %6, %10 : vector<16x256xi1>, vector<16x256xf32>
    %12 = arith.truncf %11 : vector<16x256xf32> to vector<16x256xbf16>
    %c0_7 = arith.constant 0 : index
    %c0_8 = arith.constant 0 : index
    %13 = vector.load %arg4[%c0_7, %c0_8] : memref<256x384xbf16, #tpu.memory_space<vmem>>, vector<256x384xbf16>
    %cst_9 = arith.constant dense<0.000000e+00> : vector<16x384xf32>
    %14 = tpu.matmul %12, %13, %cst_9 {dimension_numbers = #tpu.dot_dimension_numbers<[1], [0], [0], [1], [0, 0, 1, 1], [], []>} : vector<16x256xbf16>, vector<256x384xbf16>, vector<16x384xf32> -> vector<16x384xf32>
    %c0_10 = arith.constant 0 : index
    %c0_11 = arith.constant 0 : index
    %15 = vector.load %arg5[%c0_10, %c0_11] : memref<1x384xf32, #tpu.memory_space<vmem>>, vector<1x384xf32>
    %16 = vector.broadcast %15 : vector<1x384xf32> to vector<16x384xf32>
    %17 = arith.addf %14, %16 : vector<16x384xf32>
    %cst_12 = arith.constant 0.000000e+00 : f32
    %18 = vector.broadcast %cst_12 : f32 to vector<16x384xf32>
    %19 = arith.cmpf oge, %17, %18 : vector<16x384xf32>
    %cst_13 = arith.constant 0.00999999977 : f32
    %20 = vector.broadcast %cst_13 : f32 to vector<16x384xf32>
    %21 = arith.mulf %20, %17 : vector<16x384xf32>
    %22 = arith.select %19, %17, %21 : vector<16x384xi1>, vector<16x384xf32>
    %23 = arith.truncf %22 : vector<16x384xf32> to vector<16x384xbf16>
    %c0_14 = arith.constant 0 : index
    %c0_15 = arith.constant 0 : index
    %24 = vector.load %arg6[%c0_14, %c0_15] : memref<384x512xbf16, #tpu.memory_space<vmem>>, vector<384x512xbf16>
    %cst_16 = arith.constant dense<0.000000e+00> : vector<16x512xf32>
    %25 = tpu.matmul %23, %24, %cst_16 {dimension_numbers = #tpu.dot_dimension_numbers<[1], [0], [0], [1], [0, 0, 1, 1], [], []>} : vector<16x384xbf16>, vector<384x512xbf16>, vector<16x512xf32> -> vector<16x512xf32>
    %c0_17 = arith.constant 0 : index
    %c0_18 = arith.constant 0 : index
    %26 = vector.load %arg7[%c0_17, %c0_18] : memref<1x512xf32, #tpu.memory_space<vmem>>, vector<1x512xf32>
    %27 = vector.broadcast %26 : vector<1x512xf32> to vector<16x512xf32>
    %28 = arith.addf %25, %27 : vector<16x512xf32>
    %cst_19 = arith.constant 0.000000e+00 : f32
    %29 = vector.broadcast %cst_19 : f32 to vector<16x512xf32>
    %30 = arith.cmpf oge, %28, %29 : vector<16x512xf32>
    %cst_20 = arith.constant 0.00999999977 : f32
    %31 = vector.broadcast %cst_20 : f32 to vector<16x512xf32>
    %32 = arith.mulf %31, %28 : vector<16x512xf32>
    %33 = arith.select %30, %28, %32 : vector<16x512xi1>, vector<16x512xf32>
    %34 = arith.truncf %33 : vector<16x512xf32> to vector<16x512xbf16>
    %c0_21 = arith.constant 0 : index
    %c0_22 = arith.constant 0 : index
    %35 = vector.load %arg8[%c0_21, %c0_22] : memref<512x512xbf16, #tpu.memory_space<vmem>>, vector<512x512xbf16>
    %cst_23 = arith.constant dense<0.000000e+00> : vector<16x512xf32>
    %36 = tpu.matmul %34, %35, %cst_23 {dimension_numbers = #tpu.dot_dimension_numbers<[1], [0], [0], [1], [0, 0, 1, 1], [], []>} : vector<16x512xbf16>, vector<512x512xbf16>, vector<16x512xf32> -> vector<16x512xf32>
    %c0_24 = arith.constant 0 : index
    %c0_25 = arith.constant 0 : index
    %37 = vector.load %arg9[%c0_24, %c0_25] : memref<1x512xf32, #tpu.memory_space<vmem>>, vector<1x512xf32>
    %38 = vector.broadcast %37 : vector<1x512xf32> to vector<16x512xf32>
    %39 = arith.addf %36, %38 : vector<16x512xf32>
    %cst_26 = arith.constant 0.000000e+00 : f32
    %40 = vector.broadcast %cst_26 : f32 to vector<16x512xf32>
    %41 = arith.cmpf oge, %39, %40 : vector<16x512xf32>
    %cst_27 = arith.constant 0.00999999977 : f32
    %42 = vector.broadcast %cst_27 : f32 to vector<16x512xf32>
    %43 = arith.mulf %42, %39 : vector<16x512xf32>
    %44 = arith.select %41, %39, %43 : vector<16x512xi1>, vector<16x512xf32>
    %45 = arith.truncf %44 : vector<16x512xf32> to vector<16x512xbf16>
    %c0_28 = arith.constant 0 : index
    %c0_29 = arith.constant 0 : index
    %46 = vector.load %arg10[%c0_28, %c0_29] : memref<512x640xbf16, #tpu.memory_space<vmem>>, vector<512x640xbf16>
    %cst_30 = arith.constant dense<0.000000e+00> : vector<16x640xf32>
    %47 = tpu.matmul %45, %46, %cst_30 {dimension_numbers = #tpu.dot_dimension_numbers<[1], [0], [0], [1], [0, 0, 1, 1], [], []>} : vector<16x512xbf16>, vector<512x640xbf16>, vector<16x640xf32> -> vector<16x640xf32>
    %c0_31 = arith.constant 0 : index
    %c0_32 = arith.constant 0 : index
    %48 = vector.load %arg11[%c0_31, %c0_32] : memref<1x640xf32, #tpu.memory_space<vmem>>, vector<1x640xf32>
    %49 = vector.broadcast %48 : vector<1x640xf32> to vector<16x640xf32>
    %50 = arith.addf %47, %49 : vector<16x640xf32>
    %cst_33 = arith.constant 0.000000e+00 : f32
    %51 = vector.broadcast %cst_33 : f32 to vector<16x640xf32>
    %52 = arith.cmpf oge, %50, %51 : vector<16x640xf32>
    %cst_34 = arith.constant 0.00999999977 : f32
    %53 = vector.broadcast %cst_34 : f32 to vector<16x640xf32>
    %54 = arith.mulf %53, %50 : vector<16x640xf32>
    %55 = arith.select %52, %50, %54 : vector<16x640xi1>, vector<16x640xf32>
    %56 = arith.truncf %55 : vector<16x640xf32> to vector<16x640xbf16>
    %c0_35 = arith.constant 0 : index
    %c0_36 = arith.constant 0 : index
    %57 = vector.load %arg12[%c0_35, %c0_36] : memref<640x768xbf16, #tpu.memory_space<vmem>>, vector<640x768xbf16>
    %cst_37 = arith.constant dense<0.000000e+00> : vector<16x768xf32>
    %58 = tpu.matmul %56, %57, %cst_37 {dimension_numbers = #tpu.dot_dimension_numbers<[1], [0], [0], [1], [0, 0, 1, 1], [], []>} : vector<16x640xbf16>, vector<640x768xbf16>, vector<16x768xf32> -> vector<16x768xf32>
    %c0_38 = arith.constant 0 : index
    %c0_39 = arith.constant 0 : index
    %59 = vector.load %arg13[%c0_38, %c0_39] : memref<1x768xf32, #tpu.memory_space<vmem>>, vector<1x768xf32>
    %60 = vector.broadcast %59 : vector<1x768xf32> to vector<16x768xf32>
    %61 = arith.addf %58, %60 : vector<16x768xf32>
    %cst_40 = arith.constant 0.000000e+00 : f32
    %62 = vector.broadcast %cst_40 : f32 to vector<16x768xf32>
    %63 = arith.cmpf oge, %61, %62 : vector<16x768xf32>
    %cst_41 = arith.constant 0.00999999977 : f32
    %64 = vector.broadcast %cst_41 : f32 to vector<16x768xf32>
    %65 = arith.mulf %64, %61 : vector<16x768xf32>
    %66 = arith.select %63, %61, %65 : vector<16x768xi1>, vector<16x768xf32>
    %67 = arith.truncf %66 : vector<16x768xf32> to vector<16x768xbf16>
    %c0_42 = arith.constant 0 : index
    %c0_43 = arith.constant 0 : index
    %68 = vector.load %arg14[%c0_42, %c0_43] : memref<768x800xbf16, #tpu.memory_space<vmem>>, vector<768x800xbf16>
    %cst_44 = arith.constant dense<0.000000e+00> : vector<16x800xf32>
    %69 = tpu.matmul %67, %68, %cst_44 {dimension_numbers = #tpu.dot_dimension_numbers<[1], [0], [0], [1], [0, 0, 1, 1], [], []>} : vector<16x768xbf16>, vector<768x800xbf16>, vector<16x800xf32> -> vector<16x800xf32>
    %c0_45 = arith.constant 0 : index
    %c0_46 = arith.constant 0 : index
    %70 = vector.load %arg15[%c0_45, %c0_46] : memref<1x800xf32, #tpu.memory_space<vmem>>, vector<1x800xf32>
    %71 = vector.broadcast %70 : vector<1x800xf32> to vector<16x800xf32>
    %72 = arith.addf %69, %71 : vector<16x800xf32>
    %c0_47 = arith.constant 0 : index
    %c0_48 = arith.constant 0 : index
    %73 = vector.load %arg16[%c0_47, %c0_48] : memref<16x800xf32, #tpu.memory_space<vmem>>, vector<16x800xf32>
    tpu.vector_store %arg16[%c0_47, %c0_48], %72 {strides = array<i32>} : memref<16x800xf32, #tpu.memory_space<vmem>>, vector<16x800xf32>,
    return
  }
  func.func @transform_0(%arg0: i32) -> (i32, i32) {
    %c0_i32 = arith.constant 0 : i32
    %c0_i32_0 = arith.constant 0 : i32
    return %arg0, %c0_i32 : i32, i32
  }
  func.func @transform_1(%arg0: i32) -> (i32, i32) {
    %c0_i32 = arith.constant 0 : i32
    %c0_i32_0 = arith.constant 0 : i32
    %c0_i32_1 = arith.constant 0 : i32
    return %c0_i32, %c0_i32_0 : i32, i32
  }
  func.func @transform_2(%arg0: i32) -> (i32, i32) {
    %c0_i32 = arith.constant 0 : i32
    %c0_i32_0 = arith.constant 0 : i32
    %c0_i32_1 = arith.constant 0 : i32
    return %c0_i32, %c0_i32_0 : i32, i32
  }
  func.func @transform_3(%arg0: i32) -> (i32, i32) {
    %c0_i32 = arith.constant 0 : i32
    %c0_i32_0 = arith.constant 0 : i32
    %c0_i32_1 = arith.constant 0 : i32
    return %c0_i32, %c0_i32_0 : i32, i32
  }
  func.func @transform_4(%arg0: i32) -> (i32, i32) {
    %c0_i32 = arith.constant 0 : i32
    %c0_i32_0 = arith.constant 0 : i32
    %c0_i32_1 = arith.constant 0 : i32
    return %c0_i32, %c0_i32_0 : i32, i32
  }
  func.func @transform_5(%arg0: i32) -> (i32, i32) {
    %c0_i32 = arith.constant 0 : i32
    %c0_i32_0 = arith.constant 0 : i32
    %c0_i32_1 = arith.constant 0 : i32
    return %c0_i32, %c0_i32_0 : i32, i32
  }
  func.func @transform_6(%arg0: i32) -> (i32, i32) {
    %c0_i32 = arith.constant 0 : i32
    %c0_i32_0 = arith.constant 0 : i32
    %c0_i32_1 = arith.constant 0 : i32
    return %c0_i32, %c0_i32_0 : i32, i32
  }
  func.func @transform_7(%arg0: i32) -> (i32, i32) {
    %c0_i32 = arith.constant 0 : i32
    %c0_i32_0 = arith.constant 0 : i32
    %c0_i32_1 = arith.constant 0 : i32
    return %c0_i32, %c0_i32_0 : i32, i32
  }
  func.func @transform_8(%arg0: i32) -> (i32, i32) {
    %c0_i32 = arith.constant 0 : i32
    %c0_i32_0 = arith.constant 0 : i32
    %c0_i32_1 = arith.constant 0 : i32
    return %c0_i32, %c0_i32_0 : i32, i32
  }
  func.func @transform_9(%arg0: i32) -> (i32, i32) {
    %c0_i32 = arith.constant 0 : i32
    %c0_i32_0 = arith.constant 0 : i32
    %c0_i32_1 = arith.constant 0 : i32
    return %c0_i32, %c0_i32_0 : i32, i32
  }
  func.func @transform_10(%arg0: i32) -> (i32, i32) {
    %c0_i32 = arith.constant 0 : i32
    %c0_i32_0 = arith.constant 0 : i32
    %c0_i32_1 = arith.constant 0 : i32
    return %c0_i32, %c0_i32_0 : i32, i32
  }
  func.func @transform_11(%arg0: i32) -> (i32, i32) {
    %c0_i32 = arith.constant 0 : i32
    %c0_i32_0 = arith.constant 0 : i32
    %c0_i32_1 = arith.constant 0 : i32
    return %c0_i32, %c0_i32_0 : i32, i32
  }
  func.func @transform_12(%arg0: i32) -> (i32, i32) {
    %c0_i32 = arith.constant 0 : i32
    %c0_i32_0 = arith.constant 0 : i32
    %c0_i32_1 = arith.constant 0 : i32
    return %c0_i32, %c0_i32_0 : i32, i32
  }
  func.func @transform_13(%arg0: i32) -> (i32, i32) {
    %c0_i32 = arith.constant 0 : i32
    %c0_i32_0 = arith.constant 0 : i32
    %c0_i32_1 = arith.constant 0 : i32
    return %c0_i32, %c0_i32_0 : i32, i32
  }
  func.func @transform_14(%arg0: i32) -> (i32, i32) {
    %c0_i32 = arith.constant 0 : i32
    %c0_i32_0 = arith.constant 0 : i32
    %c0_i32_1 = arith.constant 0 : i32
    return %c0_i32, %c0_i32_0 : i32, i32
  }
  func.func @transform_15(%arg0: i32) -> (i32, i32) {
    %c0_i32 = arith.constant 0 : i32
    %c0_i32_0 = arith.constant 0 : i32
    return %arg0, %c0_i32 : i32, i32
  }
}

</mosaic_0001>

<bundles_post_ra>
// kernel: mlp_forward.1
= control target key start
LH: loop header
LB: loop body
LE: loop exit
PB: predicated region body
PF: predicated region fallthrough
CT: control target
= control target key end

     0   :  { %20 = vsyncpa [#allocation3], 0  ;;  %s15108_s0 = inlined_call_operand.vmem [shape: f32[20,6], index: 0, kind: input, shape index: {}]   ;;  %s15109_s1 = inlined_call_operand.vmem [shape: bf16[6,256], index: 1, kind: input, shape index: {}]   ;;  %s15110_s2 = inlined_call_operand.vmem [shape: f32[1,256], index: 2, kind: input, shape index: {}]   ;;  %s15111_s3 = inlined_call_operand.hbm [shape: bf16[256,384], index: 3, kind: input, shape index: {}]   ;;  %s15112_s4 = inlined_call_operand.vmem [shape: f32[1,384], index: 4, kind: input, shape index: {}]   ;;  %s15113_s5 = inlined_call_operand.vmem [shape: bf16[384,512], index: 5, kind: input, shape index: {}]   ;;  %s15114_s6 = inlined_call_operand.vmem [shape: f32[1,512], index: 6, kind: input, shape index: {}]   ;;  %s15115_s7 = inlined_call_operand.vmem [shape: bf16[512,512], index: 7, kind: input, shape index: {}]   ;;  %s15116_s8 = inlined_call_operand.vmem [shape: f32[1,512], index: 8, kind: input, shape index: {}]   ;;  %s15117_s9 = inlined_call_operand.vmem [shape: bf16[512,640], index: 9, kind: input, shape index: {}]   ;;  %s15118_s10 = inlined_call_operand.vmem [shape: f32[1,640], index: 10, kind: input, shape index: {}]   ;;  %s15119_s11 = inlined_call_operand.vmem [shape: bf16[640,768], index: 11, kind: input, shape index: {}]   ;;  %s15120_s12 = inlined_call_operand.vmem [shape: f32[1,768], index: 12, kind: input, shape index: {}]   ;;  %s15121_s13 = inlined_call_operand.vmem [shape: bf16[768,800], index: 13, kind: input, shape index: {}]   ;;  %s15122_s14 = inlined_call_operand.vmem [shape: f32[1,800], index: 14, kind: input, shape index: {}]   ;;  %s15123_s15 = inlined_call_operand.hbm [shape: f32[20,800], index: 15, kind: output, shape index: {}]  }
   0x1   :  { %21 = vsyncpa [#allocation4], 0 }
   0x2   :  { %23 = vsyncpa [#allocation4 + $0x1], 0  ;;  %s11853_s18 = smov 0   ;;  %s11855_s19 = smov 0  }
   0x3   :  { %s11857_s20 = smov 0   ;;  %s11859_s21 = smov 0  }
   0x4 LB: > { %15131 = sst [smem:[#allocation8_spill]] %s11752_s18  ;;  %s11874_s22 = sadd.s32 4294967295, %s11764_s21   ;;  %s11764_s21 = sphi %s11859_s21, %s15149_s21   ;;  %s11760_s20 = sphi %s11857_s20, %s15151_s20   ;;  %s11756_s19 = sphi %s11855_s19, %s15153_s19   ;;  %s11752_s18 = sphi %s11853_s18, %s15152_s18  }
   0x5   : > { %15132 = sst [smem:[#allocation9_spill]] %s11760_s20  ;;  %s8867_s23 = sadd.s32 4294967294, %s11764_s21  }
   0x6   : > { %s11878_s24 = sadd.s32 1, %s11764_s21   ;;  %s356_s25 = sadd.s32 1, %s11760_s20 }
   0x7   : > { %15133 = sst [smem:[#allocation10_spill]] %s11878_s24  ;;  %s353_s26 = ssub.s32 %s11764_s21, %s11878_s24 }
   0x8   : > { %p366_p0 = scmp.ne.s32.totalorder %s11760_s20, %s11756_s19  ;;  %p354_p1 = scmp.eq.s32.totalorder %s353_s26, 0 }
   0x9   : > { %p367_p2 = scmp.eq.s32.totalorder %s11874_s22, 1  ;;  %p372_p3 = scmp.ne.s32.totalorder %s11756_s19, %s11752_s18 }
   0xa   : > { %p373_p4 = scmp.eq.s32.totalorder %s8867_s23, 1  ;;  %p8868_p7 = scmp.ge.s32.totalorder %s11764_s21, 1 }
   0xb   : > { %s11889_s27 = scalar_select %p354_p1, %s11760_s20, %s356_s25  }
   0xc   : > { %p11891_p5 = por %p367_p2, %p366_p0  ;;  %p11895_p6 = por %p373_p4, %p372_p3 }
   0xd   : > { %15134 = sst [smem:[#allocation11_spill]] %s11889_s27  ;;  %p380_p8 = scmp.lt.s32.totalorder %s11764_s21, 3 }
   0xe   : > { %s15135_s28 = scalar_select %p11891_p5, 1, 0 }
   0xf   : > { %s15136_s29 = scalar_select %p11895_p6, 1, 0 }
  0x10   : > { %p15129_p9 = scmp.eq.s32.totalorder %s11874_s22, 0  ;;  %p11902_p10 = pnand %p8868_p7, %p380_p8 }
  0x11   : > { %15137 = sst [smem:[#allocation12_spill]] %s15136_s29  ;;  %s11766_s16 = smov [#allocation2]  }
  0x12   : > { %s15138_s30 = scalar_select %p11902_p10, 1, 0 }
  0x13   : > { %s398_s17 = sshll.u32 %s11766_s16, 4  ;;  %p10155_p11 = pneg %p11902_p10  ;;  %s399_s17 = int_to_ptr.vmem [resolvable:$true] %s398_s17 }
  0x14   : > { %s11670_s27 = scalar_lea.hbm %s15111_s3, 6144 }
  0x15   : > { %p11910_p12 = pnand %p15129_p9, %p10155_p11  ;;  %p11671_p13 = scmp.ne.s32.totalorder %s15111_s3, %s11670_s27 }
  0x16   : > { %p11677_p3 = scmp.lt.u32.totalorder %s11670_s27, %s15111_s3 }
  0x17   : > { %p11672_p0 = pneg %p11910_p12 }
  0x19   : > { %p11673_p1 = pnand %p11672_p0, %p11671_p13 }
  0x1b   : > { %p11674_p2 = pneg %p11673_p1 }
  0x1d   : > { %p11679_p4 = pnand %p11677_p3, %p11674_p2 }
  0x1f   : > { %11682 = shalt.err (!%p11679_p4)
}
  0x20   : > { %s11683_s18 = scalar_lea.vmem %s399_s17, 6144  ;;  %p11691_p9 = scmp.lt.s32.totalorder %s399_s17, %s399_s17 }
  0x21   : > { %p11684_p7 = scmp.ne.s32.totalorder %s399_s17, %s11683_s18  ;;  %p11692_p6 = scmp.lt.s32.totalorder %s11683_s18, %s11683_s18 }
  0x23   : > { %p11686_p8 = pnand %p11684_p7, %p11672_p0  ;;  %p11693_p5 = por %p11692_p6, %p11691_p9 }
  0x25   : > { %p11687_p11 = pneg %p11686_p8 }
  0x27   : > { %p11694_p10 = pnand %p11693_p5, %p11687_p11 }
  0x29   : > { %11697 = shalt.err (!%p11694_p10)
}
  0x2a   : > { %s11767_s20 = smov 192   ;;  %s11768_s24 = smov 12  }
  0x2b   : > { %10158 = dma.hbm_to_vmem [thread:$0]  (!%p11910_p12), %s15111_s3, 6144, %s399_s17, [#allocation3], %s11767_s20, %s11767_s20, %s11768_s24  }
  0x2c   : > { %p15140_p13 = scmp.ne.s32.totalorder %s15138_s30, 0 }
  0x2d   : > { %p15141_p1 = scmp.eq.s32.totalorder (!%p15140_p13), %s11874_s22, 0 }
  0x2e   : > { %464 = sbr.rel (%p15140_p13) target bundleno = 2297 (0x8f9), region = 80 }
  0x35   : > { %11743 = dma.done.wait (%p15141_p1), [#allocation3], 6144   ;;  %p15142_p0 = pmov %p15141_p1 }
  0x36   : > { %s11937_s18 = sshll.u32 %s11874_s22, 1  ;;  %v11769_v0 = vmov 0   ;;  %v540_v1 = vld [vmem:[%s15109_s1] sm:$0x77]  ;;  %vm562_vm0 = vcmask 1042432   ;;  %vm558_vm1 = vcmask 48128   ;;  %v543_v58 = vlaneseq }
  0x37   : > { %11745 = vsyncadd (%p15142_p0), [#allocation3], 4294961152  ;;  %601 = vmatprep.mubr.bf16.mxu0 %v11769_v0  ;;  %p521_p5 = scmp.lt.s32.totalorder %s11937_s18, 2  ;;  %v8876_v4 = vcombine.high %v540_v1, %v540_v1  ;;  %v8875_v5 = vcombine.low %v540_v1, %v540_v1  ;;  %v10206_v6 = vld [vmem:[#allocation2 + $0x4] ss:$12 sps:$4 sm:$0xff]   ;;  %s15143_s17 = sand.u32 1, %s11756_s19  }
  0x38   : > { %v10208_v7 = vld [vmem:[#allocation2] ss:$12 sps:$4 sm:$0xff]   ;;  %963 = vmatprep.subr.bf16.mxu1 %v10206_v6  ;;  %v10209_v10 = vld [vmem:[#allocation2 + $0x1c] ss:$12 sps:$4 sm:$0xff]   ;;  %v10211_v11 = vld [vmem:[#allocation2 + $0x18] ss:$12 sps:$4 sm:$0xff]  }
  0x39   : > { %s522_s27 = scalar_select %p521_p5, %s11937_s18, 2  ;;  %8877 = vmatprep.subr.msk.bf16.mxu0 %vm562_vm0, %v8876_v4  ;;  %v564_v8 = vsel %vm562_vm0, %v8875_v5, 0  ;;  %964 = vmatpush1.bf16.msra.mxu1 %v10208_v7  ;;  %v10212_v12 = vld [vmem:[#allocation2 + $0x34] ss:$12 sps:$4 sm:$0xff]   ;;  %v10214_v13 = vld [vmem:[#allocation2 + $0x30] ss:$12 sps:$4 sm:$0xff]  }
  0x3a   : > { %570 = vmatpush1.bf16.msra.mxu0 %v564_v8  ;;  %965 = vmatprep.subr.bf16.mxu1 %v10209_v10  ;;  %v10215_v14 = vld [vmem:[#allocation2 + $0x4c] ss:$12 sps:$4 sm:$0xff]   ;;  %v10217_v15 = vld [vmem:[#allocation2 + $0x48] ss:$12 sps:$4 sm:$0xff]   ;;  %v10218_v16 = vld [vmem:[#allocation2 + $0x64] ss:$12 sps:$4 sm:$0xff]  }
  0x3b   : > { %s8874_s29 = sshll.u32 %s522_s27, 3  ;;  %v10232_v17 = vld [vmem:[#allocation2 + $0xc8] ss:$12 sps:$4 sm:$0xff]   ;;  %v10220_v19 = vld [vmem:[#allocation2 + $0x60] ss:$12 sps:$4 sm:$0xff]   ;;  %v11954_v59 = vshrl.u32 %v543_v58, 7 }
  0x3c   : > { %s524_s23 = scalar_lea.vmem %s15108_s0, %s8874_s29  ;;  %v10234_v18 = vld [vmem:[#allocation2 + $0x8] ss:$12 sps:$4 sm:$0xff]   ;;  %9896 = vmatprep.subr.bf16.mxu0 %v10232_v17  ;;  %v10237_v20 = vld [vmem:[#allocation2 + $0xe0] ss:$12 sps:$4 sm:$0xff]   ;;  %v10223_v23 = vld [vmem:[#allocation2 + $0x78] ss:$12 sps:$4 sm:$0xff]  }
  0x3d   : > { %v537_v2 = vld [vmem:[%s524_s23] sm:$0xff]  ;;  %v538_v3 = vld [vmem:[%s524_s23 + $0x8] sm:$0xff]  ;;  %966 = vmatpush1.bf16.msra.mxu1 %v10211_v11  ;;  %v10226_v27 = vld [vmem:[#allocation2 + $0x90] ss:$12 sps:$4 sm:$0xff]   ;;  %v11960_v61 = vsub.s32 0, %v11954_v59  ;;  %v11963_v62 = vsub.s32 1, %v11954_v59 }
  0x3e   : > { %v539_v9 = vpack.c.bf16 %v538_v3, %v537_v2  ;;  %967 = vmatprep.subr.bf16.mxu1 %v10212_v12  ;;  %v10221_v21 = vld [vmem:[#allocation2 + $0x7c] ss:$12 sps:$4 sm:$0xff]   ;;  %v10239_v22 = vld [vmem:[#allocation2 + $0x20] ss:$12 sps:$4 sm:$0xff]   ;;  %v10242_v25 = vld [vmem:[#allocation2 + $0xf8] ss:$12 sps:$4 sm:$0xff]  }
  0x3f   : > { %v10224_v24 = vld [vmem:[#allocation2 + $0x94] ss:$12 sps:$4 sm:$0xff]   ;;  %v10244_v26 = vld [vmem:[#allocation2 + $0x38] ss:$12 sps:$4 sm:$0xff]   ;;  %v10247_v28 = vld [vmem:[#allocation2 + $0x110] ss:$12 sps:$4 sm:$0xff]  }
  0x40   : > { %8878 = vmatmul.mubr.msk.bf16.vlgmr.msra.gmra.mrb[0].mxu0 %vm558_vm1, %v539_v9  ;;  %v10249_v29 = vld [vmem:[#allocation2 + $0x50] ss:$12 sps:$4 sm:$0xff]   ;;  %v10227_v30 = vld [vmem:[#allocation2 + $0xac] ss:$12 sps:$4 sm:$0xff]   ;;  %v10252_v31 = vld [vmem:[#allocation2 + $0x128] ss:$12 sps:$4 sm:$0xff]  }
  0x41   : > { %968 = vmatpush1.bf16.msra.mxu1 %v10214_v13  ;;  %9897 = vmatpush3.bf16.msra.mxu0 %v10234_v18  ;;  %v10229_v32 = vld [vmem:[#allocation2 + $0xa8] ss:$12 sps:$4 sm:$0xff]   ;;  %v10230_v33 = vld [vmem:[#allocation2 + $0xc4] ss:$12 sps:$4 sm:$0xff]   ;;  %v10233_v35 = vld [vmem:[#allocation2 + $0xc0] ss:$12 sps:$4 sm:$0xff]  }
  0x42   : > { %969 = vmatprep.subr.bf16.mxu1 %v10215_v14  ;;  %9898 = vmatprep.subr.bf16.mxu0 %v10237_v20  ;;  %v10254_v34 = vld [vmem:[#allocation2 + $0x68] ss:$12 sps:$4 sm:$0xff]   ;;  %v10238_v37 = vld [vmem:[#allocation2 + $0xd8] ss:$12 sps:$4 sm:$0xff]   ;;  %v10243_v39 = vld [vmem:[#allocation2 + $0xf0] ss:$12 sps:$4 sm:$0xff]  }
  0x43   : > { %v10235_v36 = vld [vmem:[#allocation2 + $0xdc] ss:$12 sps:$4 sm:$0xff]   ;;  %v10240_v38 = vld [vmem:[#allocation2 + $0xf4] ss:$12 sps:$4 sm:$0xff]   ;;  %v10245_v40 = vld [vmem:[#allocation2 + $0x10c] ss:$12 sps:$4 sm:$0xff]  }
  0x44   : > { %v10248_v41 = vld [vmem:[#allocation2 + $0x108] ss:$12 sps:$4 sm:$0xff]   ;;  %v10250_v42 = vld [vmem:[#allocation2 + $0x124] ss:$12 sps:$4 sm:$0xff]   ;;  %v10253_v43 = vld [vmem:[#allocation2 + $0x120] ss:$12 sps:$4 sm:$0xff]  }
  0x45   : > { %970 = vmatpush1.bf16.msra.mxu1 %v10217_v15  ;;  %9899 = vmatpush3.bf16.msra.mxu0 %v10239_v22  ;;  %v10255_v44 = vld [vmem:[#allocation2 + $0x13c] ss:$12 sps:$4 sm:$0xff]   ;;  %v10257_v45 = vld [vmem:[#allocation2 + $0x140] ss:$12 sps:$4 sm:$0xff]   ;;  %v10258_v46 = vld [vmem:[#allocation2 + $0x138] ss:$12 sps:$4 sm:$0xff]  }
  0x46   : > { %971 = vmatprep.subr.bf16.mxu1 %v10218_v16  ;;  %9900 = vmatprep.subr.bf16.mxu0 %v10242_v25  ;;  %v10259_v47 = vld [vmem:[#allocation2 + $0x80] ss:$12 sps:$4 sm:$0xff]   ;;  %v10262_v49 = vld [vmem:[#allocation2 + $0x158] ss:$12 sps:$4 sm:$0xff]   ;;  %v10263_v50 = vld [vmem:[#allocation2 + $0x150] ss:$12 sps:$4 sm:$0xff]  }
  0x47   : > { %v10260_v48 = vld [vmem:[#allocation2 + $0x154] ss:$12 sps:$4 sm:$0xff]   ;;  %v10264_v51 = vld [vmem:[#allocation2 + $0x98] ss:$12 sps:$4 sm:$0xff]   ;;  %v10267_v53 = vld [vmem:[#allocation2 + $0x170] ss:$12 sps:$4 sm:$0xff]  }
  0x48   : > { %v10265_v52 = vld [vmem:[#allocation2 + $0x16c] ss:$12 sps:$4 sm:$0xff]   ;;  %v10268_v54 = vld [vmem:[#allocation2 + $0x168] ss:$12 sps:$4 sm:$0xff]   ;;  %v10269_v55 = vld [vmem:[#allocation2 + $0xb0] ss:$12 sps:$4 sm:$0xff]  }
  0x49   : > { %972 = vmatpush1.bf16.msra.mxu1 %v10220_v19  ;;  %9901 = vmatpush3.bf16.msra.mxu0 %v10244_v26  ;;  %v10272_v56 = vld [vmem:[%s15113_s5 + $0x4] ss:$16 sps:$4 sm:$0xff]   ;;  %v10275_v57 = vld [vmem:[%s15113_s5 + $0xc] ss:$16 sps:$4 sm:$0xff]   ;;  %v541_v60 = vld [vmem:[%s15110_s2] sm:$0x3] }
  0x4a   : > { %973 = vmatprep.subr.bf16.mxu1 %v10221_v21  ;;  %9902 = vmatprep.subr.bf16.mxu0 %v10247_v28  ;;  %v546_v63 = vrot.slane %v541_v60, %v11960_v61  ;;  %v550_v1 = vrot.slane %v541_v60, %v11963_v62  ;;  %v10270_v16 = vld [vmem:[%s15113_s5] ss:$16 sps:$4 sm:$0xff]   ;;  %v10273_v17 = vld [vmem:[%s15113_s5 + $0x8] ss:$16 sps:$4 sm:$0xff]   ;;  %v10278_v21 = vld [vmem:[%s15113_s5 + $0x24] ss:$16 sps:$4 sm:$0xff]  }
  0x4b   : > { %v10281_v22 = vld [vmem:[%s15113_s5 + $0x2c] ss:$16 sps:$4 sm:$0xff]   ;;  %v10279_v25 = vld [vmem:[%s15113_s5 + $0x28] ss:$16 sps:$4 sm:$0xff]   ;;  %v10284_v26 = vld [vmem:[%s15113_s5 + $0x44] ss:$16 sps:$4 sm:$0xff]  }
  0x4c   : > { %v10282_v28 = vld [vmem:[%s15113_s5 + $0x40] ss:$16 sps:$4 sm:$0xff]   ;;  %v10332_v58 = vld [vmem:[%s15113_s5 + $0x144] ss:$16 sps:$4 sm:$0xff]   ;;  %v10335_v60 = vld [vmem:[%s15113_s5 + $0x14c] ss:$16 sps:$4 sm:$0xff]  }
  0x4d   : > { %974 = vmatpush1.bf16.msra.mxu1 %v10223_v23  ;;  %9903 = vmatpush3.bf16.msra.mxu0 %v10249_v29  ;;  %v10285_v29 = vld [vmem:[%s15113_s5 + $0x48] ss:$16 sps:$4 sm:$0xff]   ;;  %s10148_s30 = smul.u32 112, %s15143_s17  ;;  %s15144_s16 = sand.u32 1, %s11756_s19  }
  0x4e   : > { %975 = vmatprep.subr.bf16.mxu1 %v10224_v24  ;;  %9904 = vmatprep.subr.bf16.mxu0 %v10252_v31  ;;  %v10276_v24 = vld [vmem:[%s15113_s5 + $0x20] ss:$16 sps:$4 sm:$0xff]   ;;  %v10293_v31 = vld [vmem:[%s15113_s5 + $0x6c] ss:$16 sps:$4 sm:$0xff]   ;;  %s15047_s24 = scalar_lea.sflag [#allocation4], %s15144_s16  ;;  %p15145_p6 = scmp.ne.s32.totalorder %s15135_s28, 0 }
  0x4f   : > { %s15015_s27 = scalar_lea.vmem [#allocation5], %s10148_s30  ;;  %s8780_s20 = ssub.s32 (%p15145_p6), 3, %s11937_s18 }
  0x50   : > { %p8781_p9 = scmp.lt.s32.totalorder (%p15145_p6), %s8780_s20, 2 }
  0x51   : > { %976 = vmatpush1.bf16.msra.mxu1 %v10226_v27  ;;  %9905 = vmatpush3.bf16.msra.mxu0 %v10254_v34  ;;  %v10287_v27 = vld [vmem:[%s15113_s5 + $0x4c] ss:$16 sps:$4 sm:$0xff]   ;;  %v10296_v34 = vld [vmem:[%s15113_s5 + $0x84] ss:$16 sps:$4 sm:$0xff]  }
  0x52   : > { %977 = vmatprep.subr.bf16.mxu1 %v10227_v30  ;;  %9906 = vmatprep.subr.bf16.mxu0 %v10257_v45  ;;  %v10290_v30 = vld [vmem:[%s15113_s5 + $0x64] ss:$16 sps:$4 sm:$0xff]   ;;  %v10309_v45 = vld [vmem:[%s15113_s5 + $0xc8] ss:$16 sps:$4 sm:$0xff]  }
  0x55   : > { %978 = vmatpush1.bf16.msra.mxu1 %v10229_v32  ;;  %9907 = vmatpush3.bf16.msra.mxu0 %v10259_v47  ;;  %v10288_v32 = vld [vmem:[%s15113_s5 + $0x60] ss:$16 sps:$4 sm:$0xff]   ;;  %v10317_v47 = vld [vmem:[%s15113_s5 + $0xec] ss:$16 sps:$4 sm:$0xff]  }
  0x56   : > { %979 = vmatprep.subr.bf16.mxu1 %v10230_v33  ;;  %9908 = vmatprep.subr.bf16.mxu0 %v10262_v49  ;;  %v10291_v33 = vld [vmem:[%s15113_s5 + $0x68] ss:$16 sps:$4 sm:$0xff]  }
  0x57   : > { %v10315_v49 = vld [vmem:[%s15113_s5 + $0xe8] ss:$16 sps:$4 sm:$0xff]  }
  0x59   : > { %980 = vmatpush1.bf16.msra.mxu1 %v10233_v35  ;;  %9909 = vmatpush3.bf16.msra.mxu0 %v10264_v51  ;;  %v10299_v35 = vld [vmem:[%s15113_s5 + $0x8c] ss:$16 sps:$4 sm:$0xff]  }
  0x5a   : > { %981 = vmatprep.subr.bf16.mxu1 %v10235_v36  ;;  %9910 = vmatprep.subr.bf16.mxu0 %v10267_v53  ;;  %v10294_v36 = vld [vmem:[%s15113_s5 + $0x80] ss:$16 sps:$4 sm:$0xff]   ;;  %v10323_v51 = vld [vmem:[%s15113_s5 + $0x10c] ss:$16 sps:$4 sm:$0xff]   ;;  %v10321_v53 = vld [vmem:[%s15113_s5 + $0x108] ss:$16 sps:$4 sm:$0xff]  }
  0x5d   : > { %982 = vmatpush1.bf16.msra.mxu1 %v10238_v37  ;;  %9911 = vmatpush3.bf16.msra.mxu0 %v10269_v55  ;;  %v10297_v37 = vld [vmem:[%s15113_s5 + $0x88] ss:$16 sps:$4 sm:$0xff]   ;;  %v10329_v55 = vld [vmem:[%s15113_s5 + $0x12c] ss:$16 sps:$4 sm:$0xff]  }
  0x5e   : > { %983 = vmatprep.subr.bf16.mxu1 %v10240_v38  ;;  %1666 = vmatprep.subr.bf16.mxu0 %v10272_v56  ;;  %v10302_v38 = vld [vmem:[%s15113_s5 + $0xa4] ss:$16 sps:$4 sm:$0xff]   ;;  %v10324_v56 = vld [vmem:[%s15113_s5 + $0x120] ss:$16 sps:$4 sm:$0xff]  }
  0x61   : > { %984 = vmatpush1.bf16.msra.mxu1 %v10243_v39  ;;  %v10305_v39 = vld [vmem:[%s15113_s5 + $0xac] ss:$16 sps:$4 sm:$0xff]  }
  0x62   : > { %985 = vmatprep.subr.bf16.mxu1 %v10245_v40  ;;  %v10300_v40 = vld [vmem:[%s15113_s5 + $0xa0] ss:$16 sps:$4 sm:$0xff]  }
  0x65   : > { %986 = vmatpush1.bf16.msra.mxu1 %v10248_v41  ;;  %v10303_v41 = vld [vmem:[%s15113_s5 + $0xa8] ss:$16 sps:$4 sm:$0xff]  }
  0x66   : > { %987 = vmatprep.subr.bf16.mxu1 %v10250_v42  ;;  %v10308_v42 = vld [vmem:[%s15113_s5 + $0xc4] ss:$16 sps:$4 sm:$0xff]  }
  0x69   : > { %988 = vmatpush1.bf16.msra.mxu1 %v10253_v43  ;;  %v10311_v43 = vld [vmem:[%s15113_s5 + $0xcc] ss:$16 sps:$4 sm:$0xff]  }
  0x6a   : > { %989 = vmatprep.subr.bf16.mxu1 %v10255_v44  ;;  %v10306_v44 = vld [vmem:[%s15113_s5 + $0xc0] ss:$16 sps:$4 sm:$0xff]  }
  0x6d   : > { %990 = vmatpush1.bf16.msra.mxu1 %v10258_v46  ;;  %v10314_v46 = vld [vmem:[%s15113_s5 + $0xe4] ss:$16 sps:$4 sm:$0xff]  }
  0x6e   : > { %991 = vmatprep.subr.bf16.mxu1 %v10260_v48  ;;  %v10312_v48 = vld [vmem:[%s15113_s5 + $0xe0] ss:$16 sps:$4 sm:$0xff]  }
  0x71   : > { %992 = vmatpush1.bf16.msra.mxu1 %v10263_v50  ;;  %v10320_v50 = vld [vmem:[%s15113_s5 + $0x104] ss:$16 sps:$4 sm:$0xff]  }
  0x72   : > { %993 = vmatprep.subr.bf16.mxu1 %v10265_v52  ;;  %v10318_v52 = vld [vmem:[%s15113_s5 + $0x100] ss:$16 sps:$4 sm:$0xff]  }
  0x75   : > { %994 = vmatpush1.bf16.msra.mxu1 %v10268_v54  ;;  %v10326_v54 = vld [vmem:[%s15113_s5 + $0x124] ss:$16 sps:$4 sm:$0xff]  }
  0x76   : > { %1752 = vmatprep.subr.bf16.mxu1 %v10275_v57  ;;  %v10327_v57 = vld [vmem:[%s15113_s5 + $0x128] ss:$16 sps:$4 sm:$0xff]  }
 0x113   : > { %v603_v2 = vpop.f32.mrb[0].mxu0 }
 0x114   : > { %v604_v3 = vadd.f32 %v603_v2, %v546_v63  ;;  %v605_v4 = vpop.f32.mrb[1].mxu0  ;;  %v10338_v2 = vld [vmem:[%s15113_s5 + $0x164] ss:$16 sps:$4 sm:$0xff]  }
 0x115   : > { %v606_v5 = vadd.f32 %v605_v4, %v550_v1  ;;  %v607_v6 = vpop.f32.mrb[2].mxu0  ;;  %v10336_v4 = vld [vmem:[%s15113_s5 + $0x160] ss:$16 sps:$4 sm:$0xff]  }
 0x116   : > { %vm612_vm2 = vcmp.ge.f32.partialorder %v604_v3, 0.0  ;;  %v616_v7 = vmul.f32 0.01, %v604_v3  ;;  %v608_v8 = vadd.f32 %v607_v6, %v546_v63  ;;  %v609_v9 = vpop.f32.mrb[3].mxu0  ;;  %v10330_v63 = vld [vmem:[%s15113_s5 + $0x140] ss:$16 sps:$4 sm:$0xff]  }
 0x117   : > { %v617_v10 = vmul.f32 0.01, %v606_v5  ;;  %v610_v11 = vadd.f32 %v609_v9, %v550_v1  ;;  %vm613_vm3 = vcmp.ge.f32.partialorder %v606_v5, 0.0  ;;  %v10333_v1 = vld [vmem:[%s15113_s5 + $0x148] ss:$16 sps:$4 sm:$0xff]  }
 0x118   : > { %vm614_vm4 = vcmp.ge.f32.partialorder %v608_v8, 0.0  ;;  %v618_v12 = vmul.f32 0.01, %v608_v8  ;;  %v620_v14 = vsel %vm612_vm2, %v604_v3, %v616_v7  ;;  %v10341_v3 = vld [vmem:[%s15113_s5 + $0x16c] ss:$16 sps:$4 sm:$0xff]  }
 0x119   : > { %v619_v13 = vmul.f32 0.01, %v610_v11  ;;  %vm615_vm5 = vcmp.ge.f32.partialorder %v610_v11, 0.0  ;;  %v621_v18 = vsel %vm613_vm3, %v606_v5, %v617_v10  ;;  %v10339_v5 = vld [vmem:[%s15113_s5 + $0x168] ss:$16 sps:$4 sm:$0xff]  }
 0x11a   : > { %v622_v15 = vsel %vm614_vm4, %v608_v8, %v618_v12  ;;  %v10344_v6 = vld [vmem:[%s15113_s5 + $0x184] ss:$16 sps:$4 sm:$0xff]   ;;  %v10347_v7 = vld [vmem:[%s15113_s5 + $0x18c] ss:$16 sps:$4 sm:$0xff]   ;;  %v10342_v8 = vld [vmem:[%s15113_s5 + $0x180] ss:$16 sps:$4 sm:$0xff]  }
 0x11b   : > { %v623_v19 = vsel %vm615_vm5, %v610_v11, %v619_v13  ;;  %v624_v20 = vpack.c.bf16 %v622_v15, %v620_v14  ;;  %v10345_v9 = vld [vmem:[%s15113_s5 + $0x188] ss:$16 sps:$4 sm:$0xff]   ;;  %v10350_v10 = vld [vmem:[%s15113_s5 + $0x1a4] ss:$16 sps:$4 sm:$0xff]   ;;  %v10353_v11 = vld [vmem:[%s15113_s5 + $0x1ac] ss:$16 sps:$4 sm:$0xff]  }
 0x11c   : > { %v625_v23 = vpack.c.bf16 %v623_v19, %v621_v18  ;;  %v10348_v12 = vld [vmem:[%s15113_s5 + $0x1a0] ss:$16 sps:$4 sm:$0xff]   ;;  %v10351_v13 = vld [vmem:[%s15113_s5 + $0x1a8] ss:$16 sps:$4 sm:$0xff]   ;;  %v10356_v14 = vld [vmem:[%s15113_s5 + $0x1c4] ss:$16 sps:$4 sm:$0xff]  }
 0x11d   : > { %v10359_v15 = vld [vmem:[%s15113_s5 + $0x1cc] ss:$16 sps:$4 sm:$0xff]   ;;  %v10362_v18 = vld [vmem:[%s15113_s5 + $0x1e4] ss:$16 sps:$4 sm:$0xff]  }
 0x11e   : > { %995 = vmatprep.mubr.bf16.mxu1 %v625_v23  ;;  %1038 = vmatprep.mubr.bf16.mxu0 %v625_v23  ;;  %v10365_v19 = vld [vmem:[%s15113_s5 + $0x1ec] ss:$16 sps:$4 sm:$0xff]  }
 0x11f   : > { %996 = vmatmul.mubr.bf16.vlgmr.msra.gmra.mrb[0].mxu1 %v624_v20  ;;  %1039 = vmatmul.mubr.bf16.vlgmr.msra.gmra.mrb[4].mxu0 %v624_v20  ;;  %v10360_v20 = vld [vmem:[%s15113_s5 + $0x1e0] ss:$16 sps:$4 sm:$0xff]   ;;  %v10371_v23 = vld [vmem:[%s15113_s5 + $0x20c] ss:$16 sps:$4 sm:$0xff]  }
 0x120   : > { %1667 = vmatpush1.bf16.msra.mxu0 %v10270_v16  ;;  %1753 = vmatpush1.bf16.msra.mxu1 %v10273_v17  ;;  %v10354_v16 = vld [vmem:[%s15113_s5 + $0x1c0] ss:$16 sps:$4 sm:$0xff]   ;;  %v10357_v17 = vld [vmem:[%s15113_s5 + $0x1c8] ss:$16 sps:$4 sm:$0xff]  }
 0x121   : > { %1668 = vmatprep.subr.bf16.mxu0 %v10278_v21  ;;  %1754 = vmatprep.subr.bf16.mxu1 %v10281_v22  ;;  %v10363_v21 = vld [vmem:[%s15113_s5 + $0x1e8] ss:$16 sps:$4 sm:$0xff]   ;;  %v10368_v22 = vld [vmem:[%s15113_s5 + $0x204] ss:$16 sps:$4 sm:$0xff]  }
 0x124   : > { %1669 = vmatpush1.bf16.msra.mxu0 %v10276_v24  ;;  %1755 = vmatpush1.bf16.msra.mxu1 %v10279_v25  ;;  %v690_v24 = vld [vmem:[%s15112_s4] sm:$0x7]  ;;  %v12163_v25 = vsub.s32 2, %v11954_v59 }
 0x125   : > { %1670 = vmatprep.subr.bf16.mxu0 %v10284_v26  ;;  %1756 = vmatprep.subr.bf16.mxu1 %v10287_v27  ;;  %v695_v26 = vrot.slane %v690_v24, %v11960_v61  ;;  %v699_v27 = vrot.slane %v690_v24, %v11963_v62 }
 0x128   : > { %1671 = vmatpush1.bf16.msra.mxu0 %v10282_v28  ;;  %1757 = vmatpush1.bf16.msra.mxu1 %v10285_v29 }
 0x129   : > { %1672 = vmatprep.subr.bf16.mxu0 %v10290_v30  ;;  %1758 = vmatprep.subr.bf16.mxu1 %v10293_v31  ;;  %v703_v30 = vrot.slane %v690_v24, %v12163_v25  ;;  %v10402_v24 = vld [vmem:[%s15113_s5 + $0x2c0] ss:$16 sps:$4 sm:$0xff]  }
 0x12c   : > { %1673 = vmatpush1.bf16.msra.mxu0 %v10288_v32  ;;  %1759 = vmatpush1.bf16.msra.mxu1 %v10291_v33 }
 0x12d   : > { %1674 = vmatprep.subr.bf16.mxu0 %v10296_v34  ;;  %1760 = vmatprep.subr.bf16.mxu1 %v10299_v35 }
 0x130   : > { %1675 = vmatpush1.bf16.msra.mxu0 %v10294_v36  ;;  %1761 = vmatpush1.bf16.msra.mxu1 %v10297_v37 }
 0x131   : > { %1676 = vmatprep.subr.bf16.mxu0 %v10302_v38  ;;  %1762 = vmatprep.subr.bf16.mxu1 %v10305_v39 }
 0x134   : > { %1677 = vmatpush1.bf16.msra.mxu0 %v10300_v40  ;;  %1763 = vmatpush1.bf16.msra.mxu1 %v10303_v41 }
 0x135   : > { %1678 = vmatprep.subr.bf16.mxu0 %v10308_v42  ;;  %1764 = vmatprep.subr.bf16.mxu1 %v10311_v43 }
 0x138   : > { %1679 = vmatpush1.bf16.msra.mxu0 %v10306_v44  ;;  %1765 = vmatpush1.bf16.msra.mxu1 %v10309_v45 }
 0x139   : > { %1680 = vmatprep.subr.bf16.mxu0 %v10314_v46  ;;  %1766 = vmatprep.subr.bf16.mxu1 %v10317_v47 }
 0x13c   : > { %1681 = vmatpush1.bf16.msra.mxu0 %v10312_v48  ;;  %1767 = vmatpush1.bf16.msra.mxu1 %v10315_v49 }
 0x13d   : > { %1682 = vmatprep.subr.bf16.mxu0 %v10320_v50  ;;  %1768 = vmatprep.subr.bf16.mxu1 %v10323_v51 }
 0x140   : > { %1683 = vmatpush1.bf16.msra.mxu0 %v10318_v52  ;;  %1769 = vmatpush1.bf16.msra.mxu1 %v10321_v53 }
 0x141   : > { %1684 = vmatprep.subr.bf16.mxu0 %v10326_v54  ;;  %1770 = vmatprep.subr.bf16.mxu1 %v10329_v55  ;;  %v10366_v55 = vld [vmem:[%s15113_s5 + $0x200] ss:$16 sps:$4 sm:$0xff]  }
 0x144   : > { %1685 = vmatpush1.bf16.msra.mxu0 %v10324_v56  ;;  %1771 = vmatpush1.bf16.msra.mxu1 %v10327_v57 }
 0x145   : > { %1686 = vmatprep.subr.bf16.mxu0 %v10332_v58  ;;  %1772 = vmatprep.subr.bf16.mxu1 %v10335_v60  ;;  %v10369_v58 = vld [vmem:[%s15113_s5 + $0x208] ss:$16 sps:$4 sm:$0xff]   ;;  %v10374_v60 = vld [vmem:[%s15113_s5 + $0x224] ss:$16 sps:$4 sm:$0xff]  }
 0x148   : > { %1687 = vmatpush1.bf16.msra.mxu0 %v10330_v63  ;;  %1773 = vmatpush1.bf16.msra.mxu1 %v10333_v1  ;;  %v10377_v63 = vld [vmem:[%s15113_s5 + $0x22c] ss:$16 sps:$4 sm:$0xff]  }
 0x149   : > { %1688 = vmatprep.subr.bf16.mxu0 %v10338_v2  ;;  %1774 = vmatprep.subr.bf16.mxu1 %v10341_v3 }
 0x14c   : > { %1689 = vmatpush1.bf16.msra.mxu0 %v10336_v4  ;;  %1775 = vmatpush1.bf16.msra.mxu1 %v10339_v5  ;;  %v10372_v4 = vld [vmem:[%s15113_s5 + $0x220] ss:$16 sps:$4 sm:$0xff]   ;;  %v10375_v5 = vld [vmem:[%s15113_s5 + $0x228] ss:$16 sps:$4 sm:$0xff]  }
 0x14d   : > { %1690 = vmatprep.subr.bf16.mxu0 %v10344_v6  ;;  %1776 = vmatprep.subr.bf16.mxu1 %v10347_v7  ;;  %v10380_v6 = vld [vmem:[%s15113_s5 + $0x244] ss:$16 sps:$4 sm:$0xff]   ;;  %v10383_v7 = vld [vmem:[%s15113_s5 + $0x24c] ss:$16 sps:$4 sm:$0xff]  }
 0x150   : > { %1691 = vmatpush1.bf16.msra.mxu0 %v10342_v8  ;;  %1777 = vmatpush1.bf16.msra.mxu1 %v10345_v9  ;;  %v10378_v8 = vld [vmem:[%s15113_s5 + $0x240] ss:$16 sps:$4 sm:$0xff]   ;;  %v10381_v9 = vld [vmem:[%s15113_s5 + $0x248] ss:$16 sps:$4 sm:$0xff]  }
 0x151   : > { %1692 = vmatprep.subr.bf16.mxu0 %v10350_v10  ;;  %1778 = vmatprep.subr.bf16.mxu1 %v10353_v11  ;;  %v10386_v10 = vld [vmem:[%s15113_s5 + $0x264] ss:$16 sps:$4 sm:$0xff]   ;;  %v10389_v11 = vld [vmem:[%s15113_s5 + $0x26c] ss:$16 sps:$4 sm:$0xff]  }
 0x154   : > { %1693 = vmatpush1.bf16.msra.mxu0 %v10348_v12  ;;  %1779 = vmatpush1.bf16.msra.mxu1 %v10351_v13  ;;  %v10384_v12 = vld [vmem:[%s15113_s5 + $0x260] ss:$16 sps:$4 sm:$0xff]   ;;  %v10387_v13 = vld [vmem:[%s15113_s5 + $0x268] ss:$16 sps:$4 sm:$0xff]  }
 0x155   : > { %1694 = vmatprep.subr.bf16.mxu0 %v10356_v14  ;;  %1780 = vmatprep.subr.bf16.mxu1 %v10359_v15  ;;  %v10392_v14 = vld [vmem:[%s15113_s5 + $0x284] ss:$16 sps:$4 sm:$0xff]   ;;  %v10395_v15 = vld [vmem:[%s15113_s5 + $0x28c] ss:$16 sps:$4 sm:$0xff]  }
 0x158   : > { %1695 = vmatpush1.bf16.msra.mxu0 %v10354_v16  ;;  %1781 = vmatpush1.bf16.msra.mxu1 %v10357_v17  ;;  %v10390_v16 = vld [vmem:[%s15113_s5 + $0x280] ss:$16 sps:$4 sm:$0xff]   ;;  %v10393_v17 = vld [vmem:[%s15113_s5 + $0x288] ss:$16 sps:$4 sm:$0xff]  }
 0x159   : > { %1696 = vmatprep.subr.bf16.mxu0 %v10362_v18  ;;  %1782 = vmatprep.subr.bf16.mxu1 %v10365_v19  ;;  %v10398_v18 = vld [vmem:[%s15113_s5 + $0x2a4] ss:$16 sps:$4 sm:$0xff]   ;;  %v10401_v19 = vld [vmem:[%s15113_s5 + $0x2ac] ss:$16 sps:$4 sm:$0xff]  }
 0x15c   : > { %1697 = vmatpush1.bf16.msra.mxu0 %v10360_v20  ;;  %1783 = vmatpush1.bf16.msra.mxu1 %v10363_v21  ;;  %v10396_v20 = vld [vmem:[%s15113_s5 + $0x2a0] ss:$16 sps:$4 sm:$0xff]   ;;  %v10399_v21 = vld [vmem:[%s15113_s5 + $0x2a8] ss:$16 sps:$4 sm:$0xff]  }
 0x15d   : > { %1709 = vmatprep.subr.bf16.mxu0 %v10368_v22  ;;  %1795 = vmatprep.subr.bf16.mxu1 %v10371_v23  ;;  %v10404_v22 = vld [vmem:[%s15113_s5 + $0x2c4] ss:$16 sps:$4 sm:$0xff]   ;;  %v10407_v23 = vld [vmem:[%s15113_s5 + $0x2cc] ss:$16 sps:$4 sm:$0xff]  }
 0x1f2   : > { %v997_v28 = vpop.f32.mrb[0].mxu1  ;;  %v9912_v29 = vpop.f32.mrb[4].mxu0 }
 0x1f3   : > { %v998_v31 = vadd.f32 %v997_v28, %v695_v26  ;;  %v999_v32 = vpop.f32.mrb[1].mxu1  ;;  %v9913_v33 = vpop.f32.mrb[5].mxu0  ;;  %v10413_v28 = vld [vmem:[%s15113_s5 + $0x2ec] ss:$16 sps:$4 sm:$0xff]  }
 0x1f4   : > { %v1000_v34 = vadd.f32 %v999_v32, %v699_v27  ;;  %v9914_v35 = vadd.f32 %v9913_v33, %v9912_v29  ;;  %v1001_v36 = vpop.f32.mrb[2].mxu1  ;;  %v9915_v37 = vpop.f32.mrb[6].mxu0  ;;  %v10408_v29 = vld [vmem:[%s15113_s5 + $0x2e0] ss:$16 sps:$4 sm:$0xff]   ;;  %v10419_v32 = vld [vmem:[%s15115_s7 + $0xc] ss:$16 sps:$4 sm:$0xff]  }
 0x1f5   : > { %v1053_v38 = vmul.f32 0.01, %v998_v31  ;;  %v1002_v39 = vadd.f32 %v1001_v36, %v695_v26  ;;  %v1003_v40 = vpop.f32.mrb[3].mxu1  ;;  %v9916_v41 = vpop.f32.mrb[7].mxu0  ;;  %vm1047_vm6 = vcmp.ge.f32.partialorder %v998_v31, 0.0 }
 0x1f6   : > { %v1054_v42 = vmul.f32 0.01, %v1000_v34  ;;  %v1041_v43 = vadd.f32 %v9914_v35, %v703_v30  ;;  %v1004_v44 = vadd.f32 %v1003_v40, %v699_v27  ;;  %vm1048_vm7 = vcmp.ge.f32.partialorder %v1000_v34, 0.0  ;;  %v10405_v26 = vld [vmem:[%s15113_s5 + $0x2c8] ss:$16 sps:$4 sm:$0xff]  }
 0x1f7   : > { %vm1050_vm8 = vcmp.ge.f32.partialorder %v1002_v39, 0.0  ;;  %v1056_v45 = vmul.f32 0.01, %v1002_v39  ;;  %v9917_v46 = vadd.f32 %v9916_v41, %v9915_v37  ;;  %v1059_v48 = vsel %vm1047_vm6, %v998_v31, %v1053_v38  ;;  %v10410_v27 = vld [vmem:[%s15113_s5 + $0x2e4] ss:$16 sps:$4 sm:$0xff]  }
 0x1f8   : > { %vm1051_vm9 = vcmp.ge.f32.partialorder %v1004_v44, 0.0  ;;  %v1057_v47 = vmul.f32 0.01, %v1004_v44  ;;  %v1055_v49 = vmul.f32 0.01, %v1041_v43  ;;  %vm1049_vm10 = vcmp.ge.f32.partialorder %v1041_v43, 0.0 }
 0x1f9   : > { %v1062_v50 = vsel %vm1050_vm8, %v1002_v39, %v1056_v45  ;;  %v1044_v51 = vadd.f32 %v9917_v46, %v703_v30  ;;  %v1060_v53 = vsel %vm1048_vm7, %v1000_v34, %v1054_v42  ;;  %v10411_v30 = vld [vmem:[%s15113_s5 + $0x2e8] ss:$16 sps:$4 sm:$0xff]   ;;  %v10416_v31 = vld [vmem:[%s15115_s7 + $0x4] ss:$16 sps:$4 sm:$0xff]   ;;  %v10414_v33 = vld [vmem:[%s15115_s7] ss:$16 sps:$4 sm:$0xff]  }
 0x1fa   : > { %v1065_v52 = vpack.c.bf16 %v1062_v50, %v1059_v48  ;;  %v1063_v54 = vsel %vm1051_vm9, %v1004_v44, %v1057_v47  ;;  %v1061_v1 = vsel %vm1049_vm10, %v1041_v43, %v1055_v49  ;;  %v10417_v34 = vld [vmem:[%s15115_s7 + $0x8] ss:$16 sps:$4 sm:$0xff]   ;;  %v10422_v35 = vld [vmem:[%s15115_s7 + $0x24] ss:$16 sps:$4 sm:$0xff]   ;;  %v10425_v36 = vld [vmem:[%s15115_s7 + $0x2c] ss:$16 sps:$4 sm:$0xff]  }
 0x1fb   : > { %vm1052_vm11 = vcmp.ge.f32.partialorder %v1044_v51, 0.0  ;;  %v1058_v56 = vmul.f32 0.01, %v1044_v51  ;;  %v1066_v57 = vpack.c.bf16 %v1063_v54, %v1060_v53  ;;  %v10420_v37 = vld [vmem:[%s15115_s7 + $0x20] ss:$16 sps:$4 sm:$0xff]  }
 0x1fc   : > { %v10423_v38 = vld [vmem:[%s15115_s7 + $0x28] ss:$16 sps:$4 sm:$0xff]   ;;  %v10428_v39 = vld [vmem:[%s15115_s7 + $0x44] ss:$16 sps:$4 sm:$0xff]   ;;  %v10431_v40 = vld [vmem:[%s15115_s7 + $0x4c] ss:$16 sps:$4 sm:$0xff]  }
 0x1fd   : > { %v1064_v2 = vsel %vm1052_vm11, %v1044_v51, %v1058_v56  ;;  %1698 = vmatprep.mubr.bf16.mxu0 %v1066_v57  ;;  %1784 = vmatprep.mubr.bf16.mxu1 %v1066_v57  ;;  %v10426_v41 = vld [vmem:[%s15115_s7 + $0x40] ss:$16 sps:$4 sm:$0xff]   ;;  %v10429_v42 = vld [vmem:[%s15115_s7 + $0x48] ss:$16 sps:$4 sm:$0xff]   ;;  %v10434_v43 = vld [vmem:[%s15115_s7 + $0x64] ss:$16 sps:$4 sm:$0xff]  }
 0x1fe   : > { %1699 = vmatmul.mubr.bf16.vlgmr.msra.gmra.mrb[8].mxu0 %v1065_v52  ;;  %1785 = vmatmul.mubr.bf16.vlgmr.msra.gmra.mrb[4].mxu1 %v1065_v52  ;;  %v12180_v3 = vpack.c.bf16 %v1064_v2, %v1061_v1  ;;  %v10437_v44 = vld [vmem:[%s15115_s7 + $0x6c] ss:$16 sps:$4 sm:$0xff]   ;;  %v10432_v45 = vld [vmem:[%s15115_s7 + $0x60] ss:$16 sps:$4 sm:$0xff]   ;;  %v10435_v46 = vld [vmem:[%s15115_s7 + $0x68] ss:$16 sps:$4 sm:$0xff]  }
 0x1ff   : > { %1710 = vmatpush1.bf16.msra.mxu0 %v10366_v55  ;;  %1796 = vmatpush1.bf16.msra.mxu1 %v10369_v58  ;;  %v10440_v47 = vld [vmem:[%s15115_s7 + $0x84] ss:$16 sps:$4 sm:$0xff]   ;;  %v10443_v48 = vld [vmem:[%s15115_s7 + $0x8c] ss:$16 sps:$4 sm:$0xff]   ;;  %v10438_v49 = vld [vmem:[%s15115_s7 + $0x80] ss:$16 sps:$4 sm:$0xff]  }
 0x200   : > { %1711 = vmatprep.subr.bf16.mxu0 %v10374_v60  ;;  %1797 = vmatprep.subr.bf16.mxu1 %v10377_v63  ;;  %v10441_v50 = vld [vmem:[%s15115_s7 + $0x88] ss:$16 sps:$4 sm:$0xff]   ;;  %v10446_v51 = vld [vmem:[%s15115_s7 + $0xa4] ss:$16 sps:$4 sm:$0xff]   ;;  %v10449_v52 = vld [vmem:[%s15115_s7 + $0xac] ss:$16 sps:$4 sm:$0xff]  }
 0x201   : > { %1741 = vmatprep.mubr.bf16.mxu0 %v11769_v0  ;;  %1827 = vmatprep.mubr.bf16.mxu1 %v11769_v0  ;;  %v10444_v53 = vld [vmem:[%s15115_s7 + $0xa0] ss:$16 sps:$4 sm:$0xff]   ;;  %v10447_v54 = vld [vmem:[%s15115_s7 + $0xa8] ss:$16 sps:$4 sm:$0xff]   ;;  %v10452_v55 = vld [vmem:[%s15115_s7 + $0xc4] ss:$16 sps:$4 sm:$0xff]  }
 0x202   : > { %v10455_v56 = vld [vmem:[%s15115_s7 + $0xcc] ss:$16 sps:$4 sm:$0xff]   ;;  %v10450_v57 = vld [vmem:[%s15115_s7 + $0xc0] ss:$16 sps:$4 sm:$0xff]   ;;  %v10453_v58 = vld [vmem:[%s15115_s7 + $0xc8] ss:$16 sps:$4 sm:$0xff]  }
 0x203   : > { %1712 = vmatpush1.bf16.msra.mxu0 %v10372_v4  ;;  %1798 = vmatpush1.bf16.msra.mxu1 %v10375_v5  ;;  %v10458_v60 = vld [vmem:[%s15115_s7 + $0xe4] ss:$16 sps:$4 sm:$0xff]   ;;  %v10461_v63 = vld [vmem:[%s15115_s7 + $0xec] ss:$16 sps:$4 sm:$0xff]   ;;  %v10456_v1 = vld [vmem:[%s15115_s7 + $0xe0] ss:$16 sps:$4 sm:$0xff]  }
 0x204   : > { %1713 = vmatprep.subr.bf16.mxu0 %v10380_v6  ;;  %1799 = vmatprep.subr.bf16.mxu1 %v10383_v7  ;;  %v10459_v2 = vld [vmem:[%s15115_s7 + $0xe8] ss:$16 sps:$4 sm:$0xff]   ;;  %v10467_v4 = vld [vmem:[%s15115_s7 + $0x10c] ss:$16 sps:$4 sm:$0xff]   ;;  %v10462_v5 = vld [vmem:[%s15115_s7 + $0x100] ss:$16 sps:$4 sm:$0xff]  }
 0x205   : > { %v10465_v6 = vld [vmem:[%s15115_s7 + $0x108] ss:$16 sps:$4 sm:$0xff]   ;;  %v10470_v7 = vld [vmem:[%s15115_s7 + $0x124] ss:$16 sps:$4 sm:$0xff]  }
 0x207   : > { %1714 = vmatpush1.bf16.msra.mxu0 %v10378_v8  ;;  %1800 = vmatpush1.bf16.msra.mxu1 %v10381_v9  ;;  %v10473_v8 = vld [vmem:[%s15115_s7 + $0x12c] ss:$16 sps:$4 sm:$0xff]   ;;  %v10468_v9 = vld [vmem:[%s15115_s7 + $0x120] ss:$16 sps:$4 sm:$0xff]  }
 0x208   : > { %1715 = vmatprep.subr.bf16.mxu0 %v10386_v10  ;;  %1801 = vmatprep.subr.bf16.mxu1 %v10389_v11  ;;  %v10471_v10 = vld [vmem:[%s15115_s7 + $0x128] ss:$16 sps:$4 sm:$0xff]   ;;  %v10476_v11 = vld [vmem:[%s15115_s7 + $0x144] ss:$16 sps:$4 sm:$0xff]  }
 0x20b   : > { %1716 = vmatpush1.bf16.msra.mxu0 %v10384_v12  ;;  %1802 = vmatpush1.bf16.msra.mxu1 %v10387_v13  ;;  %v10479_v12 = vld [vmem:[%s15115_s7 + $0x14c] ss:$16 sps:$4 sm:$0xff]   ;;  %v10474_v13 = vld [vmem:[%s15115_s7 + $0x140] ss:$16 sps:$4 sm:$0xff]  }
 0x20c   : > { %1717 = vmatprep.subr.bf16.mxu0 %v10392_v14  ;;  %1803 = vmatprep.subr.bf16.mxu1 %v10395_v15  ;;  %v10477_v14 = vld [vmem:[%s15115_s7 + $0x148] ss:$16 sps:$4 sm:$0xff]   ;;  %v10482_v15 = vld [vmem:[%s15115_s7 + $0x164] ss:$16 sps:$4 sm:$0xff]  }
 0x20f   : > { %1718 = vmatpush1.bf16.msra.mxu0 %v10390_v16  ;;  %1804 = vmatpush1.bf16.msra.mxu1 %v10393_v17  ;;  %v10485_v16 = vld [vmem:[%s15115_s7 + $0x16c] ss:$16 sps:$4 sm:$0xff]   ;;  %v10480_v17 = vld [vmem:[%s15115_s7 + $0x160] ss:$16 sps:$4 sm:$0xff]  }
 0x210   : > { %1719 = vmatprep.subr.bf16.mxu0 %v10398_v18  ;;  %1805 = vmatprep.subr.bf16.mxu1 %v10401_v19  ;;  %v10483_v18 = vld [vmem:[%s15115_s7 + $0x168] ss:$16 sps:$4 sm:$0xff]   ;;  %v10488_v19 = vld [vmem:[%s15115_s7 + $0x184] ss:$16 sps:$4 sm:$0xff]  }
 0x213   : > { %1720 = vmatpush1.bf16.msra.mxu0 %v10396_v20  ;;  %1806 = vmatpush1.bf16.msra.mxu1 %v10399_v21  ;;  %v10491_v20 = vld [vmem:[%s15115_s7 + $0x18c] ss:$16 sps:$4 sm:$0xff]   ;;  %v10486_v21 = vld [vmem:[%s15115_s7 + $0x180] ss:$16 sps:$4 sm:$0xff]  }
 0x214   : > { %1721 = vmatprep.subr.bf16.mxu0 %v10404_v22  ;;  %1807 = vmatprep.subr.bf16.mxu1 %v10407_v23  ;;  %v10489_v22 = vld [vmem:[%s15115_s7 + $0x188] ss:$16 sps:$4 sm:$0xff]   ;;  %v10494_v23 = vld [vmem:[%s15115_s7 + $0x1a4] ss:$16 sps:$4 sm:$0xff]  }
 0x217   : > { %1722 = vmatpush1.bf16.msra.mxu0 %v10402_v24  ;;  %1808 = vmatpush1.bf16.msra.mxu1 %v10405_v26  ;;  %v10497_v24 = vld [vmem:[%s15115_s7 + $0x1ac] ss:$16 sps:$4 sm:$0xff]   ;;  %v10492_v26 = vld [vmem:[%s15115_s7 + $0x1a0] ss:$16 sps:$4 sm:$0xff]  }
 0x218   : > { %1723 = vmatprep.subr.bf16.mxu0 %v10410_v27  ;;  %1809 = vmatprep.subr.bf16.mxu1 %v10413_v28  ;;  %v10495_v27 = vld [vmem:[%s15115_s7 + $0x1a8] ss:$16 sps:$4 sm:$0xff]   ;;  %v10500_v28 = vld [vmem:[%s15115_s7 + $0x1c4] ss:$16 sps:$4 sm:$0xff]  }
 0x21b   : > { %1724 = vmatpush1.bf16.msra.mxu0 %v10408_v29  ;;  %1810 = vmatpush1.bf16.msra.mxu1 %v10411_v30  ;;  %v10503_v29 = vld [vmem:[%s15115_s7 + $0x1cc] ss:$16 sps:$4 sm:$0xff]   ;;  %v10498_v30 = vld [vmem:[%s15115_s7 + $0x1c0] ss:$16 sps:$4 sm:$0xff]  }
 0x21c   : > { %2656 = vmatprep.subr.bf16.mxu0 %v10416_v31  ;;  %2742 = vmatprep.subr.bf16.mxu1 %v10419_v32  ;;  %v10501_v31 = vld [vmem:[%s15115_s7 + $0x1c8] ss:$16 sps:$4 sm:$0xff]   ;;  %v10506_v32 = vld [vmem:[%s15115_s7 + $0x1e4] ss:$16 sps:$4 sm:$0xff]  }
 0x21e   : > { %1742 = vmatmul.mubr.bf16.vlgmr.msra.gmra.mrb[8].mxu0 %v12180_v3  ;;  %1828 = vmatmul.mubr.bf16.vlgmr.msra.gmra.mrb[4].mxu1 %v12180_v3  ;;  %v10464_v3 = vld [vmem:[%s15115_s7 + $0x104] ss:$16 sps:$4 sm:$0xff]  }
 0x21f   : > { %2657 = vmatpush1.bf16.msra.mxu0 %v10414_v33  ;;  %2743 = vmatpush1.bf16.msra.mxu1 %v10417_v34  ;;  %v10509_v33 = vld [vmem:[%s15115_s7 + $0x1ec] ss:$16 sps:$4 sm:$0xff]   ;;  %v10504_v34 = vld [vmem:[%s15115_s7 + $0x1e0] ss:$16 sps:$4 sm:$0xff]  }
 0x220   : > { %2658 = vmatprep.subr.bf16.mxu0 %v10422_v35  ;;  %2744 = vmatprep.subr.bf16.mxu1 %v10425_v36  ;;  %v10507_v35 = vld [vmem:[%s15115_s7 + $0x1e8] ss:$16 sps:$4 sm:$0xff]   ;;  %v10512_v36 = vld [vmem:[%s15115_s7 + $0x204] ss:$16 sps:$4 sm:$0xff]  }
 0x223   : > { %2659 = vmatpush1.bf16.msra.mxu0 %v10420_v37  ;;  %2745 = vmatpush1.bf16.msra.mxu1 %v10423_v38  ;;  %v10515_v37 = vld [vmem:[%s15115_s7 + $0x20c] ss:$16 sps:$4 sm:$0xff]   ;;  %v1164_v38 = vld [vmem:[%s15114_s6] sm:$0xf] }
 0x224   : > { %2660 = vmatprep.subr.bf16.mxu0 %v10428_v39  ;;  %2746 = vmatprep.subr.bf16.mxu1 %v10431_v40  ;;  %v12466_v39 = vsub.s32 3, %v11954_v59  ;;  %v1169_v40 = vrot.slane %v1164_v38, %v11960_v61 }
 0x227   : > { %2661 = vmatpush1.bf16.msra.mxu0 %v10426_v41  ;;  %2747 = vmatpush1.bf16.msra.mxu1 %v10429_v42  ;;  %v1177_v41 = vrot.slane %v1164_v38, %v12163_v25  ;;  %v1173_v42 = vrot.slane %v1164_v38, %v11963_v62 }
 0x228   : > { %2662 = vmatprep.subr.bf16.mxu0 %v10434_v43  ;;  %2748 = vmatprep.subr.bf16.mxu1 %v10437_v44  ;;  %v1181_v43 = vrot.slane %v1164_v38, %v12466_v39  ;;  %v10537_v38 = vld [vmem:[%s15115_s7 + $0x288] ss:$16 sps:$4 sm:$0xff]  }
 0x22b   : > { %2663 = vmatpush1.bf16.msra.mxu0 %v10432_v45  ;;  %2749 = vmatpush1.bf16.msra.mxu1 %v10435_v46 }
 0x22c   : > { %2664 = vmatprep.subr.bf16.mxu0 %v10440_v47  ;;  %2750 = vmatprep.subr.bf16.mxu1 %v10443_v48 }
 0x22f   : > { %2665 = vmatpush1.bf16.msra.mxu0 %v10438_v49  ;;  %2751 = vmatpush1.bf16.msra.mxu1 %v10441_v50 }
 0x230   : > { %2666 = vmatprep.subr.bf16.mxu0 %v10446_v51  ;;  %2752 = vmatprep.subr.bf16.mxu1 %v10449_v52 }
 0x233   : > { %2667 = vmatpush1.bf16.msra.mxu0 %v10444_v53  ;;  %2753 = vmatpush1.bf16.msra.mxu1 %v10447_v54 }
 0x234   : > { %2668 = vmatprep.subr.bf16.mxu0 %v10452_v55  ;;  %2754 = vmatprep.subr.bf16.mxu1 %v10455_v56 }
 0x237   : > { %2669 = vmatpush1.bf16.msra.mxu0 %v10450_v57  ;;  %2755 = vmatpush1.bf16.msra.mxu1 %v10453_v58 }
 0x238   : > { %2670 = vmatprep.subr.bf16.mxu0 %v10458_v60  ;;  %2756 = vmatprep.subr.bf16.mxu1 %v10461_v63 }
 0x23b   : > { %2671 = vmatpush1.bf16.msra.mxu0 %v10456_v1  ;;  %2757 = vmatpush1.bf16.msra.mxu1 %v10459_v2 }
 0x23c   : > { %2672 = vmatprep.subr.bf16.mxu0 %v10464_v3  ;;  %2758 = vmatprep.subr.bf16.mxu1 %v10467_v4 }
 0x23f   : > { %2673 = vmatpush1.bf16.msra.mxu0 %v10462_v5  ;;  %2759 = vmatpush1.bf16.msra.mxu1 %v10465_v6 }
 0x240   : > { %2674 = vmatprep.subr.bf16.mxu0 %v10470_v7  ;;  %2760 = vmatprep.subr.bf16.mxu1 %v10473_v8 }
 0x243   : > { %2675 = vmatpush1.bf16.msra.mxu0 %v10468_v9  ;;  %2761 = vmatpush1.bf16.msra.mxu1 %v10471_v10 }
 0x244   : > { %2676 = vmatprep.subr.bf16.mxu0 %v10476_v11  ;;  %2762 = vmatprep.subr.bf16.mxu1 %v10479_v12 }
 0x247   : > { %2677 = vmatpush1.bf16.msra.mxu0 %v10474_v13  ;;  %2763 = vmatpush1.bf16.msra.mxu1 %v10477_v14 }
 0x248   : > { %2678 = vmatprep.subr.bf16.mxu0 %v10482_v15  ;;  %2764 = vmatprep.subr.bf16.mxu1 %v10485_v16 }
 0x24b   : > { %2679 = vmatpush1.bf16.msra.mxu0 %v10480_v17  ;;  %2765 = vmatpush1.bf16.msra.mxu1 %v10483_v18 }
 0x24c   : > { %2680 = vmatprep.subr.bf16.mxu0 %v10488_v19  ;;  %2766 = vmatprep.subr.bf16.mxu1 %v10491_v20  ;;  %v10510_v19 = vld [vmem:[%s15115_s7 + $0x200] ss:$16 sps:$4 sm:$0xff]   ;;  %v10513_v20 = vld [vmem:[%s15115_s7 + $0x208] ss:$16 sps:$4 sm:$0xff]  }
 0x24f   : > { %2681 = vmatpush1.bf16.msra.mxu0 %v10486_v21  ;;  %2767 = vmatpush1.bf16.msra.mxu1 %v10489_v22  ;;  %v10518_v22 = vld [vmem:[%s15115_s7 + $0x224] ss:$16 sps:$4 sm:$0xff]  }
 0x250   : > { %2682 = vmatprep.subr.bf16.mxu0 %v10494_v23  ;;  %2768 = vmatprep.subr.bf16.mxu1 %v10497_v24  ;;  %v10521_v23 = vld [vmem:[%s15115_s7 + $0x22c] ss:$16 sps:$4 sm:$0xff]   ;;  %v10516_v24 = vld [vmem:[%s15115_s7 + $0x220] ss:$16 sps:$4 sm:$0xff]  }
 0x253   : > { %2683 = vmatpush1.bf16.msra.mxu0 %v10492_v26  ;;  %2769 = vmatpush1.bf16.msra.mxu1 %v10495_v27  ;;  %v10519_v26 = vld [vmem:[%s15115_s7 + $0x228] ss:$16 sps:$4 sm:$0xff]   ;;  %v10524_v27 = vld [vmem:[%s15115_s7 + $0x244] ss:$16 sps:$4 sm:$0xff]  }
 0x254   : > { %2684 = vmatprep.subr.bf16.mxu0 %v10500_v28  ;;  %2770 = vmatprep.subr.bf16.mxu1 %v10503_v29  ;;  %v10527_v28 = vld [vmem:[%s15115_s7 + $0x24c] ss:$16 sps:$4 sm:$0xff]   ;;  %v10522_v29 = vld [vmem:[%s15115_s7 + $0x240] ss:$16 sps:$4 sm:$0xff]  }
 0x257   : > { %2685 = vmatpush1.bf16.msra.mxu0 %v10498_v30  ;;  %2771 = vmatpush1.bf16.msra.mxu1 %v10501_v31  ;;  %v10525_v30 = vld [vmem:[%s15115_s7 + $0x248] ss:$16 sps:$4 sm:$0xff]   ;;  %v10530_v31 = vld [vmem:[%s15115_s7 + $0x264] ss:$16 sps:$4 sm:$0xff]  }
 0x258   : > { %2686 = vmatprep.subr.bf16.mxu0 %v10506_v32  ;;  %2772 = vmatprep.subr.bf16.mxu1 %v10509_v33  ;;  %v10533_v32 = vld [vmem:[%s15115_s7 + $0x26c] ss:$16 sps:$4 sm:$0xff]   ;;  %v10528_v33 = vld [vmem:[%s15115_s7 + $0x260] ss:$16 sps:$4 sm:$0xff]  }
 0x25b   : > { %2687 = vmatpush1.bf16.msra.mxu0 %v10504_v34  ;;  %2773 = vmatpush1.bf16.msra.mxu1 %v10507_v35  ;;  %v10531_v34 = vld [vmem:[%s15115_s7 + $0x268] ss:$16 sps:$4 sm:$0xff]   ;;  %v10536_v35 = vld [vmem:[%s15115_s7 + $0x284] ss:$16 sps:$4 sm:$0xff]  }
 0x25c   : > { %2699 = vmatprep.subr.bf16.mxu0 %v10512_v36  ;;  %2785 = vmatprep.subr.bf16.mxu1 %v10515_v37  ;;  %v10539_v36 = vld [vmem:[%s15115_s7 + $0x28c] ss:$16 sps:$4 sm:$0xff]   ;;  %v10534_v37 = vld [vmem:[%s15115_s7 + $0x280] ss:$16 sps:$4 sm:$0xff]  }
 0x2f1   : > { %v1743_v44 = vpop.f32.mrb[8].mxu0  ;;  %v1829_v45 = vpop.f32.mrb[4].mxu1 }
 0x2f2   : > { %v10028_v46 = vadd.f32 %v1743_v44, %v1169_v40  ;;  %v10032_v47 = vadd.f32 %v1829_v45, %v1177_v41  ;;  %v1745_v48 = vpop.f32.mrb[9].mxu0  ;;  %v1831_v49 = vpop.f32.mrb[5].mxu1  ;;  %v10548_v44 = vld [vmem:[%s15115_s7 + $0x2c4] ss:$16 sps:$4 sm:$0xff]   ;;  %v10551_v45 = vld [vmem:[%s15115_s7 + $0x2cc] ss:$16 sps:$4 sm:$0xff]  }
 0x2f3   : > { %v10029_v50 = vadd.f32 %v1745_v48, %v1173_v42  ;;  %v10033_v51 = vadd.f32 %v1831_v49, %v1181_v43  ;;  %v1747_v52 = vpop.f32.mrb[10].mxu0  ;;  %v1833_v53 = vpop.f32.mrb[6].mxu1  ;;  %v10554_v48 = vld [vmem:[%s15115_s7 + $0x2e4] ss:$16 sps:$4 sm:$0xff]   ;;  %v10557_v49 = vld [vmem:[%s15115_s7 + $0x2ec] ss:$16 sps:$4 sm:$0xff]  }
 0x2f4   : > { %vm1838_vm12 = vcmp.ge.f32.partialorder %v10028_v46, 0.0  ;;  %v1846_v54 = vmul.f32 0.01, %v10028_v46  ;;  %vm1840_vm13 = vcmp.ge.f32.partialorder %v10032_v47, 0.0  ;;  %v1848_v55 = vmul.f32 0.01, %v10032_v47 }
 0x2f5   : > { %vm1839_vm14 = vcmp.ge.f32.partialorder %v10029_v50, 0.0  ;;  %v1847_v56 = vmul.f32 0.01, %v10029_v50  ;;  %vm1841_vm15 = vcmp.ge.f32.partialorder %v10033_v51, 0.0  ;;  %v1849_v57 = vmul.f32 0.01, %v10033_v51 }
 0x2f6   : > { %v10030_v58 = vadd.f32 %v1747_v52, %v1169_v40  ;;  %v10034_v60 = vadd.f32 %v1833_v53, %v1177_v41  ;;  %v1749_v63 = vpop.f32.mrb[11].mxu0  ;;  %v1835_v1 = vpop.f32.mrb[7].mxu1  ;;  %v1854_v2 = vsel %vm1838_vm12, %v10028_v46, %v1846_v54  ;;  %v1856_v3 = vsel %vm1840_vm13, %v10032_v47, %v1848_v55  ;;  %v10542_v40 = vld [vmem:[%s15115_s7 + $0x2a4] ss:$16 sps:$4 sm:$0xff]   ;;  %v10545_v41 = vld [vmem:[%s15115_s7 + $0x2ac] ss:$16 sps:$4 sm:$0xff]  }
 0x2f7   : > { %v10031_v4 = vadd.f32 %v1749_v63, %v1173_v42  ;;  %v10035_v5 = vadd.f32 %v1835_v1, %v1181_v43  ;;  %v1855_v12 = vsel %vm1839_vm14, %v10029_v50, %v1847_v56  ;;  %v1857_v13 = vsel %vm1841_vm15, %v10033_v51, %v1849_v57  ;;  %v10540_v42 = vld [vmem:[%s15115_s7 + $0x2a0] ss:$16 sps:$4 sm:$0xff]   ;;  %v10543_v43 = vld [vmem:[%s15115_s7 + $0x2a8] ss:$16 sps:$4 sm:$0xff]   ;;  %v10560_v52 = vld [vmem:[%s15115_s7 + $0x304] ss:$16 sps:$4 sm:$0xff]  }
 0x2f8   : > { %vm1842_vm0 = vcmp.ge.f32.partialorder %v10030_v58, 0.0  ;;  %v1850_v6 = vmul.f32 0.01, %v10030_v58  ;;  %vm1844_vm1 = vcmp.ge.f32.partialorder %v10034_v60, 0.0  ;;  %v1852_v7 = vmul.f32 0.01, %v10034_v60 }
 0x2f9   : > { %vm1843_vm2 = vcmp.ge.f32.partialorder %v10031_v4, 0.0  ;;  %v1851_v8 = vmul.f32 0.01, %v10031_v4  ;;  %vm1845_vm3 = vcmp.ge.f32.partialorder %v10035_v5, 0.0  ;;  %v1853_v9 = vmul.f32 0.01, %v10035_v5 }
 0x2fa   : > { %v1858_v10 = vsel %vm1842_vm0, %v10030_v58, %v1850_v6  ;;  %v1860_v11 = vsel %vm1844_vm1, %v10034_v60, %v1852_v7  ;;  %v10546_v46 = vld [vmem:[%s15115_s7 + $0x2c0] ss:$16 sps:$4 sm:$0xff]   ;;  %v10549_v47 = vld [vmem:[%s15115_s7 + $0x2c8] ss:$16 sps:$4 sm:$0xff]   ;;  %v10563_v53 = vld [vmem:[%s15115_s7 + $0x30c] ss:$16 sps:$4 sm:$0xff]  }
 0x2fb   : > { %v1862_v14 = vpack.c.bf16 %v1858_v10, %v1854_v2  ;;  %v12474_v15 = vpack.c.bf16 %v1860_v11, %v1856_v3  ;;  %v1859_v16 = vsel %vm1843_vm2, %v10031_v4, %v1851_v8  ;;  %v1861_v17 = vsel %vm1845_vm3, %v10035_v5, %v1853_v9  ;;  %v10552_v50 = vld [vmem:[%s15115_s7 + $0x2e0] ss:$16 sps:$4 sm:$0xff]   ;;  %v10555_v51 = vld [vmem:[%s15115_s7 + $0x2e8] ss:$16 sps:$4 sm:$0xff]   ;;  %v10566_v56 = vld [vmem:[%s15115_s7 + $0x324] ss:$16 sps:$4 sm:$0xff]  }
 0x2fc   : > { %v1863_v18 = vpack.c.bf16 %v1859_v16, %v1855_v12  ;;  %v1865_v21 = vpack.c.bf16 %v1861_v17, %v1857_v13  ;;  %v10558_v54 = vld [vmem:[%s15115_s7 + $0x300] ss:$16 sps:$4 sm:$0xff]   ;;  %v10561_v55 = vld [vmem:[%s15115_s7 + $0x308] ss:$16 sps:$4 sm:$0xff]   ;;  %v10569_v57 = vld [vmem:[%s15115_s7 + $0x32c] ss:$16 sps:$4 sm:$0xff]  }
 0x2fd   : > { %v10564_v58 = vld [vmem:[%s15115_s7 + $0x320] ss:$16 sps:$4 sm:$0xff]   ;;  %v10567_v60 = vld [vmem:[%s15115_s7 + $0x328] ss:$16 sps:$4 sm:$0xff]   ;;  %v10572_v63 = vld [vmem:[%s15115_s7 + $0x344] ss:$16 sps:$4 sm:$0xff]  }
 0x2fe   : > { %2688 = vmatprep.mubr.bf16.mxu0 %v1863_v18  ;;  %2774 = vmatprep.mubr.bf16.mxu1 %v1863_v18  ;;  %v10575_v1 = vld [vmem:[%s15115_s7 + $0x34c] ss:$16 sps:$4 sm:$0xff]   ;;  %v10570_v2 = vld [vmem:[%s15115_s7 + $0x340] ss:$16 sps:$4 sm:$0xff]   ;;  %v10573_v3 = vld [vmem:[%s15115_s7 + $0x348] ss:$16 sps:$4 sm:$0xff]  }
 0x2ff   : > { %2689 = vmatmul.mubr.bf16.vlgmr.msra.gmra.mrb[12].mxu0 %v1862_v14  ;;  %2775 = vmatmul.mubr.bf16.vlgmr.msra.gmra.mrb[8].mxu1 %v1862_v14  ;;  %v10578_v4 = vld [vmem:[%s15115_s7 + $0x364] ss:$16 sps:$4 sm:$0xff]   ;;  %v10581_v5 = vld [vmem:[%s15115_s7 + $0x36c] ss:$16 sps:$4 sm:$0xff]   ;;  %v10576_v6 = vld [vmem:[%s15115_s7 + $0x360] ss:$16 sps:$4 sm:$0xff]  }
 0x300   : > { %2700 = vmatpush1.bf16.msra.mxu0 %v10510_v19  ;;  %2786 = vmatpush1.bf16.msra.mxu1 %v10513_v20  ;;  %v10579_v7 = vld [vmem:[%s15115_s7 + $0x368] ss:$16 sps:$4 sm:$0xff]   ;;  %v10584_v8 = vld [vmem:[%s15115_s7 + $0x384] ss:$16 sps:$4 sm:$0xff]   ;;  %v10587_v9 = vld [vmem:[%s15115_s7 + $0x38c] ss:$16 sps:$4 sm:$0xff]  }
 0x301   : > { %2731 = vmatprep.mubr.bf16.mxu0 %v1865_v21  ;;  %2817 = vmatprep.mubr.bf16.mxu1 %v1865_v21  ;;  %v10582_v10 = vld [vmem:[%s15115_s7 + $0x380] ss:$16 sps:$4 sm:$0xff]   ;;  %v10585_v11 = vld [vmem:[%s15115_s7 + $0x388] ss:$16 sps:$4 sm:$0xff]   ;;  %v10590_v12 = vld [vmem:[%s15115_s7 + $0x3a4] ss:$16 sps:$4 sm:$0xff]  }
 0x302   : > { %2701 = vmatprep.subr.bf16.mxu0 %v10518_v22  ;;  %2787 = vmatprep.subr.bf16.mxu1 %v10521_v23  ;;  %v10593_v13 = vld [vmem:[%s15115_s7 + $0x3ac] ss:$16 sps:$4 sm:$0xff]   ;;  %v10588_v14 = vld [vmem:[%s15115_s7 + $0x3a0] ss:$16 sps:$4 sm:$0xff]   ;;  %v10591_v16 = vld [vmem:[%s15115_s7 + $0x3a8] ss:$16 sps:$4 sm:$0xff]  }
 0x303   : > { %v10596_v17 = vld [vmem:[%s15115_s7 + $0x3c4] ss:$16 sps:$4 sm:$0xff]   ;;  %v10599_v18 = vld [vmem:[%s15115_s7 + $0x3cc] ss:$16 sps:$4 sm:$0xff]   ;;  %v10594_v19 = vld [vmem:[%s15115_s7 + $0x3c0] ss:$16 sps:$4 sm:$0xff]  }
 0x304   : > { %2702 = vmatpush1.bf16.msra.mxu0 %v10516_v24  ;;  %2788 = vmatpush1.bf16.msra.mxu1 %v10519_v26  ;;  %v10597_v20 = vld [vmem:[%s15115_s7 + $0x3c8] ss:$16 sps:$4 sm:$0xff]   ;;  %v10602_v21 = vld [vmem:[%s15115_s7 + $0x3e4] ss:$16 sps:$4 sm:$0xff]   ;;  %v10605_v22 = vld [vmem:[%s15115_s7 + $0x3ec] ss:$16 sps:$4 sm:$0xff]  }
 0x305   : > { %2703 = vmatprep.subr.bf16.mxu0 %v10524_v27  ;;  %2789 = vmatprep.subr.bf16.mxu1 %v10527_v28  ;;  %v10600_v23 = vld [vmem:[%s15115_s7 + $0x3e0] ss:$16 sps:$4 sm:$0xff]   ;;  %v10603_v24 = vld [vmem:[%s15115_s7 + $0x3e8] ss:$16 sps:$4 sm:$0xff]  }
 0x306   : > { %v10608_v26 = vld [vmem:[%s15117_s9 + $0x4] ss:$20 sps:$4 sm:$0xff]   ;;  %v10611_v27 = vld [vmem:[%s15117_s9 + $0xc] ss:$20 sps:$4 sm:$0xff]  }
 0x307   : > { %v10606_v28 = vld [vmem:[%s15117_s9] ss:$20 sps:$4 sm:$0xff]  }
 0x308   : > { %2704 = vmatpush1.bf16.msra.mxu0 %v10522_v29  ;;  %2790 = vmatpush1.bf16.msra.mxu1 %v10525_v30  ;;  %v10609_v29 = vld [vmem:[%s15117_s9 + $0x8] ss:$20 sps:$4 sm:$0xff]   ;;  %v10614_v30 = vld [vmem:[%s15117_s9 + $0x2c] ss:$20 sps:$4 sm:$0xff]  }
 0x309   : > { %2705 = vmatprep.subr.bf16.mxu0 %v10530_v31  ;;  %2791 = vmatprep.subr.bf16.mxu1 %v10533_v32  ;;  %v10617_v31 = vld [vmem:[%s15117_s9 + $0x34] ss:$20 sps:$4 sm:$0xff]  }
 0x30a   : > { %v10612_v32 = vld [vmem:[%s15117_s9 + $0x28] ss:$20 sps:$4 sm:$0xff]  }
 0x30c   : > { %2706 = vmatpush1.bf16.msra.mxu0 %v10528_v33  ;;  %2792 = vmatpush1.bf16.msra.mxu1 %v10531_v34  ;;  %v10615_v33 = vld [vmem:[%s15117_s9 + $0x30] ss:$20 sps:$4 sm:$0xff]   ;;  %v10620_v34 = vld [vmem:[%s15117_s9 + $0x54] ss:$20 sps:$4 sm:$0xff]  }
 0x30d   : > { %2707 = vmatprep.subr.bf16.mxu0 %v10536_v35  ;;  %2793 = vmatprep.subr.bf16.mxu1 %v10539_v36  ;;  %v10618_v35 = vld [vmem:[%s15117_s9 + $0x50] ss:$20 sps:$4 sm:$0xff]   ;;  %v10621_v36 = vld [vmem:[%s15117_s9 + $0x58] ss:$20 sps:$4 sm:$0xff]  }
 0x310   : > { %2708 = vmatpush1.bf16.msra.mxu0 %v10534_v37  ;;  %2794 = vmatpush1.bf16.msra.mxu1 %v10537_v38  ;;  %v10626_v37 = vld [vmem:[%s15117_s9 + $0x7c] ss:$20 sps:$4 sm:$0xff]   ;;  %v10629_v38 = vld [vmem:[%s15117_s9 + $0x84] ss:$20 sps:$4 sm:$0xff]  }
 0x311   : > { %2709 = vmatprep.subr.bf16.mxu0 %v10542_v40  ;;  %2795 = vmatprep.subr.bf16.mxu1 %v10545_v41  ;;  %v10624_v40 = vld [vmem:[%s15117_s9 + $0x78] ss:$20 sps:$4 sm:$0xff]   ;;  %v10627_v41 = vld [vmem:[%s15117_s9 + $0x80] ss:$20 sps:$4 sm:$0xff]  }
 0x314   : > { %2710 = vmatpush1.bf16.msra.mxu0 %v10540_v42  ;;  %2796 = vmatpush1.bf16.msra.mxu1 %v10543_v43  ;;  %v10632_v42 = vld [vmem:[%s15117_s9 + $0xa4] ss:$20 sps:$4 sm:$0xff]   ;;  %v10635_v43 = vld [vmem:[%s15117_s9 + $0xac] ss:$20 sps:$4 sm:$0xff]  }
 0x315   : > { %2711 = vmatprep.subr.bf16.mxu0 %v10548_v44  ;;  %2797 = vmatprep.subr.bf16.mxu1 %v10551_v45  ;;  %v10630_v44 = vld [vmem:[%s15117_s9 + $0xa0] ss:$20 sps:$4 sm:$0xff]   ;;  %v10633_v45 = vld [vmem:[%s15117_s9 + $0xa8] ss:$20 sps:$4 sm:$0xff]  }
 0x318   : > { %2712 = vmatpush1.bf16.msra.mxu0 %v10546_v46  ;;  %2798 = vmatpush1.bf16.msra.mxu1 %v10549_v47  ;;  %v10638_v46 = vld [vmem:[%s15117_s9 + $0xcc] ss:$20 sps:$4 sm:$0xff]   ;;  %v10641_v47 = vld [vmem:[%s15117_s9 + $0xd4] ss:$20 sps:$4 sm:$0xff]  }
 0x319   : > { %2713 = vmatprep.subr.bf16.mxu0 %v10554_v48  ;;  %2799 = vmatprep.subr.bf16.mxu1 %v10557_v49  ;;  %v10636_v48 = vld [vmem:[%s15117_s9 + $0xc8] ss:$20 sps:$4 sm:$0xff]   ;;  %v10639_v49 = vld [vmem:[%s15117_s9 + $0xd0] ss:$20 sps:$4 sm:$0xff]  }
 0x31c   : > { %2714 = vmatpush1.bf16.msra.mxu0 %v10552_v50  ;;  %2800 = vmatpush1.bf16.msra.mxu1 %v10555_v51  ;;  %v10644_v50 = vld [vmem:[%s15117_s9 + $0xf4] ss:$20 sps:$4 sm:$0xff]   ;;  %v10647_v51 = vld [vmem:[%s15117_s9 + $0xfc] ss:$20 sps:$4 sm:$0xff]  }
 0x31d   : > { %2715 = vmatprep.subr.bf16.mxu0 %v10560_v52  ;;  %2801 = vmatprep.subr.bf16.mxu1 %v10563_v53  ;;  %v10642_v52 = vld [vmem:[%s15117_s9 + $0xf0] ss:$20 sps:$4 sm:$0xff]   ;;  %v10645_v53 = vld [vmem:[%s15117_s9 + $0xf8] ss:$20 sps:$4 sm:$0xff]  }
 0x320   : > { %2716 = vmatpush1.bf16.msra.mxu0 %v10558_v54  ;;  %2802 = vmatpush1.bf16.msra.mxu1 %v10561_v55  ;;  %v10650_v54 = vld [vmem:[%s15117_s9 + $0x11c] ss:$20 sps:$4 sm:$0xff]   ;;  %v10653_v55 = vld [vmem:[%s15117_s9 + $0x124] ss:$20 sps:$4 sm:$0xff]  }
 0x321   : > { %2717 = vmatprep.subr.bf16.mxu0 %v10566_v56  ;;  %2803 = vmatprep.subr.bf16.mxu1 %v10569_v57  ;;  %v10648_v56 = vld [vmem:[%s15117_s9 + $0x118] ss:$20 sps:$4 sm:$0xff]   ;;  %v10651_v57 = vld [vmem:[%s15117_s9 + $0x120] ss:$20 sps:$4 sm:$0xff]  }
 0x324   : > { %2718 = vmatpush1.bf16.msra.mxu0 %v10564_v58  ;;  %2804 = vmatpush1.bf16.msra.mxu1 %v10567_v60  ;;  %v10656_v58 = vld [vmem:[%s15117_s9 + $0x144] ss:$20 sps:$4 sm:$0xff]   ;;  %v10659_v60 = vld [vmem:[%s15117_s9 + $0x14c] ss:$20 sps:$4 sm:$0xff]  }
 0x325   : > { %2719 = vmatprep.subr.bf16.mxu0 %v10572_v63  ;;  %2805 = vmatprep.subr.bf16.mxu1 %v10575_v1  ;;  %v10654_v63 = vld [vmem:[%s15117_s9 + $0x140] ss:$20 sps:$4 sm:$0xff]   ;;  %v10657_v1 = vld [vmem:[%s15117_s9 + $0x148] ss:$20 sps:$4 sm:$0xff]  }
 0x328   : > { %2720 = vmatpush1.bf16.msra.mxu0 %v10570_v2  ;;  %2806 = vmatpush1.bf16.msra.mxu1 %v10573_v3  ;;  %v10662_v2 = vld [vmem:[%s15117_s9 + $0x16c] ss:$20 sps:$4 sm:$0xff]   ;;  %v10665_v3 = vld [vmem:[%s15117_s9 + $0x174] ss:$20 sps:$4 sm:$0xff]  }
 0x329   : > { %2721 = vmatprep.subr.bf16.mxu0 %v10578_v4  ;;  %2807 = vmatprep.subr.bf16.mxu1 %v10581_v5  ;;  %v10660_v4 = vld [vmem:[%s15117_s9 + $0x168] ss:$20 sps:$4 sm:$0xff]   ;;  %v10663_v5 = vld [vmem:[%s15117_s9 + $0x170] ss:$20 sps:$4 sm:$0xff]  }
 0x32c   : > { %2722 = vmatpush1.bf16.msra.mxu0 %v10576_v6  ;;  %2808 = vmatpush1.bf16.msra.mxu1 %v10579_v7  ;;  %v10668_v6 = vld [vmem:[%s15117_s9 + $0x194] ss:$20 sps:$4 sm:$0xff]   ;;  %v10671_v7 = vld [vmem:[%s15117_s9 + $0x19c] ss:$20 sps:$4 sm:$0xff]  }
 0x32d   : > { %2723 = vmatprep.subr.bf16.mxu0 %v10584_v8  ;;  %2809 = vmatprep.subr.bf16.mxu1 %v10587_v9  ;;  %v10666_v8 = vld [vmem:[%s15117_s9 + $0x190] ss:$20 sps:$4 sm:$0xff]   ;;  %v10669_v9 = vld [vmem:[%s15117_s9 + $0x198] ss:$20 sps:$4 sm:$0xff]  }
 0x330   : > { %2724 = vmatpush1.bf16.msra.mxu0 %v10582_v10  ;;  %2810 = vmatpush1.bf16.msra.mxu1 %v10585_v11  ;;  %v10674_v10 = vld [vmem:[%s15117_s9 + $0x1bc] ss:$20 sps:$4 sm:$0xff]   ;;  %v10677_v11 = vld [vmem:[%s15117_s9 + $0x1c4] ss:$20 sps:$4 sm:$0xff]  }
 0x331   : > { %2725 = vmatprep.subr.bf16.mxu0 %v10590_v12  ;;  %2811 = vmatprep.subr.bf16.mxu1 %v10593_v13  ;;  %v10672_v12 = vld [vmem:[%s15117_s9 + $0x1b8] ss:$20 sps:$4 sm:$0xff]   ;;  %v10675_v13 = vld [vmem:[%s15117_s9 + $0x1c0] ss:$20 sps:$4 sm:$0xff]  }
 0x334   : > { %2726 = vmatpush1.bf16.msra.mxu0 %v10588_v14  ;;  %2812 = vmatpush1.bf16.msra.mxu1 %v10591_v16  ;;  %v10680_v14 = vld [vmem:[%s15117_s9 + $0x1e4] ss:$20 sps:$4 sm:$0xff]   ;;  %v10683_v16 = vld [vmem:[%s15117_s9 + $0x1ec] ss:$20 sps:$4 sm:$0xff]  }
 0x335   : > { %2727 = vmatprep.subr.bf16.mxu0 %v10596_v17  ;;  %2813 = vmatprep.subr.bf16.mxu1 %v10599_v18  ;;  %v10678_v17 = vld [vmem:[%s15117_s9 + $0x1e0] ss:$20 sps:$4 sm:$0xff]   ;;  %v10681_v18 = vld [vmem:[%s15117_s9 + $0x1e8] ss:$20 sps:$4 sm:$0xff]  }
 0x338   : > { %2728 = vmatpush1.bf16.msra.mxu0 %v10594_v19  ;;  %2814 = vmatpush1.bf16.msra.mxu1 %v10597_v20  ;;  %v10686_v19 = vld [vmem:[%s15117_s9 + $0x20c] ss:$20 sps:$4 sm:$0xff]   ;;  %v10689_v20 = vld [vmem:[%s15117_s9 + $0x214] ss:$20 sps:$4 sm:$0xff]  }
 0x339   : > { %2729 = vmatprep.subr.bf16.mxu0 %v10602_v21  ;;  %2815 = vmatprep.subr.bf16.mxu1 %v10605_v22  ;;  %v10684_v21 = vld [vmem:[%s15117_s9 + $0x208] ss:$20 sps:$4 sm:$0xff]   ;;  %v10687_v22 = vld [vmem:[%s15117_s9 + $0x210] ss:$20 sps:$4 sm:$0xff]  }
 0x33c   : > { %2730 = vmatpush1.bf16.msra.mxu0 %v10600_v23  ;;  %2816 = vmatpush1.bf16.msra.mxu1 %v10603_v24  ;;  %v10692_v23 = vld [vmem:[%s15117_s9 + $0x234] ss:$20 sps:$4 sm:$0xff]   ;;  %v10695_v24 = vld [vmem:[%s15117_s9 + $0x23c] ss:$20 sps:$4 sm:$0xff]  }
 0x33d   : > { %3907 = vmatprep.subr.bf16.mxu0 %v10608_v26  ;;  %3993 = vmatprep.subr.bf16.mxu1 %v10611_v27  ;;  %v10690_v26 = vld [vmem:[%s15117_s9 + $0x230] ss:$20 sps:$4 sm:$0xff]   ;;  %v10693_v27 = vld [vmem:[%s15117_s9 + $0x238] ss:$20 sps:$4 sm:$0xff]  }
 0x33f   : > { %2732 = vmatmul.mubr.bf16.vlgmr.msra.gmra.mrb[12].mxu0 %v12474_v15  ;;  %2818 = vmatmul.mubr.bf16.vlgmr.msra.gmra.mrb[8].mxu1 %v12474_v15  ;;  %v10623_v15 = vld [vmem:[%s15117_s9 + $0x5c] ss:$20 sps:$4 sm:$0xff]  }
 0x340   : > { %3908 = vmatpush1.bf16.msra.mxu0 %v10606_v28  ;;  %3994 = vmatpush1.bf16.msra.mxu1 %v10609_v29  ;;  %v10698_v28 = vld [vmem:[%s15117_s9 + $0x25c] ss:$20 sps:$4 sm:$0xff]   ;;  %v10701_v29 = vld [vmem:[%s15117_s9 + $0x264] ss:$20 sps:$4 sm:$0xff]  }
 0x341   : > { %3909 = vmatprep.subr.bf16.mxu0 %v10614_v30  ;;  %3995 = vmatprep.subr.bf16.mxu1 %v10617_v31  ;;  %v10696_v30 = vld [vmem:[%s15117_s9 + $0x258] ss:$20 sps:$4 sm:$0xff]   ;;  %v10699_v31 = vld [vmem:[%s15117_s9 + $0x260] ss:$20 sps:$4 sm:$0xff]  }
 0x344   : > { %3910 = vmatpush1.bf16.msra.mxu0 %v10612_v32  ;;  %3996 = vmatpush1.bf16.msra.mxu1 %v10615_v33  ;;  %v10704_v32 = vld [vmem:[%s15117_s9 + $0x284] ss:$20 sps:$4 sm:$0xff]   ;;  %v10707_v33 = vld [vmem:[%s15117_s9 + $0x28c] ss:$20 sps:$4 sm:$0xff]  }
 0x345   : > { %3911 = vmatprep.subr.bf16.mxu0 %v10620_v34  ;;  %3997 = vmatprep.subr.bf16.mxu1 %v10623_v15  ;;  %v1994_v34 = vld [vmem:[%s15116_s8] sm:$0xf] }
 0x346   : > { %v1999_v15 = vrot.slane %v1994_v34, %v11960_v61 }
 0x348   : > { %3912 = vmatpush1.bf16.msra.mxu0 %v10618_v35  ;;  %3998 = vmatpush1.bf16.msra.mxu1 %v10621_v36  ;;  %v2007_v35 = vrot.slane %v1994_v34, %v12163_v25  ;;  %v2003_v36 = vrot.slane %v1994_v34, %v11963_v62 }
 0x349   : > { %3913 = vmatprep.subr.bf16.mxu0 %v10626_v37  ;;  %3999 = vmatprep.subr.bf16.mxu1 %v10629_v38  ;;  %v2011_v37 = vrot.slane %v1994_v34, %v12466_v39  ;;  %v10729_v34 = vld [vmem:[%s15117_s9 + $0x328] ss:$20 sps:$4 sm:$0xff]  }
 0x34c   : > { %3914 = vmatpush1.bf16.msra.mxu0 %v10624_v40  ;;  %4000 = vmatpush1.bf16.msra.mxu1 %v10627_v41 }
 0x34d   : > { %3915 = vmatprep.subr.bf16.mxu0 %v10632_v42  ;;  %4001 = vmatprep.subr.bf16.mxu1 %v10635_v43 }
 0x350   : > { %3916 = vmatpush1.bf16.msra.mxu0 %v10630_v44  ;;  %4002 = vmatpush1.bf16.msra.mxu1 %v10633_v45 }
 0x351   : > { %3917 = vmatprep.subr.bf16.mxu0 %v10638_v46  ;;  %4003 = vmatprep.subr.bf16.mxu1 %v10641_v47 }
 0x354   : > { %3918 = vmatpush1.bf16.msra.mxu0 %v10636_v48  ;;  %4004 = vmatpush1.bf16.msra.mxu1 %v10639_v49 }
 0x355   : > { %3919 = vmatprep.subr.bf16.mxu0 %v10644_v50  ;;  %4005 = vmatprep.subr.bf16.mxu1 %v10647_v51 }
 0x358   : > { %3920 = vmatpush1.bf16.msra.mxu0 %v10642_v52  ;;  %4006 = vmatpush1.bf16.msra.mxu1 %v10645_v53 }
 0x359   : > { %3921 = vmatprep.subr.bf16.mxu0 %v10650_v54  ;;  %4007 = vmatprep.subr.bf16.mxu1 %v10653_v55 }
 0x35c   : > { %3922 = vmatpush1.bf16.msra.mxu0 %v10648_v56  ;;  %4008 = vmatpush1.bf16.msra.mxu1 %v10651_v57 }
 0x35d   : > { %3923 = vmatprep.subr.bf16.mxu0 %v10656_v58  ;;  %4009 = vmatprep.subr.bf16.mxu1 %v10659_v60 }
 0x360   : > { %3924 = vmatpush1.bf16.msra.mxu0 %v10654_v63  ;;  %4010 = vmatpush1.bf16.msra.mxu1 %v10657_v1 }
 0x361   : > { %3925 = vmatprep.subr.bf16.mxu0 %v10662_v2  ;;  %4011 = vmatprep.subr.bf16.mxu1 %v10665_v3 }
 0x364   : > { %3926 = vmatpush1.bf16.msra.mxu0 %v10660_v4  ;;  %4012 = vmatpush1.bf16.msra.mxu1 %v10663_v5 }
 0x365   : > { %3927 = vmatprep.subr.bf16.mxu0 %v10668_v6  ;;  %4013 = vmatprep.subr.bf16.mxu1 %v10671_v7 }
 0x368   : > { %3928 = vmatpush1.bf16.msra.mxu0 %v10666_v8  ;;  %4014 = vmatpush1.bf16.msra.mxu1 %v10669_v9 }
 0x369   : > { %3929 = vmatprep.subr.bf16.mxu0 %v10674_v10  ;;  %4015 = vmatprep.subr.bf16.mxu1 %v10677_v11 }
 0x36c   : > { %3930 = vmatpush1.bf16.msra.mxu0 %v10672_v12  ;;  %4016 = vmatpush1.bf16.msra.mxu1 %v10675_v13 }
 0x36d   : > { %3931 = vmatprep.subr.bf16.mxu0 %v10680_v14  ;;  %4017 = vmatprep.subr.bf16.mxu1 %v10683_v16  ;;  %v10702_v14 = vld [vmem:[%s15117_s9 + $0x280] ss:$20 sps:$4 sm:$0xff]   ;;  %v10705_v16 = vld [vmem:[%s15117_s9 + $0x288] ss:$20 sps:$4 sm:$0xff]  }
 0x370   : > { %3932 = vmatpush1.bf16.msra.mxu0 %v10678_v17  ;;  %4018 = vmatpush1.bf16.msra.mxu1 %v10681_v18  ;;  %v10710_v18 = vld [vmem:[%s15117_s9 + $0x2ac] ss:$20 sps:$4 sm:$0xff]  }
 0x371   : > { %3933 = vmatprep.subr.bf16.mxu0 %v10686_v19  ;;  %4019 = vmatprep.subr.bf16.mxu1 %v10689_v20  ;;  %v10713_v19 = vld [vmem:[%s15117_s9 + $0x2b4] ss:$20 sps:$4 sm:$0xff]  }
 0x372   : > { %v10708_v20 = vld [vmem:[%s15117_s9 + $0x2a8] ss:$20 sps:$4 sm:$0xff]  }
 0x374   : > { %3934 = vmatpush1.bf16.msra.mxu0 %v10684_v21  ;;  %4020 = vmatpush1.bf16.msra.mxu1 %v10687_v22  ;;  %v10711_v21 = vld [vmem:[%s15117_s9 + $0x2b0] ss:$20 sps:$4 sm:$0xff]   ;;  %v10716_v22 = vld [vmem:[%s15117_s9 + $0x2d4] ss:$20 sps:$4 sm:$0xff]  }
 0x375   : > { %3935 = vmatprep.subr.bf16.mxu0 %v10692_v23  ;;  %4021 = vmatprep.subr.bf16.mxu1 %v10695_v24  ;;  %v10719_v23 = vld [vmem:[%s15117_s9 + $0x2dc] ss:$20 sps:$4 sm:$0xff]  }
 0x376   : > { %v10714_v24 = vld [vmem:[%s15117_s9 + $0x2d0] ss:$20 sps:$4 sm:$0xff]  }
 0x378   : > { %3936 = vmatpush1.bf16.msra.mxu0 %v10690_v26  ;;  %4022 = vmatpush1.bf16.msra.mxu1 %v10693_v27  ;;  %v10717_v26 = vld [vmem:[%s15117_s9 + $0x2d8] ss:$20 sps:$4 sm:$0xff]   ;;  %v10722_v27 = vld [vmem:[%s15117_s9 + $0x2fc] ss:$20 sps:$4 sm:$0xff]  }
 0x379   : > { %3937 = vmatprep.subr.bf16.mxu0 %v10698_v28  ;;  %4023 = vmatprep.subr.bf16.mxu1 %v10701_v29  ;;  %v10725_v28 = vld [vmem:[%s15117_s9 + $0x304] ss:$20 sps:$4 sm:$0xff]  }
 0x37a   : > { %v10720_v29 = vld [vmem:[%s15117_s9 + $0x2f8] ss:$20 sps:$4 sm:$0xff]  }
 0x37c   : > { %3938 = vmatpush1.bf16.msra.mxu0 %v10696_v30  ;;  %4024 = vmatpush1.bf16.msra.mxu1 %v10699_v31  ;;  %v10723_v30 = vld [vmem:[%s15117_s9 + $0x300] ss:$20 sps:$4 sm:$0xff]   ;;  %v10728_v31 = vld [vmem:[%s15117_s9 + $0x324] ss:$20 sps:$4 sm:$0xff]  }
 0x37d   : > { %3950 = vmatprep.subr.bf16.mxu0 %v10704_v32  ;;  %4036 = vmatprep.subr.bf16.mxu1 %v10707_v33  ;;  %v10731_v32 = vld [vmem:[%s15117_s9 + $0x32c] ss:$20 sps:$4 sm:$0xff]  }
 0x37e   : > { %v10726_v33 = vld [vmem:[%s15117_s9 + $0x320] ss:$20 sps:$4 sm:$0xff]  }
 0x412   : > { %v2733_v38 = vpop.f32.mrb[12].mxu0  ;;  %v2819_v40 = vpop.f32.mrb[8].mxu1 }
 0x413   : > { %v10036_v41 = vadd.f32 %v2733_v38, %v1999_v15  ;;  %v10040_v42 = vadd.f32 %v2819_v40, %v2007_v35  ;;  %v2735_v43 = vpop.f32.mrb[13].mxu0  ;;  %v2821_v44 = vpop.f32.mrb[9].mxu1  ;;  %v10740_v38 = vld [vmem:[%s15117_s9 + $0x374] ss:$20 sps:$4 sm:$0xff]   ;;  %v10743_v40 = vld [vmem:[%s15117_s9 + $0x37c] ss:$20 sps:$4 sm:$0xff]  }
 0x414   : > { %v10037_v45 = vadd.f32 %v2735_v43, %v2003_v36  ;;  %v10041_v46 = vadd.f32 %v2821_v44, %v2011_v37  ;;  %v2737_v47 = vpop.f32.mrb[14].mxu0  ;;  %v2823_v48 = vpop.f32.mrb[10].mxu1  ;;  %v10746_v43 = vld [vmem:[%s15117_s9 + $0x39c] ss:$20 sps:$4 sm:$0xff]   ;;  %v10749_v44 = vld [vmem:[%s15117_s9 + $0x3a4] ss:$20 sps:$4 sm:$0xff]  }
 0x415   : > { %vm2828_vm4 = vcmp.ge.f32.partialorder %v10036_v41, 0.0  ;;  %v2836_v49 = vmul.f32 0.01, %v10036_v41  ;;  %vm2830_vm5 = vcmp.ge.f32.partialorder %v10040_v42, 0.0  ;;  %v2838_v50 = vmul.f32 0.01, %v10040_v42 }
 0x416   : > { %vm2829_vm6 = vcmp.ge.f32.partialorder %v10037_v45, 0.0  ;;  %v2837_v51 = vmul.f32 0.01, %v10037_v45  ;;  %vm2831_vm7 = vcmp.ge.f32.partialorder %v10041_v46, 0.0  ;;  %v2839_v52 = vmul.f32 0.01, %v10041_v46 }
 0x417   : > { %v10038_v53 = vadd.f32 %v2737_v47, %v1999_v15  ;;  %v10042_v54 = vadd.f32 %v2823_v48, %v2007_v35  ;;  %v2739_v55 = vpop.f32.mrb[15].mxu0  ;;  %v2825_v56 = vpop.f32.mrb[11].mxu1  ;;  %v2844_v57 = vsel %vm2828_vm4, %v10036_v41, %v2836_v49  ;;  %v2846_v58 = vsel %vm2830_vm5, %v10040_v42, %v2838_v50  ;;  %v10734_v15 = vld [vmem:[%s15117_s9 + $0x34c] ss:$20 sps:$4 sm:$0xff]   ;;  %v10737_v35 = vld [vmem:[%s15117_s9 + $0x354] ss:$20 sps:$4 sm:$0xff]  }
 0x418   : > { %v10039_v60 = vadd.f32 %v2739_v55, %v2003_v36  ;;  %v10043_v63 = vadd.f32 %v2825_v56, %v2011_v37  ;;  %v2845_v7 = vsel %vm2829_vm6, %v10037_v45, %v2837_v51  ;;  %v2847_v8 = vsel %vm2831_vm7, %v10041_v46, %v2839_v52  ;;  %v10732_v36 = vld [vmem:[%s15117_s9 + $0x348] ss:$20 sps:$4 sm:$0xff]   ;;  %v10735_v37 = vld [vmem:[%s15117_s9 + $0x350] ss:$20 sps:$4 sm:$0xff]   ;;  %v10741_v42 = vld [vmem:[%s15117_s9 + $0x378] ss:$20 sps:$4 sm:$0xff]  }
 0x419   : > { %vm2832_vm8 = vcmp.ge.f32.partialorder %v10038_v53, 0.0  ;;  %v2840_v1 = vmul.f32 0.01, %v10038_v53  ;;  %vm2834_vm9 = vcmp.ge.f32.partialorder %v10042_v54, 0.0  ;;  %v2842_v2 = vmul.f32 0.01, %v10042_v54 }
 0x41a   : > { %vm2833_vm10 = vcmp.ge.f32.partialorder %v10039_v60, 0.0  ;;  %v2841_v3 = vmul.f32 0.01, %v10039_v60  ;;  %vm2835_vm11 = vcmp.ge.f32.partialorder %v10043_v63, 0.0  ;;  %v2843_v4 = vmul.f32 0.01, %v10043_v63 }
 0x41b   : > { %v2848_v5 = vsel %vm2832_vm8, %v10038_v53, %v2840_v1  ;;  %v2850_v6 = vsel %vm2834_vm9, %v10042_v54, %v2842_v2  ;;  %v10738_v41 = vld [vmem:[%s15117_s9 + $0x370] ss:$20 sps:$4 sm:$0xff]   ;;  %v10744_v45 = vld [vmem:[%s15117_s9 + $0x398] ss:$20 sps:$4 sm:$0xff]   ;;  %v10747_v46 = vld [vmem:[%s15117_s9 + $0x3a0] ss:$20 sps:$4 sm:$0xff]  }
 0x41c   : > { %v12871_v9 = vpack.c.bf16 %v2848_v5, %v2844_v57  ;;  %v12873_v10 = vpack.c.bf16 %v2850_v6, %v2846_v58  ;;  %v2849_v11 = vsel %vm2833_vm10, %v10039_v60, %v2841_v3  ;;  %v2851_v12 = vsel %vm2835_vm11, %v10043_v63, %v2843_v4  ;;  %v10752_v47 = vld [vmem:[%s15117_s9 + $0x3c4] ss:$20 sps:$4 sm:$0xff]   ;;  %v10755_v48 = vld [vmem:[%s15117_s9 + $0x3cc] ss:$20 sps:$4 sm:$0xff]   ;;  %v10753_v50 = vld [vmem:[%s15117_s9 + $0x3c8] ss:$20 sps:$4 sm:$0xff]  }
 0x41d   : > { %v12875_v13 = vpack.c.bf16 %v2849_v11, %v2845_v7  ;;  %v12883_v17 = vpack.c.bf16 %v2851_v12, %v2847_v8  ;;  %v10750_v49 = vld [vmem:[%s15117_s9 + $0x3c0] ss:$20 sps:$4 sm:$0xff]   ;;  %v10756_v53 = vld [vmem:[%s15117_s9 + $0x3e8] ss:$20 sps:$4 sm:$0xff]   ;;  %v10759_v54 = vld [vmem:[%s15117_s9 + $0x3f0] ss:$20 sps:$4 sm:$0xff]  }
 0x41e   : > { %v10758_v51 = vld [vmem:[%s15117_s9 + $0x3ec] ss:$20 sps:$4 sm:$0xff]   ;;  %v10761_v52 = vld [vmem:[%s15117_s9 + $0x3f4] ss:$20 sps:$4 sm:$0xff]   ;;  %v10767_v56 = vld [vmem:[%s15117_s9 + $0x41c] ss:$20 sps:$4 sm:$0xff]  }
 0x41f   : > { %3939 = vmatprep.mubr.bf16.mxu0 %v12875_v13  ;;  %4025 = vmatprep.mubr.bf16.mxu1 %v12875_v13  ;;  %v10764_v55 = vld [vmem:[%s15117_s9 + $0x414] ss:$20 sps:$4 sm:$0xff]   ;;  %v10762_v57 = vld [vmem:[%s15117_s9 + $0x410] ss:$20 sps:$4 sm:$0xff]   ;;  %v10765_v58 = vld [vmem:[%s15117_s9 + $0x418] ss:$20 sps:$4 sm:$0xff]  }
 0x420   : > { %3940 = vmatmul.mubr.bf16.vlgmr.msra.gmra.mrb[16].mxu0 %v12871_v9  ;;  %4026 = vmatmul.mubr.bf16.vlgmr.msra.gmra.mrb[12].mxu1 %v12871_v9  ;;  %v10770_v60 = vld [vmem:[%s15117_s9 + $0x43c] ss:$20 sps:$4 sm:$0xff]   ;;  %v10773_v63 = vld [vmem:[%s15117_s9 + $0x444] ss:$20 sps:$4 sm:$0xff]   ;;  %v10771_v2 = vld [vmem:[%s15117_s9 + $0x440] ss:$20 sps:$4 sm:$0xff]  }
 0x421   : > { %3951 = vmatpush1.bf16.msra.mxu0 %v10702_v14  ;;  %4037 = vmatpush1.bf16.msra.mxu1 %v10705_v16  ;;  %v10768_v1 = vld [vmem:[%s15117_s9 + $0x438] ss:$20 sps:$4 sm:$0xff]   ;;  %v10774_v5 = vld [vmem:[%s15117_s9 + $0x460] ss:$20 sps:$4 sm:$0xff]   ;;  %v10777_v6 = vld [vmem:[%s15117_s9 + $0x468] ss:$20 sps:$4 sm:$0xff]  }
 0x422   : > { %3982 = vmatprep.mubr.bf16.mxu0 %v12883_v17  ;;  %4068 = vmatprep.mubr.bf16.mxu1 %v12883_v17  ;;  %v10776_v3 = vld [vmem:[%s15117_s9 + $0x464] ss:$20 sps:$4 sm:$0xff]   ;;  %v10779_v4 = vld [vmem:[%s15117_s9 + $0x46c] ss:$20 sps:$4 sm:$0xff]   ;;  %v10785_v8 = vld [vmem:[%s15117_s9 + $0x494] ss:$20 sps:$4 sm:$0xff]  }
 0x423   : > { %3952 = vmatprep.subr.bf16.mxu0 %v10710_v18  ;;  %4038 = vmatprep.subr.bf16.mxu1 %v10713_v19  ;;  %v10782_v7 = vld [vmem:[%s15117_s9 + $0x48c] ss:$20 sps:$4 sm:$0xff]   ;;  %v10780_v11 = vld [vmem:[%s15117_s9 + $0x488] ss:$20 sps:$4 sm:$0xff]   ;;  %v10783_v12 = vld [vmem:[%s15117_s9 + $0x490] ss:$20 sps:$4 sm:$0xff]  }
 0x424   : > { %v10788_v14 = vld [vmem:[%s15117_s9 + $0x4b4] ss:$20 sps:$4 sm:$0xff]   ;;  %v10791_v16 = vld [vmem:[%s15117_s9 + $0x4bc] ss:$20 sps:$4 sm:$0xff]   ;;  %v10789_v19 = vld [vmem:[%s15117_s9 + $0x4b8] ss:$20 sps:$4 sm:$0xff]  }
 0x425   : > { %3953 = vmatpush1.bf16.msra.mxu0 %v10708_v20  ;;  %4039 = vmatpush1.bf16.msra.mxu1 %v10711_v21  ;;  %v10786_v18 = vld [vmem:[%s15117_s9 + $0x4b0] ss:$20 sps:$4 sm:$0xff]  }
 0x426   : > { %3954 = vmatprep.subr.bf16.mxu0 %v10716_v22  ;;  %4040 = vmatprep.subr.bf16.mxu1 %v10719_v23  ;;  %v10794_v20 = vld [vmem:[%s15117_s9 + $0x4dc] ss:$20 sps:$4 sm:$0xff]   ;;  %v10797_v21 = vld [vmem:[%s15117_s9 + $0x4e4] ss:$20 sps:$4 sm:$0xff]   ;;  %v10795_v23 = vld [vmem:[%s15117_s9 + $0x4e0] ss:$20 sps:$4 sm:$0xff]  }
 0x427   : > { %v10792_v22 = vld [vmem:[%s15117_s9 + $0x4d8] ss:$20 sps:$4 sm:$0xff]  }
 0x429   : > { %3955 = vmatpush1.bf16.msra.mxu0 %v10714_v24  ;;  %4041 = vmatpush1.bf16.msra.mxu1 %v10717_v26  ;;  %v10798_v24 = vld [vmem:[%s15117_s9 + $0x150] ss:$20 sps:$4 sm:$0xff]  }
 0x42a   : > { %3956 = vmatprep.subr.bf16.mxu0 %v10722_v27  ;;  %4042 = vmatprep.subr.bf16.mxu1 %v10725_v28  ;;  %v10799_v26 = vld [vmem:[%s15117_s9 + $0x3d0] ss:$20 sps:$4 sm:$0xff]  }
 0x42b   : > { %v10800_v27 = vld [vmem:[%s15117_s9 + $0x10] ss:$20 sps:$4 sm:$0xff]  }
 0x42c   : > { %v10801_v28 = vld [vmem:[%s15117_s9 + $0x290] ss:$20 sps:$4 sm:$0xff]  }
 0x42d   : > { %3957 = vmatpush1.bf16.msra.mxu0 %v10720_v29  ;;  %4043 = vmatpush1.bf16.msra.mxu1 %v10723_v30  ;;  %v10802_v29 = vld [vmem:[%s15117_s9 + $0x178] ss:$20 sps:$4 sm:$0xff]  }
 0x42e   : > { %3958 = vmatprep.subr.bf16.mxu0 %v10728_v31  ;;  %4044 = vmatprep.subr.bf16.mxu1 %v10731_v32  ;;  %v10803_v30 = vld [vmem:[%s15117_s9 + $0x3f8] ss:$20 sps:$4 sm:$0xff]  }
 0x42f   : > { %v10804_v31 = vld [vmem:[%s15117_s9 + $0x38] ss:$20 sps:$4 sm:$0xff]  }
 0x430   : > { %v10805_v32 = vld [vmem:[%s15117_s9 + $0x2b8] ss:$20 sps:$4 sm:$0xff]  }
 0x431   : > { %3959 = vmatpush1.bf16.msra.mxu0 %v10726_v33  ;;  %4045 = vmatpush1.bf16.msra.mxu1 %v10729_v34  ;;  %v10806_v33 = vld [vmem:[%s15117_s9 + $0x1a0] ss:$20 sps:$4 sm:$0xff]  }
 0x432   : > { %3960 = vmatprep.subr.bf16.mxu0 %v10734_v15  ;;  %4046 = vmatprep.subr.bf16.mxu1 %v10737_v35  ;;  %v10808_v34 = vld [vmem:[%s15117_s9 + $0x60] ss:$20 sps:$4 sm:$0xff]   ;;  %v10810_v15 = vld [vmem:[%s15117_s9 + $0x1c8] ss:$20 sps:$4 sm:$0xff]  }
 0x433   : > { %v10811_v35 = vld [vmem:[%s15117_s9 + $0x448] ss:$20 sps:$4 sm:$0xff]  }
 0x435   : > { %3961 = vmatpush1.bf16.msra.mxu0 %v10732_v36  ;;  %4047 = vmatpush1.bf16.msra.mxu1 %v10735_v37  ;;  %v10812_v36 = vld [vmem:[%s15117_s9 + $0x88] ss:$20 sps:$4 sm:$0xff]  }
 0x436   : > { %3962 = vmatprep.subr.bf16.mxu0 %v10740_v38  ;;  %4048 = vmatprep.subr.bf16.mxu1 %v10743_v40  ;;  %v10813_v37 = vld [vmem:[%s15117_s9 + $0x308] ss:$20 sps:$4 sm:$0xff]   ;;  %v10814_v38 = vld [vmem:[%s15117_s9 + $0x1f0] ss:$20 sps:$4 sm:$0xff]  }
 0x437   : > { %v10815_v40 = vld [vmem:[%s15117_s9 + $0x470] ss:$20 sps:$4 sm:$0xff]  }
 0x439   : > { %3963 = vmatpush1.bf16.msra.mxu0 %v10738_v41  ;;  %4049 = vmatpush1.bf16.msra.mxu1 %v10741_v42  ;;  %v10816_v41 = vld [vmem:[%s15117_s9 + $0xb0] ss:$20 sps:$4 sm:$0xff]  }
 0x43a   : > { %3964 = vmatprep.subr.bf16.mxu0 %v10746_v43  ;;  %4050 = vmatprep.subr.bf16.mxu1 %v10749_v44  ;;  %v10817_v42 = vld [vmem:[%s15117_s9 + $0x330] ss:$20 sps:$4 sm:$0xff]   ;;  %v10818_v43 = vld [vmem:[%s15117_s9 + $0x218] ss:$20 sps:$4 sm:$0xff]  }
 0x43b   : > { %v10819_v44 = vld [vmem:[%s15117_s9 + $0x498] ss:$20 sps:$4 sm:$0xff]  }
 0x43d   : > { %3965 = vmatpush1.bf16.msra.mxu0 %v10744_v45  ;;  %4051 = vmatpush1.bf16.msra.mxu1 %v10747_v46  ;;  %v10820_v45 = vld [vmem:[%s15117_s9 + $0xd8] ss:$20 sps:$4 sm:$0xff]  }
 0x43e   : > { %3966 = vmatprep.subr.bf16.mxu0 %v10752_v47  ;;  %4052 = vmatprep.subr.bf16.mxu1 %v10755_v48  ;;  %v10821_v46 = vld [vmem:[%s15117_s9 + $0x358] ss:$20 sps:$4 sm:$0xff]   ;;  %v10822_v47 = vld [vmem:[%s15117_s9 + $0x240] ss:$20 sps:$4 sm:$0xff]  }
 0x43f   : > { %v10823_v48 = vld [vmem:[%s15117_s9 + $0x4c0] ss:$20 sps:$4 sm:$0xff]  }
 0x441   : > { %3967 = vmatpush1.bf16.msra.mxu0 %v10750_v49  ;;  %4053 = vmatpush1.bf16.msra.mxu1 %v10753_v50  ;;  %v10824_v49 = vld [vmem:[%s15117_s9 + $0x100] ss:$20 sps:$4 sm:$0xff]  }
 0x442   : > { %3968 = vmatprep.subr.bf16.mxu0 %v10758_v51  ;;  %4054 = vmatprep.subr.bf16.mxu1 %v10761_v52  ;;  %v10825_v50 = vld [vmem:[%s15117_s9 + $0x380] ss:$20 sps:$4 sm:$0xff]   ;;  %v10826_v51 = vld [vmem:[%s15117_s9 + $0x268] ss:$20 sps:$4 sm:$0xff]  }
 0x443   : > { %v10827_v52 = vld [vmem:[%s15117_s9 + $0x4e8] ss:$20 sps:$4 sm:$0xff]  }
 0x445   : > { %3969 = vmatpush1.bf16.msra.mxu0 %v10756_v53  ;;  %4055 = vmatpush1.bf16.msra.mxu1 %v10759_v54  ;;  %v10828_v53 = vld [vmem:[%s15117_s9 + $0x128] ss:$20 sps:$4 sm:$0xff]  }
 0x446   : > { %3970 = vmatprep.subr.bf16.mxu0 %v10764_v55  ;;  %4056 = vmatprep.subr.bf16.mxu1 %v10767_v56  ;;  %v10829_v54 = vld [vmem:[%s15117_s9 + $0x3a8] ss:$20 sps:$4 sm:$0xff]   ;;  %v10835_v56 = vld [vmem:[%s15119_s11 + $0xc] ss:$24 sps:$4 sm:$0xff]  }
 0x447   : > { %v10832_v55 = vld [vmem:[%s15119_s11 + $0x4] ss:$24 sps:$4 sm:$0xff]  }
 0x449   : > { %3971 = vmatpush1.bf16.msra.mxu0 %v10762_v57  ;;  %4057 = vmatpush1.bf16.msra.mxu1 %v10765_v58  ;;  %v10830_v57 = vld [vmem:[%s15119_s11] ss:$24 sps:$4 sm:$0xff]  }
 0x44a   : > { %3972 = vmatprep.subr.bf16.mxu0 %v10770_v60  ;;  %4058 = vmatprep.subr.bf16.mxu1 %v10773_v63  ;;  %v10833_v58 = vld [vmem:[%s15119_s11 + $0x8] ss:$24 sps:$4 sm:$0xff]   ;;  %v10838_v60 = vld [vmem:[%s15119_s11 + $0x34] ss:$24 sps:$4 sm:$0xff]  }
 0x44b   : > { %v10841_v63 = vld [vmem:[%s15119_s11 + $0x3c] ss:$24 sps:$4 sm:$0xff]  }
 0x44d   : > { %3973 = vmatpush1.bf16.msra.mxu0 %v10768_v1  ;;  %4059 = vmatpush1.bf16.msra.mxu1 %v10771_v2  ;;  %v10836_v1 = vld [vmem:[%s15119_s11 + $0x30] ss:$24 sps:$4 sm:$0xff]  }
 0x44e   : > { %3974 = vmatprep.subr.bf16.mxu0 %v10776_v3  ;;  %4060 = vmatprep.subr.bf16.mxu1 %v10779_v4  ;;  %v10839_v2 = vld [vmem:[%s15119_s11 + $0x38] ss:$24 sps:$4 sm:$0xff]   ;;  %v10844_v3 = vld [vmem:[%s15119_s11 + $0x64] ss:$24 sps:$4 sm:$0xff]   ;;  %v10845_v4 = vld [vmem:[%s15119_s11 + $0x68] ss:$24 sps:$4 sm:$0xff]  }
 0x451   : > { %3975 = vmatpush1.bf16.msra.mxu0 %v10774_v5  ;;  %4061 = vmatpush1.bf16.msra.mxu1 %v10777_v6  ;;  %v10850_v5 = vld [vmem:[%s15119_s11 + $0x94] ss:$24 sps:$4 sm:$0xff]  }
 0x452   : > { %3976 = vmatprep.subr.bf16.mxu0 %v10782_v7  ;;  %4062 = vmatprep.subr.bf16.mxu1 %v10785_v8  ;;  %v10853_v6 = vld [vmem:[%s15119_s11 + $0x9c] ss:$24 sps:$4 sm:$0xff]   ;;  %v10848_v7 = vld [vmem:[%s15119_s11 + $0x90] ss:$24 sps:$4 sm:$0xff]  }
 0x453   : > { %v10851_v8 = vld [vmem:[%s15119_s11 + $0x98] ss:$24 sps:$4 sm:$0xff]  }
 0x455   : > { %3977 = vmatpush1.bf16.msra.mxu0 %v10780_v11  ;;  %4063 = vmatpush1.bf16.msra.mxu1 %v10783_v12  ;;  %v10856_v11 = vld [vmem:[%s15119_s11 + $0xc4] ss:$24 sps:$4 sm:$0xff]  }
 0x456   : > { %3978 = vmatprep.subr.bf16.mxu0 %v10788_v14  ;;  %4064 = vmatprep.subr.bf16.mxu1 %v10791_v16  ;;  %v10859_v12 = vld [vmem:[%s15119_s11 + $0xcc] ss:$24 sps:$4 sm:$0xff]   ;;  %v10854_v14 = vld [vmem:[%s15119_s11 + $0xc0] ss:$24 sps:$4 sm:$0xff]  }
 0x457   : > { %v10857_v16 = vld [vmem:[%s15119_s11 + $0xc8] ss:$24 sps:$4 sm:$0xff]  }
 0x459   : > { %3979 = vmatpush1.bf16.msra.mxu0 %v10786_v18  ;;  %4065 = vmatpush1.bf16.msra.mxu1 %v10789_v19  ;;  %v10862_v18 = vld [vmem:[%s15119_s11 + $0xf4] ss:$24 sps:$4 sm:$0xff]  }
 0x45a   : > { %3980 = vmatprep.subr.bf16.mxu0 %v10794_v20  ;;  %4066 = vmatprep.subr.bf16.mxu1 %v10797_v21  ;;  %v10865_v19 = vld [vmem:[%s15119_s11 + $0xfc] ss:$24 sps:$4 sm:$0xff]   ;;  %v10860_v20 = vld [vmem:[%s15119_s11 + $0xf0] ss:$24 sps:$4 sm:$0xff]  }
 0x45b   : > { %v10863_v21 = vld [vmem:[%s15119_s11 + $0xf8] ss:$24 sps:$4 sm:$0xff]  }
 0x45d   : > { %3981 = vmatpush1.bf16.msra.mxu0 %v10792_v22  ;;  %4067 = vmatpush1.bf16.msra.mxu1 %v10795_v23  ;;  %v10868_v22 = vld [vmem:[%s15119_s11 + $0x124] ss:$24 sps:$4 sm:$0xff]  }
 0x45e   : > { %9918 = vmatprep.subr.bf16.mxu0 %v10798_v24  ;;  %9940 = vmatprep.subr.bf16.mxu1 %v10799_v26  ;;  %v10871_v23 = vld [vmem:[%s15119_s11 + $0x12c] ss:$24 sps:$4 sm:$0xff]   ;;  %v10866_v24 = vld [vmem:[%s15119_s11 + $0x120] ss:$24 sps:$4 sm:$0xff]  }
 0x45f   : > { %v10869_v26 = vld [vmem:[%s15119_s11 + $0x128] ss:$24 sps:$4 sm:$0xff]  }
 0x460   : > { %3983 = vmatmul.mubr.bf16.vlgmr.msra.gmra.mrb[16].mxu0 %v12873_v10  ;;  %4069 = vmatmul.mubr.bf16.vlgmr.msra.gmra.mrb[12].mxu1 %v12873_v10 }
 0x461   : > { %9919 = vmatpush3.bf16.msra.mxu0 %v10800_v27  ;;  %4111 = vmatprep.mubr.bf16.mxu0 %v12875_v13  ;;  %v10807_v13 = vld [vmem:[%s15117_s9 + $0x420] ss:$20 sps:$4 sm:$0xff]  }
 0x462   : > { %9941 = vmatpush3.bf16.msra.mxu1 %v10801_v28  ;;  %4152 = vmatprep.mubr.bf16.mxu1 %v12883_v17  ;;  %v10809_v17 = vld [vmem:[%s15117_s9 + $0x2e0] ss:$20 sps:$4 sm:$0xff]  }
 0x463   : > { %9920 = vmatprep.subr.bf16.mxu0 %v10802_v29  ;;  %9942 = vmatprep.subr.bf16.mxu1 %v10803_v30  ;;  %v10874_v27 = vld [vmem:[%s15119_s11 + $0x154] ss:$24 sps:$4 sm:$0xff]   ;;  %v10872_v29 = vld [vmem:[%s15119_s11 + $0x150] ss:$24 sps:$4 sm:$0xff]  }
 0x464   : > { %v10877_v28 = vld [vmem:[%s15119_s11 + $0x15c] ss:$24 sps:$4 sm:$0xff]   ;;  %v10875_v30 = vld [vmem:[%s15119_s11 + $0x158] ss:$24 sps:$4 sm:$0xff]  }
 0x465   : > { %9921 = vmatpush3.bf16.msra.mxu0 %v10804_v31  ;;  %v10880_v31 = vld [vmem:[%s15119_s11 + $0x184] ss:$24 sps:$4 sm:$0xff]  }
 0x466   : > { %9943 = vmatpush3.bf16.msra.mxu1 %v10805_v32  ;;  %9922 = vmatprep.subr.bf16.mxu0 %v10806_v33  ;;  %v10883_v32 = vld [vmem:[%s15119_s11 + $0x18c] ss:$24 sps:$4 sm:$0xff]   ;;  %v10878_v33 = vld [vmem:[%s15119_s11 + $0x180] ss:$24 sps:$4 sm:$0xff]  }
 0x467   : > { %9944 = vmatprep.subr.bf16.mxu1 %v10807_v13  ;;  %v10881_v13 = vld [vmem:[%s15119_s11 + $0x188] ss:$24 sps:$4 sm:$0xff]  }
 0x469   : > { %9923 = vmatpush3.bf16.msra.mxu0 %v10808_v34  ;;  %v10886_v34 = vld [vmem:[%s15119_s11 + $0x1b4] ss:$24 sps:$4 sm:$0xff]  }
 0x46a   : > { %9945 = vmatpush3.bf16.msra.mxu1 %v10809_v17  ;;  %9924 = vmatprep.subr.bf16.mxu0 %v10810_v15  ;;  %v10889_v17 = vld [vmem:[%s15119_s11 + $0x1bc] ss:$24 sps:$4 sm:$0xff]   ;;  %v10884_v15 = vld [vmem:[%s15119_s11 + $0x1b0] ss:$24 sps:$4 sm:$0xff]  }
 0x46b   : > { %9946 = vmatprep.subr.bf16.mxu1 %v10811_v35  ;;  %v10887_v35 = vld [vmem:[%s15119_s11 + $0x1b8] ss:$24 sps:$4 sm:$0xff]  }
 0x46d   : > { %9925 = vmatpush3.bf16.msra.mxu0 %v10812_v36  ;;  %v10892_v36 = vld [vmem:[%s15119_s11 + $0x1e4] ss:$24 sps:$4 sm:$0xff]  }
 0x46e   : > { %9947 = vmatpush3.bf16.msra.mxu1 %v10813_v37  ;;  %9926 = vmatprep.subr.bf16.mxu0 %v10814_v38  ;;  %v10895_v37 = vld [vmem:[%s15119_s11 + $0x1ec] ss:$24 sps:$4 sm:$0xff]   ;;  %v10890_v38 = vld [vmem:[%s15119_s11 + $0x1e0] ss:$24 sps:$4 sm:$0xff]  }
 0x46f   : > { %9948 = vmatprep.subr.bf16.mxu1 %v10815_v40  ;;  %v10893_v40 = vld [vmem:[%s15119_s11 + $0x1e8] ss:$24 sps:$4 sm:$0xff]  }
 0x471   : > { %9927 = vmatpush3.bf16.msra.mxu0 %v10816_v41  ;;  %v10898_v41 = vld [vmem:[%s15119_s11 + $0x214] ss:$24 sps:$4 sm:$0xff]  }
 0x472   : > { %9949 = vmatpush3.bf16.msra.mxu1 %v10817_v42  ;;  %9928 = vmatprep.subr.bf16.mxu0 %v10818_v43  ;;  %v10901_v42 = vld [vmem:[%s15119_s11 + $0x21c] ss:$24 sps:$4 sm:$0xff]   ;;  %v10896_v43 = vld [vmem:[%s15119_s11 + $0x210] ss:$24 sps:$4 sm:$0xff]  }
 0x473   : > { %9950 = vmatprep.subr.bf16.mxu1 %v10819_v44  ;;  %v10899_v44 = vld [vmem:[%s15119_s11 + $0x218] ss:$24 sps:$4 sm:$0xff]  }
 0x475   : > { %9929 = vmatpush3.bf16.msra.mxu0 %v10820_v45  ;;  %v10904_v45 = vld [vmem:[%s15119_s11 + $0x244] ss:$24 sps:$4 sm:$0xff]  }
 0x476   : > { %9951 = vmatpush3.bf16.msra.mxu1 %v10821_v46  ;;  %9930 = vmatprep.subr.bf16.mxu0 %v10822_v47  ;;  %v10907_v46 = vld [vmem:[%s15119_s11 + $0x24c] ss:$24 sps:$4 sm:$0xff]   ;;  %v10902_v47 = vld [vmem:[%s15119_s11 + $0x240] ss:$24 sps:$4 sm:$0xff]  }
 0x477   : > { %9952 = vmatprep.subr.bf16.mxu1 %v10823_v48  ;;  %v10905_v48 = vld [vmem:[%s15119_s11 + $0x248] ss:$24 sps:$4 sm:$0xff]  }
 0x479   : > { %9931 = vmatpush3.bf16.msra.mxu0 %v10824_v49  ;;  %v10910_v49 = vld [vmem:[%s15119_s11 + $0x274] ss:$24 sps:$4 sm:$0xff]  }
 0x47a   : > { %9953 = vmatpush3.bf16.msra.mxu1 %v10825_v50  ;;  %9932 = vmatprep.subr.bf16.mxu0 %v10826_v51  ;;  %v10913_v50 = vld [vmem:[%s15119_s11 + $0x27c] ss:$24 sps:$4 sm:$0xff]   ;;  %v10908_v51 = vld [vmem:[%s15119_s11 + $0x270] ss:$24 sps:$4 sm:$0xff]  }
 0x47b   : > { %9954 = vmatprep.subr.bf16.mxu1 %v10827_v52  ;;  %v10911_v52 = vld [vmem:[%s15119_s11 + $0x278] ss:$24 sps:$4 sm:$0xff]  }
 0x47d   : > { %9933 = vmatpush3.bf16.msra.mxu0 %v10828_v53  ;;  %v10916_v53 = vld [vmem:[%s15119_s11 + $0x2a4] ss:$24 sps:$4 sm:$0xff]  }
 0x47e   : > { %9955 = vmatpush3.bf16.msra.mxu1 %v10829_v54  ;;  %5668 = vmatprep.subr.bf16.mxu0 %v10832_v55  ;;  %v10919_v54 = vld [vmem:[%s15119_s11 + $0x2ac] ss:$24 sps:$4 sm:$0xff]   ;;  %v10914_v55 = vld [vmem:[%s15119_s11 + $0x2a0] ss:$24 sps:$4 sm:$0xff]  }
 0x47f   : > { %5797 = vmatprep.subr.bf16.mxu1 %v10835_v56  ;;  %v10917_v56 = vld [vmem:[%s15119_s11 + $0x2a8] ss:$24 sps:$4 sm:$0xff]  }
 0x480   : > { %4112 = vmatmul.mubr.bf16.vlgmr.msra.gmra.mrb[20].mxu0 %v12871_v9  ;;  %v10847_v9 = vld [vmem:[%s15119_s11 + $0x6c] ss:$24 sps:$4 sm:$0xff]  }
 0x481   : > { %4153 = vmatmul.mubr.bf16.vlgmr.msra.gmra.mrb[16].mxu1 %v12873_v10  ;;  %5669 = vmatpush1.bf16.msra.mxu0 %v10830_v57  ;;  %v10842_v10 = vld [vmem:[%s15119_s11 + $0x60] ss:$24 sps:$4 sm:$0xff]   ;;  %v10922_v57 = vld [vmem:[%s15119_s11 + $0x2d4] ss:$24 sps:$4 sm:$0xff]  }
 0x482   : > { %5798 = vmatpush1.bf16.msra.mxu1 %v10833_v58  ;;  %5670 = vmatprep.subr.bf16.mxu0 %v10838_v60  ;;  %v10925_v58 = vld [vmem:[%s15119_s11 + $0x2dc] ss:$24 sps:$4 sm:$0xff]   ;;  %v10920_v60 = vld [vmem:[%s15119_s11 + $0x2d0] ss:$24 sps:$4 sm:$0xff]  }
 0x483   : > { %5799 = vmatprep.subr.bf16.mxu1 %v10841_v63  ;;  %v10923_v63 = vld [vmem:[%s15119_s11 + $0x2d8] ss:$24 sps:$4 sm:$0xff]  }
 0x485   : > { %5671 = vmatpush1.bf16.msra.mxu0 %v10836_v1  ;;  %v10928_v1 = vld [vmem:[%s15119_s11 + $0x304] ss:$24 sps:$4 sm:$0xff]  }
 0x486   : > { %5800 = vmatpush1.bf16.msra.mxu1 %v10839_v2  ;;  %5672 = vmatprep.subr.bf16.mxu0 %v10844_v3  ;;  %v10931_v2 = vld [vmem:[%s15119_s11 + $0x30c] ss:$24 sps:$4 sm:$0xff]  }
 0x487   : > { %5801 = vmatprep.subr.bf16.mxu1 %v10847_v9  ;;  %v13374_v3 = vld [vmem:[%s15118_s10] sm:$0x1f] }
 0x488   : > { %v3053_v9 = vrot.slane %v13374_v3, %v11960_v61 }
 0x489   : > { %5673 = vmatpush1.bf16.msra.mxu0 %v10842_v10  ;;  %v3061_v10 = vrot.slane %v13374_v3, %v12163_v25 }
 0x48a   : > { %5802 = vmatpush1.bf16.msra.mxu1 %v10845_v4  ;;  %5674 = vmatprep.subr.bf16.mxu0 %v10850_v5  ;;  %v3057_v4 = vrot.slane %v13374_v3, %v11963_v62  ;;  %v3065_v5 = vrot.slane %v13374_v3, %v12466_v39 }
 0x48b   : > { %5803 = vmatprep.subr.bf16.mxu1 %v10853_v6 }
 0x48d   : > { %5675 = vmatpush1.bf16.msra.mxu0 %v10848_v7 }
 0x48e   : > { %5804 = vmatpush1.bf16.msra.mxu1 %v10851_v8  ;;  %5676 = vmatprep.subr.bf16.mxu0 %v10856_v11 }
 0x48f   : > { %5805 = vmatprep.subr.bf16.mxu1 %v10859_v12 }
 0x491   : > { %5677 = vmatpush1.bf16.msra.mxu0 %v10854_v14 }
 0x492   : > { %5806 = vmatpush1.bf16.msra.mxu1 %v10857_v16  ;;  %5678 = vmatprep.subr.bf16.mxu0 %v10862_v18 }
 0x493   : > { %5807 = vmatprep.subr.bf16.mxu1 %v10865_v19 }
 0x495   : > { %5679 = vmatpush1.bf16.msra.mxu0 %v10860_v20 }
 0x496   : > { %5808 = vmatpush1.bf16.msra.mxu1 %v10863_v21  ;;  %5680 = vmatprep.subr.bf16.mxu0 %v10868_v22 }
 0x497   : > { %5809 = vmatprep.subr.bf16.mxu1 %v10871_v23 }
 0x499   : > { %5681 = vmatpush1.bf16.msra.mxu0 %v10866_v24 }
 0x49a   : > { %5810 = vmatpush1.bf16.msra.mxu1 %v10869_v26  ;;  %5682 = vmatprep.subr.bf16.mxu0 %v10874_v27 }
 0x49b   : > { %5811 = vmatprep.subr.bf16.mxu1 %v10877_v28 }
 0x49d   : > { %5683 = vmatpush1.bf16.msra.mxu0 %v10872_v29 }
 0x49e   : > { %5812 = vmatpush1.bf16.msra.mxu1 %v10875_v30  ;;  %5684 = vmatprep.subr.bf16.mxu0 %v10880_v31 }
 0x49f   : > { %5813 = vmatprep.subr.bf16.mxu1 %v10883_v32 }
 0x4a1   : > { %5685 = vmatpush1.bf16.msra.mxu0 %v10878_v33 }
 0x4a2   : > { %5814 = vmatpush1.bf16.msra.mxu1 %v10881_v13  ;;  %5686 = vmatprep.subr.bf16.mxu0 %v10886_v34 }
 0x4a3   : > { %5815 = vmatprep.subr.bf16.mxu1 %v10889_v17 }
 0x4a5   : > { %5687 = vmatpush1.bf16.msra.mxu0 %v10884_v15 }
 0x4a6   : > { %5816 = vmatpush1.bf16.msra.mxu1 %v10887_v35  ;;  %5688 = vmatprep.subr.bf16.mxu0 %v10892_v36 }
 0x4a7   : > { %5817 = vmatprep.subr.bf16.mxu1 %v10895_v37 }
 0x4a9   : > { %5689 = vmatpush1.bf16.msra.mxu0 %v10890_v38 }
 0x4aa   : > { %5818 = vmatpush1.bf16.msra.mxu1 %v10893_v40  ;;  %5690 = vmatprep.subr.bf16.mxu0 %v10898_v41 }
 0x4ab   : > { %5819 = vmatprep.subr.bf16.mxu1 %v10901_v42 }
 0x4ad   : > { %5691 = vmatpush1.bf16.msra.mxu0 %v10896_v43 }
 0x4ae   : > { %5820 = vmatpush1.bf16.msra.mxu1 %v10899_v44  ;;  %5692 = vmatprep.subr.bf16.mxu0 %v10904_v45  ;;  %v10926_v45 = vld [vmem:[%s15119_s11 + $0x300] ss:$24 sps:$4 sm:$0xff]  }
 0x4af   : > { %5821 = vmatprep.subr.bf16.mxu1 %v10907_v46  ;;  %v10929_v46 = vld [vmem:[%s15119_s11 + $0x308] ss:$24 sps:$4 sm:$0xff]  }
 0x4b1   : > { %5693 = vmatpush1.bf16.msra.mxu0 %v10902_v47 }
 0x4b2   : > { %5822 = vmatpush1.bf16.msra.mxu1 %v10905_v48  ;;  %5694 = vmatprep.subr.bf16.mxu0 %v10910_v49  ;;  %v10934_v48 = vld [vmem:[%s15119_s11 + $0x334] ss:$24 sps:$4 sm:$0xff]  }
 0x4b3   : > { %5823 = vmatprep.subr.bf16.mxu1 %v10913_v50  ;;  %v10937_v49 = vld [vmem:[%s15119_s11 + $0x33c] ss:$24 sps:$4 sm:$0xff]   ;;  %v10932_v50 = vld [vmem:[%s15119_s11 + $0x330] ss:$24 sps:$4 sm:$0xff]  }
 0x4b5   : > { %5695 = vmatpush1.bf16.msra.mxu0 %v10908_v51  ;;  %v10935_v51 = vld [vmem:[%s15119_s11 + $0x338] ss:$24 sps:$4 sm:$0xff]  }
 0x4b6   : > { %5824 = vmatpush1.bf16.msra.mxu1 %v10911_v52  ;;  %5696 = vmatprep.subr.bf16.mxu0 %v10916_v53  ;;  %v10940_v52 = vld [vmem:[%s15119_s11 + $0x364] ss:$24 sps:$4 sm:$0xff]  }
 0x4b7   : > { %5825 = vmatprep.subr.bf16.mxu1 %v10919_v54  ;;  %v10943_v53 = vld [vmem:[%s15119_s11 + $0x36c] ss:$24 sps:$4 sm:$0xff]   ;;  %v10938_v54 = vld [vmem:[%s15119_s11 + $0x360] ss:$24 sps:$4 sm:$0xff]  }
 0x4b9   : > { %5697 = vmatpush1.bf16.msra.mxu0 %v10914_v55  ;;  %v10941_v55 = vld [vmem:[%s15119_s11 + $0x368] ss:$24 sps:$4 sm:$0xff]  }
 0x4ba   : > { %5826 = vmatpush1.bf16.msra.mxu1 %v10917_v56  ;;  %5698 = vmatprep.subr.bf16.mxu0 %v10922_v57  ;;  %v10946_v56 = vld [vmem:[%s15119_s11 + $0x394] ss:$24 sps:$4 sm:$0xff]  }
 0x4bb   : > { %5827 = vmatprep.subr.bf16.mxu1 %v10925_v58  ;;  %v10949_v57 = vld [vmem:[%s15119_s11 + $0x39c] ss:$24 sps:$4 sm:$0xff]   ;;  %v10944_v58 = vld [vmem:[%s15119_s11 + $0x390] ss:$24 sps:$4 sm:$0xff]  }
 0x4bd   : > { %5699 = vmatpush1.bf16.msra.mxu0 %v10920_v60  ;;  %v10947_v60 = vld [vmem:[%s15119_s11 + $0x398] ss:$24 sps:$4 sm:$0xff]  }
 0x4be   : > { %5828 = vmatpush1.bf16.msra.mxu1 %v10923_v63  ;;  %5711 = vmatprep.subr.bf16.mxu0 %v10928_v1  ;;  %v10952_v63 = vld [vmem:[%s15119_s11 + $0x3c4] ss:$24 sps:$4 sm:$0xff]  }
 0x4bf   : > { %5840 = vmatprep.subr.bf16.mxu1 %v10931_v2  ;;  %v10955_v1 = vld [vmem:[%s15119_s11 + $0x3cc] ss:$24 sps:$4 sm:$0xff]   ;;  %v10950_v2 = vld [vmem:[%s15119_s11 + $0x3c0] ss:$24 sps:$4 sm:$0xff]  }
 0x533   : > { %v3984_v6 = vpop.f32.mrb[16].mxu0  ;;  %v4070_v7 = vpop.f32.mrb[12].mxu1 }
 0x534   : > { %v10044_v8 = vadd.f32 %v3984_v6, %v3053_v9  ;;  %v10048_v11 = vadd.f32 %v4070_v7, %v3061_v10  ;;  %v3986_v12 = vpop.f32.mrb[17].mxu0  ;;  %v4072_v14 = vpop.f32.mrb[13].mxu1  ;;  %v10956_v6 = vld [vmem:[%s15119_s11 + $0x3f0] ss:$24 sps:$4 sm:$0xff]  }
 0x535   : > { %v10045_v16 = vadd.f32 %v3986_v12, %v3057_v4  ;;  %v10049_v18 = vadd.f32 %v4072_v14, %v3065_v5  ;;  %v3988_v19 = vpop.f32.mrb[18].mxu0  ;;  %v4074_v20 = vpop.f32.mrb[14].mxu1  ;;  %v10959_v7 = vld [vmem:[%s15119_s11 + $0x3f8] ss:$24 sps:$4 sm:$0xff]   ;;  %v10964_v12 = vld [vmem:[%s15119_s11 + $0x424] ss:$24 sps:$4 sm:$0xff]  }
 0x536   : > { %vm4161_vm12 = vcmp.ge.f32.partialorder %v10044_v8, 0.0  ;;  %v4171_v21 = vmul.f32 0.01, %v10044_v8  ;;  %vm4163_vm13 = vcmp.ge.f32.partialorder %v10048_v11, 0.0  ;;  %v4173_v22 = vmul.f32 0.01, %v10048_v11 }
 0x537   : > { %vm4162_vm14 = vcmp.ge.f32.partialorder %v10045_v16, 0.0  ;;  %v4172_v23 = vmul.f32 0.01, %v10045_v16  ;;  %vm4164_vm15 = vcmp.ge.f32.partialorder %v10049_v18, 0.0  ;;  %v4174_v24 = vmul.f32 0.01, %v10049_v18 }
 0x538   : > { %v10046_v26 = vadd.f32 %v3988_v19, %v3053_v9  ;;  %v10050_v27 = vadd.f32 %v4074_v20, %v3061_v10  ;;  %v3990_v28 = vpop.f32.mrb[19].mxu0  ;;  %v4076_v29 = vpop.f32.mrb[15].mxu1  ;;  %v4181_v30 = vsel %vm4161_vm12, %v10044_v8, %v4171_v21  ;;  %v4183_v31 = vsel %vm4163_vm13, %v10048_v11, %v4173_v22  ;;  %v10953_v9 = vld [vmem:[%s15119_s11 + $0x3c8] ss:$24 sps:$4 sm:$0xff]   ;;  %v10958_v10 = vld [vmem:[%s15119_s11 + $0x3f4] ss:$24 sps:$4 sm:$0xff]  }
 0x539   : > { %v10047_v32 = vadd.f32 %v3990_v28, %v3057_v4  ;;  %v10051_v33 = vadd.f32 %v4076_v29, %v3065_v5  ;;  %v4182_v37 = vsel %vm4162_vm14, %v10045_v16, %v4172_v23  ;;  %v4184_v38 = vsel %vm4164_vm15, %v10049_v18, %v4174_v24  ;;  %v10961_v4 = vld [vmem:[%s15119_s11 + $0x3fc] ss:$24 sps:$4 sm:$0xff]   ;;  %v10967_v14 = vld [vmem:[%s15119_s11 + $0x42c] ss:$24 sps:$4 sm:$0xff]  }
 0x53a   : > { %vm4166_vm0 = vcmp.ge.f32.partialorder %v10046_v26, 0.0  ;;  %v4176_v13 = vmul.f32 0.01, %v10046_v26  ;;  %vm4168_vm1 = vcmp.ge.f32.partialorder %v10050_v27, 0.0  ;;  %v4178_v34 = vmul.f32 0.01, %v10050_v27 }
 0x53b   : > { %vm4167_vm2 = vcmp.ge.f32.partialorder %v10047_v32, 0.0  ;;  %v4177_v17 = vmul.f32 0.01, %v10047_v32  ;;  %vm4169_vm3 = vcmp.ge.f32.partialorder %v10051_v33, 0.0  ;;  %v4179_v15 = vmul.f32 0.01, %v10051_v33 }
 0x53c   : > { %v4186_v35 = vsel %vm4166_vm0, %v10046_v26, %v4176_v13  ;;  %v4188_v36 = vsel %vm4168_vm1, %v10050_v27, %v4178_v34  ;;  %v13461_v5 = vsub.s32 4, %v11954_v59  ;;  %v10965_v26 = vld [vmem:[%s15119_s11 + $0x428] ss:$24 sps:$4 sm:$0xff]  }
 0x53d   : > { %v13386_v40 = vpack.c.bf16 %v4186_v35, %v4181_v30  ;;  %v13388_v41 = vpack.c.bf16 %v4188_v36, %v4183_v31  ;;  %v4187_v42 = vsel %vm4167_vm2, %v10047_v32, %v4177_v17  ;;  %v4189_v43 = vsel %vm4169_vm3, %v10051_v33, %v4179_v15  ;;  %v10970_v30 = vld [vmem:[%s15119_s11 + $0x454] ss:$24 sps:$4 sm:$0xff]   ;;  %v10968_v34 = vld [vmem:[%s15119_s11 + $0x450] ss:$24 sps:$4 sm:$0xff]   ;;  %v10976_v36 = vld [vmem:[%s15119_s11 + $0x484] ss:$24 sps:$4 sm:$0xff]  }
 0x53e   : > { %v13390_v44 = vpack.c.bf16 %v4187_v42, %v4182_v37  ;;  %v13398_v47 = vpack.c.bf16 %v4189_v43, %v4184_v38  ;;  %v3069_v11 = vrot.slane %v13374_v3, %v13461_v5  ;;  %v10962_v3 = vld [vmem:[%s15119_s11 + $0x420] ss:$24 sps:$4 sm:$0xff]   ;;  %v10973_v31 = vld [vmem:[%s15119_s11 + $0x45c] ss:$24 sps:$4 sm:$0xff]   ;;  %v10979_v37 = vld [vmem:[%s15119_s11 + $0x48c] ss:$24 sps:$4 sm:$0xff]  }
 0x53f   : > { %v10971_v17 = vld [vmem:[%s15119_s11 + $0x458] ss:$24 sps:$4 sm:$0xff]   ;;  %v10977_v43 = vld [vmem:[%s15119_s11 + $0x488] ss:$24 sps:$4 sm:$0xff]   ;;  %vm8762_vm2 = vcmask 261120  }
 0x540   : > { %5700 = vmatprep.mubr.bf16.mxu0 %v13390_v44  ;;  %5829 = vmatprep.mubr.bf16.mxu1 %v13390_v44  ;;  %v10974_v42 = vld [vmem:[%s15119_s11 + $0x480] ss:$24 sps:$4 sm:$0xff]  }
 0x541   : > { %5701 = vmatmul.mubr.bf16.vlgmr.msra.gmra.mrb[24].mxu0 %v13386_v40  ;;  %5830 = vmatmul.mubr.bf16.vlgmr.msra.gmra.mrb[20].mxu1 %v13386_v40 }
 0x542   : > { %5712 = vmatpush1.bf16.msra.mxu0 %v10926_v45  ;;  %5841 = vmatpush1.bf16.msra.mxu1 %v10929_v46 }
 0x543   : > { %5743 = vmatprep.mubr.bf16.mxu0 %v13398_v47  ;;  %5872 = vmatprep.mubr.bf16.mxu1 %v13398_v47 }
 0x544   : > { %5713 = vmatprep.subr.bf16.mxu0 %v10934_v48  ;;  %5842 = vmatprep.subr.bf16.mxu1 %v10937_v49  ;;  %v10982_v48 = vld [vmem:[%s15119_s11 + $0x4b4] ss:$24 sps:$4 sm:$0xff]  }
 0x545   : > { %v10985_v49 = vld [vmem:[%s15119_s11 + $0x4bc] ss:$24 sps:$4 sm:$0xff]  }
 0x546   : > { %5714 = vmatpush1.bf16.msra.mxu0 %v10932_v50  ;;  %5843 = vmatpush1.bf16.msra.mxu1 %v10935_v51  ;;  %v10980_v51 = vld [vmem:[%s15119_s11 + $0x4b0] ss:$24 sps:$4 sm:$0xff]  }
 0x547   : > { %5715 = vmatprep.subr.bf16.mxu0 %v10940_v52  ;;  %5844 = vmatprep.subr.bf16.mxu1 %v10943_v53  ;;  %v10983_v52 = vld [vmem:[%s15119_s11 + $0x4b8] ss:$24 sps:$4 sm:$0xff]   ;;  %v10988_v53 = vld [vmem:[%s15119_s11 + $0x4e4] ss:$24 sps:$4 sm:$0xff]  }
 0x54a   : > { %5716 = vmatpush1.bf16.msra.mxu0 %v10938_v54  ;;  %5845 = vmatpush1.bf16.msra.mxu1 %v10941_v55  ;;  %v10991_v54 = vld [vmem:[%s15119_s11 + $0x4ec] ss:$24 sps:$4 sm:$0xff]   ;;  %v10986_v55 = vld [vmem:[%s15119_s11 + $0x4e0] ss:$24 sps:$4 sm:$0xff]  }
 0x54b   : > { %5717 = vmatprep.subr.bf16.mxu0 %v10946_v56  ;;  %5846 = vmatprep.subr.bf16.mxu1 %v10949_v57  ;;  %v10989_v56 = vld [vmem:[%s15119_s11 + $0x4e8] ss:$24 sps:$4 sm:$0xff]   ;;  %v10994_v57 = vld [vmem:[%s15119_s11 + $0x514] ss:$24 sps:$4 sm:$0xff]  }
 0x54e   : > { %5718 = vmatpush1.bf16.msra.mxu0 %v10944_v58  ;;  %5847 = vmatpush1.bf16.msra.mxu1 %v10947_v60  ;;  %v10997_v58 = vld [vmem:[%s15119_s11 + $0x51c] ss:$24 sps:$4 sm:$0xff]   ;;  %v10992_v60 = vld [vmem:[%s15119_s11 + $0x510] ss:$24 sps:$4 sm:$0xff]  }
 0x54f   : > { %5719 = vmatprep.subr.bf16.mxu0 %v10952_v63  ;;  %5848 = vmatprep.subr.bf16.mxu1 %v10955_v1  ;;  %v10995_v63 = vld [vmem:[%s15119_s11 + $0x518] ss:$24 sps:$4 sm:$0xff]   ;;  %v11000_v1 = vld [vmem:[%s15119_s11 + $0x544] ss:$24 sps:$4 sm:$0xff]  }
 0x552   : > { %5720 = vmatpush1.bf16.msra.mxu0 %v10950_v2  ;;  %5849 = vmatpush1.bf16.msra.mxu1 %v10953_v9  ;;  %v11003_v2 = vld [vmem:[%s15119_s11 + $0x54c] ss:$24 sps:$4 sm:$0xff]   ;;  %v10998_v9 = vld [vmem:[%s15119_s11 + $0x540] ss:$24 sps:$4 sm:$0xff]  }
 0x553   : > { %5721 = vmatprep.subr.bf16.mxu0 %v10958_v10  ;;  %5850 = vmatprep.subr.bf16.mxu1 %v10961_v4  ;;  %v9934_v8 = vpop.f32.mrb[20].mxu0  ;;  %v11001_v10 = vld [vmem:[%s15119_s11 + $0x548] ss:$24 sps:$4 sm:$0xff]   ;;  %v11006_v4 = vld [vmem:[%s15119_s11 + $0x574] ss:$24 sps:$4 sm:$0xff]  }
 0x554   : > { %v9956_v16 = vpop.f32.mrb[16].mxu1  ;;  %v9935_v18 = vpop.f32.mrb[21].mxu0 }
 0x555   : > { %v9936_v19 = vadd.f32 %v9935_v18, %v9934_v8  ;;  %v9957_v20 = vpop.f32.mrb[17].mxu1  ;;  %v9937_v21 = vpop.f32.mrb[22].mxu0  ;;  %v11007_v8 = vld [vmem:[%s15119_s11 + $0x578] ss:$24 sps:$4 sm:$0xff]   ;;  %v11018_v18 = vld [vmem:[%s15119_s11 + $0x5d4] ss:$24 sps:$4 sm:$0xff]  }
 0x556   : > { %5722 = vmatpush1.bf16.msra.mxu0 %v10956_v6  ;;  %5851 = vmatpush1.bf16.msra.mxu1 %v10959_v7  ;;  %v9958_v22 = vadd.f32 %v9957_v20, %v9956_v16  ;;  %v9959_v23 = vpop.f32.mrb[18].mxu1  ;;  %v9938_v24 = vpop.f32.mrb[23].mxu0  ;;  %v11009_v6 = vld [vmem:[%s15119_s11 + $0x57c] ss:$24 sps:$4 sm:$0xff]   ;;  %v11004_v7 = vld [vmem:[%s15119_s11 + $0x570] ss:$24 sps:$4 sm:$0xff]  }
 0x557   : > { %v4114_v27 = vadd.f32 %v9936_v19, %v3069_v11  ;;  %v9939_v28 = vadd.f32 %v9938_v24, %v9937_v21  ;;  %v9960_v29 = vpop.f32.mrb[19].mxu1  ;;  %5723 = vmatprep.subr.bf16.mxu0 %v10964_v12  ;;  %5852 = vmatprep.subr.bf16.mxu1 %v10967_v14  ;;  %v11015_v12 = vld [vmem:[%s15119_s11 + $0x5ac] ss:$24 sps:$4 sm:$0xff]   ;;  %v11010_v14 = vld [vmem:[%s15119_s11 + $0x5a0] ss:$24 sps:$4 sm:$0xff]  }
 0x558   : > { %v9961_v32 = vadd.f32 %v9960_v29, %v9959_v23  ;;  %v11013_v16 = vld [vmem:[%s15119_s11 + $0x5a8] ss:$24 sps:$4 sm:$0xff]   ;;  %v11021_v19 = vld [vmem:[%s15119_s11 + $0x5dc] ss:$24 sps:$4 sm:$0xff]   ;;  %v11019_v21 = vld [vmem:[%s15119_s11 + $0x5d8] ss:$24 sps:$4 sm:$0xff]  }
 0x559   : > { %v4155_v33 = vadd.f32 %v9958_v22, %v4114_v27  ;;  %v4117_v13 = vadd.f32 %v9939_v28, %v3069_v11  ;;  %v11012_v11 = vld [vmem:[%s15119_s11 + $0x5a4] ss:$24 sps:$4 sm:$0xff]   ;;  %v11016_v20 = vld [vmem:[%s15119_s11 + $0x5d0] ss:$24 sps:$4 sm:$0xff]   ;;  %v11022_v24 = vld [vmem:[%s15119_s11 + $0x600] ss:$24 sps:$4 sm:$0xff]  }
 0x55a   : > { %5724 = vmatpush1.bf16.msra.mxu0 %v10962_v3  ;;  %5853 = vmatpush1.bf16.msra.mxu1 %v10965_v26  ;;  %v11024_v22 = vld [vmem:[%s15119_s11 + $0x604] ss:$24 sps:$4 sm:$0xff]   ;;  %v11025_v3 = vld [vmem:[%s15119_s11 + $0x608] ss:$24 sps:$4 sm:$0xff]   ;;  %v11030_v26 = vld [vmem:[%s15119_s11 + $0x634] ss:$24 sps:$4 sm:$0xff]  }
 0x55b   : > { %v4175_v15 = vmul.f32 0.01, %v4155_v33  ;;  %v4158_v35 = vadd.f32 %v9961_v32, %v4117_v13  ;;  %5725 = vmatprep.subr.bf16.mxu0 %v10970_v30  ;;  %5854 = vmatprep.subr.bf16.mxu1 %v10973_v31  ;;  %vm4165_vm4 = vcmp.ge.f32.partialorder %v4155_v33, 0.0  ;;  %v11027_v23 = vld [vmem:[%s15119_s11 + $0x60c] ss:$24 sps:$4 sm:$0xff]  }
 0x55c   : > { %v11033_v27 = vld [vmem:[%s15119_s11 + $0x63c] ss:$24 sps:$4 sm:$0xff]   ;;  %v11028_v28 = vld [vmem:[%s15119_s11 + $0x630] ss:$24 sps:$4 sm:$0xff]   ;;  %v11039_v31 = vld [vmem:[%s15119_s11 + $0x66c] ss:$24 sps:$4 sm:$0xff]  }
 0x55d   : > { %vm4170_vm5 = vcmp.ge.f32.partialorder %v4158_v35, 0.0  ;;  %v4180_v38 = vmul.f32 0.01, %v4158_v35  ;;  %v4185_v45 = vsel %vm4165_vm4, %v4155_v33, %v4175_v15  ;;  %v11031_v29 = vld [vmem:[%s15119_s11 + $0x638] ss:$24 sps:$4 sm:$0xff]  }
 0x55e   : > { %5726 = vmatpush1.bf16.msra.mxu0 %v10968_v34  ;;  %5855 = vmatpush1.bf16.msra.mxu1 %v10971_v17  ;;  %v11036_v30 = vld [vmem:[%s15119_s11 + $0x664] ss:$24 sps:$4 sm:$0xff]   ;;  %v11034_v32 = vld [vmem:[%s15119_s11 + $0x660] ss:$24 sps:$4 sm:$0xff]   ;;  %v11042_v13 = vld [vmem:[%s15119_s11 + $0x694] ss:$24 sps:$4 sm:$0xff]  }
 0x55f   : > { %v4190_v46 = vsel %vm4170_vm5, %v4158_v35, %v4180_v38  ;;  %5727 = vmatprep.subr.bf16.mxu0 %v10976_v36  ;;  %5856 = vmatprep.subr.bf16.mxu1 %v10979_v37  ;;  %v11037_v33 = vld [vmem:[%s15119_s11 + $0x668] ss:$24 sps:$4 sm:$0xff]   ;;  %v11045_v34 = vld [vmem:[%s15119_s11 + $0x69c] ss:$24 sps:$4 sm:$0xff]   ;;  %v11043_v15 = vld [vmem:[%s15119_s11 + $0x698] ss:$24 sps:$4 sm:$0xff]  }
 0x560   : > { %v13513_v50 = vpack.c.bf16 %v4190_v46, %v4185_v45  ;;  %v11040_v17 = vld [vmem:[%s15119_s11 + $0x690] ss:$24 sps:$4 sm:$0xff]   ;;  %v11048_v35 = vld [vmem:[%s15119_s11 + $0x6c4] ss:$24 sps:$4 sm:$0xff]   ;;  %v11046_v37 = vld [vmem:[%s15119_s11 + $0x6c0] ss:$24 sps:$4 sm:$0xff]  }
 0x561   : > { %v11051_v36 = vld [vmem:[%s15119_s11 + $0x6cc] ss:$24 sps:$4 sm:$0xff]   ;;  %v11049_v38 = vld [vmem:[%s15119_s11 + $0x6c8] ss:$24 sps:$4 sm:$0xff]   ;;  %v11055_v46 = vld [vmem:[%s15119_s11 + $0x6f8] ss:$24 sps:$4 sm:$0xff]  }
 0x562   : > { %5728 = vmatpush1.bf16.msra.mxu0 %v10974_v42  ;;  %5857 = vmatpush1.bf16.msra.mxu1 %v10977_v43  ;;  %v11054_v42 = vld [vmem:[%s15119_s11 + $0x6f4] ss:$24 sps:$4 sm:$0xff]   ;;  %v11052_v45 = vld [vmem:[%s15119_s11 + $0x6f0] ss:$24 sps:$4 sm:$0xff]  }
 0x563   : > { %5729 = vmatprep.subr.bf16.mxu0 %v10982_v48  ;;  %5858 = vmatprep.subr.bf16.mxu1 %v10985_v49  ;;  %v11057_v43 = vld [vmem:[%s15119_s11 + $0x6fc] ss:$24 sps:$4 sm:$0xff]   ;;  %v11063_v49 = vld [vmem:[%s15119_s11 + $0x72c] ss:$24 sps:$4 sm:$0xff]  }
 0x564   : > { %v11060_v48 = vld [vmem:[%s15119_s11 + $0x724] ss:$24 sps:$4 sm:$0xff]  }
 0x566   : > { %5730 = vmatpush1.bf16.msra.mxu0 %v10980_v51  ;;  %5859 = vmatpush1.bf16.msra.mxu1 %v10983_v52  ;;  %v11058_v51 = vld [vmem:[%s15119_s11 + $0x720] ss:$24 sps:$4 sm:$0xff]  }
 0x567   : > { %5731 = vmatprep.subr.bf16.mxu0 %v10988_v53  ;;  %5860 = vmatprep.subr.bf16.mxu1 %v10991_v54  ;;  %v11061_v52 = vld [vmem:[%s15119_s11 + $0x728] ss:$24 sps:$4 sm:$0xff]   ;;  %v11066_v53 = vld [vmem:[%s15119_s11 + $0x754] ss:$24 sps:$4 sm:$0xff]  }
 0x568   : > { %v11069_v54 = vld [vmem:[%s15119_s11 + $0x75c] ss:$24 sps:$4 sm:$0xff]  }
 0x56a   : > { %5732 = vmatpush1.bf16.msra.mxu0 %v10986_v55  ;;  %5861 = vmatpush1.bf16.msra.mxu1 %v10989_v56  ;;  %v11064_v55 = vld [vmem:[%s15119_s11 + $0x750] ss:$24 sps:$4 sm:$0xff]  }
 0x56b   : > { %5733 = vmatprep.subr.bf16.mxu0 %v10994_v57  ;;  %5862 = vmatprep.subr.bf16.mxu1 %v10997_v58  ;;  %v11067_v56 = vld [vmem:[%s15119_s11 + $0x758] ss:$24 sps:$4 sm:$0xff]   ;;  %v11072_v57 = vld [vmem:[%s15119_s11 + $0x14] ss:$24 sps:$4 sm:$0xff]  }
 0x56c   : > { %v11070_v58 = vld [vmem:[%s15119_s11 + $0x10] ss:$24 sps:$4 sm:$0xff]  }
 0x56e   : > { %5734 = vmatpush1.bf16.msra.mxu0 %v10992_v60  ;;  %5863 = vmatpush1.bf16.msra.mxu1 %v10995_v63  ;;  %v11075_v60 = vld [vmem:[%s15119_s11 + $0x44] ss:$24 sps:$4 sm:$0xff]   ;;  %v11073_v63 = vld [vmem:[%s15119_s11 + $0x40] ss:$24 sps:$4 sm:$0xff]  }
 0x56f   : > { %5735 = vmatprep.subr.bf16.mxu0 %v11000_v1  ;;  %5864 = vmatprep.subr.bf16.mxu1 %v11003_v2  ;;  %v11078_v1 = vld [vmem:[%s15119_s11 + $0x74] ss:$24 sps:$4 sm:$0xff]   ;;  %v11076_v2 = vld [vmem:[%s15119_s11 + $0x70] ss:$24 sps:$4 sm:$0xff]  }
 0x572   : > { %5736 = vmatpush1.bf16.msra.mxu0 %v10998_v9  ;;  %5865 = vmatpush1.bf16.msra.mxu1 %v11001_v10  ;;  %v11081_v9 = vld [vmem:[%s15119_s11 + $0xa4] ss:$24 sps:$4 sm:$0xff]   ;;  %v11084_v10 = vld [vmem:[%s15119_s11 + $0xd4] ss:$24 sps:$4 sm:$0xff]  }
 0x573   : > { %5737 = vmatprep.subr.bf16.mxu0 %v11006_v4  ;;  %5866 = vmatprep.subr.bf16.mxu1 %v11009_v6  ;;  %v11082_v4 = vld [vmem:[%s15119_s11 + $0xd0] ss:$24 sps:$4 sm:$0xff]   ;;  %v11087_v6 = vld [vmem:[%s15119_s11 + $0x104] ss:$24 sps:$4 sm:$0xff]  }
 0x576   : > { %5738 = vmatpush1.bf16.msra.mxu0 %v11004_v7  ;;  %5867 = vmatpush1.bf16.msra.mxu1 %v11007_v8  ;;  %v11085_v7 = vld [vmem:[%s15119_s11 + $0x100] ss:$24 sps:$4 sm:$0xff]   ;;  %v11090_v8 = vld [vmem:[%s15119_s11 + $0x134] ss:$24 sps:$4 sm:$0xff]  }
 0x577   : > { %5739 = vmatprep.subr.bf16.mxu0 %v11012_v11  ;;  %5868 = vmatprep.subr.bf16.mxu1 %v11015_v12  ;;  %v11088_v11 = vld [vmem:[%s15119_s11 + $0x130] ss:$24 sps:$4 sm:$0xff]   ;;  %v11093_v12 = vld [vmem:[%s15119_s11 + $0x164] ss:$24 sps:$4 sm:$0xff]  }
 0x57a   : > { %5740 = vmatpush1.bf16.msra.mxu0 %v11010_v14  ;;  %5869 = vmatpush1.bf16.msra.mxu1 %v11013_v16  ;;  %v11091_v14 = vld [vmem:[%s15119_s11 + $0x160] ss:$24 sps:$4 sm:$0xff]   ;;  %v11096_v16 = vld [vmem:[%s15119_s11 + $0x194] ss:$24 sps:$4 sm:$0xff]  }
 0x57b   : > { %5741 = vmatprep.subr.bf16.mxu0 %v11018_v18  ;;  %5870 = vmatprep.subr.bf16.mxu1 %v11021_v19  ;;  %v11192_v18 = vld [vmem:[%s15121_s13 + $0x4] ss:$28 sps:$4 sm:$0xff]   ;;  %v11094_v19 = vld [vmem:[%s15119_s11 + $0x190] ss:$24 sps:$4 sm:$0xff]  }
 0x57e   : > { %5742 = vmatpush1.bf16.msra.mxu0 %v11016_v20  ;;  %5871 = vmatpush1.bf16.msra.mxu1 %v11019_v21  ;;  %v11190_v20 = vld [vmem:[%s15121_s13] ss:$28 sps:$4 sm:$0xff]  }
 0x57f   : > { %5754 = vmatprep.subr.bf16.mxu0 %v11024_v22  ;;  %5883 = vmatprep.subr.bf16.mxu1 %v11027_v23  ;;  %v11099_v21 = vld [vmem:[%s15119_s11 + $0x1c4] ss:$24 sps:$4 sm:$0xff]   ;;  %v11097_v23 = vld [vmem:[%s15119_s11 + $0x1c0] ss:$24 sps:$4 sm:$0xff]  }
 0x580   : > { %v11198_v22 = vld [vmem:[%s15121_s13 + $0x3c] ss:$28 sps:$4 sm:$0xff]  }
 0x581   : > { %5744 = vmatmul.mubr.bf16.vlgmr.msra.gmra.mrb[24].mxu0 %v13388_v41  ;;  %5873 = vmatmul.mubr.bf16.vlgmr.msra.gmra.mrb[20].mxu1 %v13388_v41 }
 0x582   : > { %5755 = vmatpush1.bf16.msra.mxu0 %v11022_v24  ;;  %5884 = vmatpush1.bf16.msra.mxu1 %v11025_v3  ;;  %v11196_v24 = vld [vmem:[%s15121_s13 + $0x38] ss:$28 sps:$4 sm:$0xff]  }
 0x583   : > { %5756 = vmatprep.subr.bf16.mxu0 %v11030_v26  ;;  %5885 = vmatprep.subr.bf16.mxu1 %v11033_v27  ;;  %v11102_v3 = vld [vmem:[%s15119_s11 + $0x1f4] ss:$24 sps:$4 sm:$0xff]   ;;  %v11100_v27 = vld [vmem:[%s15119_s11 + $0x1f0] ss:$24 sps:$4 sm:$0xff]  }
 0x584   : > { %5786 = vmatprep.mubr.bf16.mxu0 %v11769_v0  ;;  %5915 = vmatprep.mubr.bf16.mxu1 %v11769_v0  ;;  %v11204_v26 = vld [vmem:[%s15121_s13 + $0x74] ss:$28 sps:$4 sm:$0xff]  }
 0x586   : > { %5757 = vmatpush1.bf16.msra.mxu0 %v11028_v28  ;;  %5886 = vmatpush1.bf16.msra.mxu1 %v11031_v29  ;;  %v11202_v28 = vld [vmem:[%s15121_s13 + $0x70] ss:$28 sps:$4 sm:$0xff]   ;;  %v11105_v29 = vld [vmem:[%s15119_s11 + $0x224] ss:$24 sps:$4 sm:$0xff]  }
 0x587   : > { %5758 = vmatprep.subr.bf16.mxu0 %v11036_v30  ;;  %5887 = vmatprep.subr.bf16.mxu1 %v11039_v31  ;;  %v11210_v30 = vld [vmem:[%s15121_s13 + $0xac] ss:$28 sps:$4 sm:$0xff]   ;;  %v11103_v31 = vld [vmem:[%s15119_s11 + $0x220] ss:$24 sps:$4 sm:$0xff]  }
 0x58a   : > { %5759 = vmatpush1.bf16.msra.mxu0 %v11034_v32  ;;  %5888 = vmatpush1.bf16.msra.mxu1 %v11037_v33  ;;  %v11208_v32 = vld [vmem:[%s15121_s13 + $0xa8] ss:$28 sps:$4 sm:$0xff]   ;;  %v11108_v33 = vld [vmem:[%s15119_s11 + $0x254] ss:$24 sps:$4 sm:$0xff]  }
 0x58b   : > { %5760 = vmatprep.subr.bf16.mxu0 %v11042_v13  ;;  %5889 = vmatprep.subr.bf16.mxu1 %v11045_v34  ;;  %v11216_v13 = vld [vmem:[%s15121_s13 + $0xe4] ss:$28 sps:$4 sm:$0xff]   ;;  %v11106_v34 = vld [vmem:[%s15119_s11 + $0x250] ss:$24 sps:$4 sm:$0xff]  }
 0x58e   : > { %5761 = vmatpush1.bf16.msra.mxu0 %v11040_v17  ;;  %5890 = vmatpush1.bf16.msra.mxu1 %v11043_v15  ;;  %v11214_v17 = vld [vmem:[%s15121_s13 + $0xe0] ss:$28 sps:$4 sm:$0xff]  }
 0x58f   : > { %5762 = vmatprep.subr.bf16.mxu0 %v11048_v35  ;;  %5891 = vmatprep.subr.bf16.mxu1 %v11051_v36  ;;  %v11111_v15 = vld [vmem:[%s15119_s11 + $0x284] ss:$24 sps:$4 sm:$0xff]   ;;  %v11109_v36 = vld [vmem:[%s15119_s11 + $0x280] ss:$24 sps:$4 sm:$0xff]  }
 0x590   : > { %v11222_v35 = vld [vmem:[%s15121_s13 + $0x11c] ss:$28 sps:$4 sm:$0xff]  }
 0x592   : > { %5763 = vmatpush1.bf16.msra.mxu0 %v11046_v37  ;;  %5892 = vmatpush1.bf16.msra.mxu1 %v11049_v38  ;;  %v11220_v37 = vld [vmem:[%s15121_s13 + $0x118] ss:$28 sps:$4 sm:$0xff]  }
 0x593   : > { %5764 = vmatprep.subr.bf16.mxu0 %v11054_v42  ;;  %5893 = vmatprep.subr.bf16.mxu1 %v11057_v43  ;;  %v11114_v38 = vld [vmem:[%s15119_s11 + $0x2b4] ss:$24 sps:$4 sm:$0xff]   ;;  %v11112_v43 = vld [vmem:[%s15119_s11 + $0x2b0] ss:$24 sps:$4 sm:$0xff]  }
 0x594   : > { %v11228_v42 = vld [vmem:[%s15121_s13 + $0x154] ss:$28 sps:$4 sm:$0xff]  }
 0x596   : > { %5765 = vmatpush1.bf16.msra.mxu0 %v11052_v45  ;;  %5894 = vmatpush1.bf16.msra.mxu1 %v11055_v46  ;;  %v11226_v45 = vld [vmem:[%s15121_s13 + $0x150] ss:$28 sps:$4 sm:$0xff]   ;;  %v11117_v46 = vld [vmem:[%s15119_s11 + $0x2e4] ss:$24 sps:$4 sm:$0xff]  }
 0x597   : > { %5766 = vmatprep.subr.bf16.mxu0 %v11060_v48  ;;  %5895 = vmatprep.subr.bf16.mxu1 %v11063_v49  ;;  %v11234_v48 = vld [vmem:[%s15121_s13 + $0x18c] ss:$28 sps:$4 sm:$0xff]   ;;  %v11115_v49 = vld [vmem:[%s15119_s11 + $0x2e0] ss:$24 sps:$4 sm:$0xff]  }
 0x59a   : > { %5767 = vmatpush1.bf16.msra.mxu0 %v11058_v51  ;;  %5896 = vmatpush1.bf16.msra.mxu1 %v11061_v52  ;;  %v11232_v51 = vld [vmem:[%s15121_s13 + $0x188] ss:$28 sps:$4 sm:$0xff]   ;;  %v11120_v52 = vld [vmem:[%s15119_s11 + $0x314] ss:$24 sps:$4 sm:$0xff]  }
 0x59b   : > { %5768 = vmatprep.subr.bf16.mxu0 %v11066_v53  ;;  %5897 = vmatprep.subr.bf16.mxu1 %v11069_v54  ;;  %v11240_v53 = vld [vmem:[%s15121_s13 + $0x1c4] ss:$28 sps:$4 sm:$0xff]   ;;  %v11118_v54 = vld [vmem:[%s15119_s11 + $0x310] ss:$24 sps:$4 sm:$0xff]  }
 0x59e   : > { %5769 = vmatpush1.bf16.msra.mxu0 %v11064_v55  ;;  %5898 = vmatpush1.bf16.msra.mxu1 %v11067_v56  ;;  %v11238_v55 = vld [vmem:[%s15121_s13 + $0x1c0] ss:$28 sps:$4 sm:$0xff]  }
 0x59f   : > { %5926 = vmatprep.subr.bf16.mxu0 %v11072_v57  ;;  %8246 = vmatprep.subr.bf16.mxu1 %v11192_v18  ;;  %v11123_v56 = vld [vmem:[%s15119_s11 + $0x344] ss:$24 sps:$4 sm:$0xff]   ;;  %v11138_v18 = vld [vmem:[%s15119_s11 + $0x434] ss:$24 sps:$4 sm:$0xff]  }
 0x5a0   : > { %v11246_v57 = vld [vmem:[%s15121_s13 + $0x1fc] ss:$28 sps:$4 sm:$0xff]  }
 0x5a1   : > { %5787 = vmatmul.mubr.bf16.vlgmr.msra.gmra.mrb[24].mxu0 %v13513_v50  ;;  %5916 = vmatmul.mubr.bf16.vlgmr.msra.gmra.mrb[20].mxu1 %v13513_v50 }
 0x5a2   : > { %5927 = vmatpush1.bf16.msra.mxu0 %v11070_v58  ;;  %5958 = vmatprep.mubr.bf16.mxu0 %v13390_v44  ;;  %v11079_v44 = vld [vmem:[%s15119_s11 + $0xa0] ss:$24 sps:$4 sm:$0xff]  }
 0x5a3   : > { %5928 = vmatprep.subr.bf16.mxu0 %v11075_v60  ;;  %8247 = vmatpush1.bf16.msra.mxu1 %v11190_v20  ;;  %v11121_v58 = vld [vmem:[%s15119_s11 + $0x340] ss:$24 sps:$4 sm:$0xff]   ;;  %v11141_v20 = vld [vmem:[%s15119_s11 + $0x464] ss:$24 sps:$4 sm:$0xff]  }
 0x5a4   : > { %8248 = vmatprep.subr.bf16.mxu1 %v11198_v22  ;;  %v11244_v60 = vld [vmem:[%s15121_s13 + $0x1f8] ss:$28 sps:$4 sm:$0xff]   ;;  %v11274_v22 = vld [vmem:[%s15121_s13 + $0x310] ss:$28 sps:$4 sm:$0xff]  }
 0x5a6   : > { %5929 = vmatpush1.bf16.msra.mxu0 %v11073_v63  ;;  %v11252_v63 = vld [vmem:[%s15121_s13 + $0x234] ss:$28 sps:$4 sm:$0xff]  }
 0x5a7   : > { %5930 = vmatprep.subr.bf16.mxu0 %v11078_v1  ;;  %8249 = vmatpush1.bf16.msra.mxu1 %v11196_v24  ;;  %v11250_v1 = vld [vmem:[%s15121_s13 + $0x230] ss:$28 sps:$4 sm:$0xff]  }
 0x5a8   : > { %8250 = vmatprep.subr.bf16.mxu1 %v11204_v26  ;;  %v11144_v24 = vld [vmem:[%s15119_s11 + $0x494] ss:$24 sps:$4 sm:$0xff]   ;;  %v11280_v26 = vld [vmem:[%s15121_s13 + $0x348] ss:$28 sps:$4 sm:$0xff]  }
 0x5aa   : > { %5931 = vmatpush1.bf16.msra.mxu0 %v11076_v2  ;;  %v11129_v2 = vld [vmem:[%s15119_s11 + $0x3a4] ss:$24 sps:$4 sm:$0xff]  }
 0x5ab   : > { %5932 = vmatprep.subr.bf16.mxu0 %v11081_v9  ;;  %8251 = vmatpush1.bf16.msra.mxu1 %v11202_v28  ;;  %v11258_v9 = vld [vmem:[%s15121_s13 + $0x26c] ss:$28 sps:$4 sm:$0xff]   ;;  %v11147_v28 = vld [vmem:[%s15119_s11 + $0x4c4] ss:$24 sps:$4 sm:$0xff]  }
 0x5ac   : > { %8252 = vmatprep.subr.bf16.mxu1 %v11210_v30  ;;  %v11145_v30 = vld [vmem:[%s15119_s11 + $0x4c0] ss:$24 sps:$4 sm:$0xff]  }
 0x5ae   : > { %5933 = vmatpush1.bf16.msra.mxu0 %v11079_v44  ;;  %v11127_v44 = vld [vmem:[%s15119_s11 + $0x3a0] ss:$24 sps:$4 sm:$0xff]  }
 0x5af   : > { %5934 = vmatprep.subr.bf16.mxu0 %v11084_v10  ;;  %8253 = vmatpush1.bf16.msra.mxu1 %v11208_v32  ;;  %v11256_v10 = vld [vmem:[%s15121_s13 + $0x268] ss:$28 sps:$4 sm:$0xff]  }
 0x5b0   : > { %8254 = vmatprep.subr.bf16.mxu1 %v11216_v13  ;;  %v11148_v32 = vld [vmem:[%s15119_s11 + $0x4f0] ss:$24 sps:$4 sm:$0xff]   ;;  %v11151_v13 = vld [vmem:[%s15119_s11 + $0x520] ss:$24 sps:$4 sm:$0xff]  }
 0x5b2   : > { %5935 = vmatpush1.bf16.msra.mxu0 %v11082_v4  ;;  %v11132_v4 = vld [vmem:[%s15119_s11 + $0x3d4] ss:$24 sps:$4 sm:$0xff]  }
 0x5b3   : > { %5936 = vmatprep.subr.bf16.mxu0 %v11087_v6  ;;  %8255 = vmatpush1.bf16.msra.mxu1 %v11214_v17  ;;  %v11264_v6 = vld [vmem:[%s15121_s13 + $0x2a4] ss:$28 sps:$4 sm:$0xff]   ;;  %v11154_v17 = vld [vmem:[%s15119_s11 + $0x550] ss:$24 sps:$4 sm:$0xff]  }
 0x5b4   : > { %8256 = vmatprep.subr.bf16.mxu1 %v11222_v35  ;;  %v11157_v35 = vld [vmem:[%s15119_s11 + $0x580] ss:$24 sps:$4 sm:$0xff]  }
 0x5b6   : > { %5937 = vmatpush1.bf16.msra.mxu0 %v11085_v7  ;;  %v11130_v7 = vld [vmem:[%s15119_s11 + $0x3d0] ss:$24 sps:$4 sm:$0xff]  }
 0x5b7   : > { %5938 = vmatprep.subr.bf16.mxu0 %v11090_v8  ;;  %8257 = vmatpush1.bf16.msra.mxu1 %v11220_v37  ;;  %v11262_v8 = vld [vmem:[%s15121_s13 + $0x2a0] ss:$28 sps:$4 sm:$0xff]   ;;  %v11160_v37 = vld [vmem:[%s15119_s11 + $0x5b0] ss:$24 sps:$4 sm:$0xff]  }
 0x5b8   : > { %8258 = vmatprep.subr.bf16.mxu1 %v11228_v42  ;;  %v11163_v42 = vld [vmem:[%s15119_s11 + $0x5e0] ss:$24 sps:$4 sm:$0xff]  }
 0x5ba   : > { %5939 = vmatpush1.bf16.msra.mxu0 %v11088_v11  ;;  %v11135_v11 = vld [vmem:[%s15119_s11 + $0x404] ss:$24 sps:$4 sm:$0xff]  }
 0x5bb   : > { %5940 = vmatprep.subr.bf16.mxu0 %v11093_v12  ;;  %8259 = vmatpush1.bf16.msra.mxu1 %v11226_v45  ;;  %v11270_v12 = vld [vmem:[%s15121_s13 + $0x2dc] ss:$28 sps:$4 sm:$0xff]   ;;  %v11166_v45 = vld [vmem:[%s15119_s11 + $0x610] ss:$24 sps:$4 sm:$0xff]  }
 0x5bc   : > { %8260 = vmatprep.subr.bf16.mxu1 %v11234_v48  ;;  %v11169_v48 = vld [vmem:[%s15119_s11 + $0x640] ss:$24 sps:$4 sm:$0xff]  }
 0x5be   : > { %5941 = vmatpush1.bf16.msra.mxu0 %v11091_v14  ;;  %v11133_v14 = vld [vmem:[%s15119_s11 + $0x400] ss:$24 sps:$4 sm:$0xff]  }
 0x5bf   : > { %5942 = vmatprep.subr.bf16.mxu0 %v11096_v16  ;;  %8261 = vmatpush1.bf16.msra.mxu1 %v11232_v51  ;;  %v11268_v16 = vld [vmem:[%s15121_s13 + $0x2d8] ss:$28 sps:$4 sm:$0xff]   ;;  %v11172_v51 = vld [vmem:[%s15119_s11 + $0x670] ss:$24 sps:$4 sm:$0xff]  }
 0x5c0   : > { %8262 = vmatprep.subr.bf16.mxu1 %v11240_v53  ;;  %v11178_v53 = vld [vmem:[%s15119_s11 + $0x6d0] ss:$24 sps:$4 sm:$0xff]  }
 0x5c2   : > { %5943 = vmatpush1.bf16.msra.mxu0 %v11094_v19  ;;  %v11136_v19 = vld [vmem:[%s15119_s11 + $0x430] ss:$24 sps:$4 sm:$0xff]  }
 0x5c3   : > { %5944 = vmatprep.subr.bf16.mxu0 %v11099_v21  ;;  %8263 = vmatpush1.bf16.msra.mxu1 %v11238_v55  ;;  %v11276_v21 = vld [vmem:[%s15121_s13 + $0x314] ss:$28 sps:$4 sm:$0xff]   ;;  %v11181_v55 = vld [vmem:[%s15119_s11 + $0x700] ss:$24 sps:$4 sm:$0xff]  }
 0x5c4   : > { %8264 = vmatprep.subr.bf16.mxu1 %v11246_v57  ;;  %v11184_v57 = vld [vmem:[%s15119_s11 + $0x730] ss:$24 sps:$4 sm:$0xff]  }
 0x5c6   : > { %5945 = vmatpush1.bf16.msra.mxu0 %v11097_v23  ;;  %v11139_v23 = vld [vmem:[%s15119_s11 + $0x460] ss:$24 sps:$4 sm:$0xff]  }
 0x5c7   : > { %5946 = vmatprep.subr.bf16.mxu0 %v11102_v3  ;;  %8265 = vmatpush1.bf16.msra.mxu1 %v11244_v60  ;;  %v11282_v3 = vld [vmem:[%s15121_s13 + $0x34c] ss:$28 sps:$4 sm:$0xff]   ;;  %v11187_v60 = vld [vmem:[%s15119_s11 + $0x760] ss:$24 sps:$4 sm:$0xff]  }
 0x5c8   : > { %8266 = vmatprep.subr.bf16.mxu1 %v11252_v63  ;;  %v11193_v63 = vld [vmem:[%s15121_s13 + $0x8] ss:$28 sps:$4 sm:$0xff]  }
 0x5ca   : > { %5947 = vmatpush1.bf16.msra.mxu0 %v11100_v27  ;;  %v11142_v27 = vld [vmem:[%s15119_s11 + $0x490] ss:$24 sps:$4 sm:$0xff]  }
 0x5cb   : > { %5948 = vmatprep.subr.bf16.mxu0 %v11105_v29  ;;  %8267 = vmatpush1.bf16.msra.mxu1 %v11250_v1  ;;  %v11288_v29 = vld [vmem:[%s15121_s13 + $0x384] ss:$28 sps:$4 sm:$0xff]  }
 0x5cc   : > { %8268 = vmatprep.subr.bf16.mxu1 %v11258_v9  ;;  %v11199_v1 = vld [vmem:[%s15121_s13 + $0x40] ss:$28 sps:$4 sm:$0xff]   ;;  %v11205_v9 = vld [vmem:[%s15121_s13 + $0x78] ss:$28 sps:$4 sm:$0xff]  }
 0x5ce   : > { %5949 = vmatpush1.bf16.msra.mxu0 %v11103_v31  ;;  %v11150_v31 = vld [vmem:[%s15119_s11 + $0x4f4] ss:$24 sps:$4 sm:$0xff]  }
 0x5cf   : > { %5950 = vmatprep.subr.bf16.mxu0 %v11108_v33  ;;  %8269 = vmatpush1.bf16.msra.mxu1 %v11256_v10  ;;  %v11153_v33 = vld [vmem:[%s15119_s11 + $0x524] ss:$24 sps:$4 sm:$0xff]   ;;  %v11219_v10 = vld [vmem:[%s15121_s13 + $0xec] ss:$28 sps:$4 sm:$0xff]  }
 0x5d0   : > { %8270 = vmatprep.subr.bf16.mxu1 %v11264_v6  ;;  %v11225_v6 = vld [vmem:[%s15121_s13 + $0x124] ss:$28 sps:$4 sm:$0xff]  }
 0x5d2   : > { %5951 = vmatpush1.bf16.msra.mxu0 %v11106_v34  ;;  %v11156_v34 = vld [vmem:[%s15119_s11 + $0x554] ss:$24 sps:$4 sm:$0xff]  }
 0x5d3   : > { %5952 = vmatprep.subr.bf16.mxu0 %v11111_v15  ;;  %8271 = vmatpush1.bf16.msra.mxu1 %v11262_v8  ;;  %v11159_v15 = vld [vmem:[%s15119_s11 + $0x584] ss:$24 sps:$4 sm:$0xff]  }
 0x5d4   : > { %8272 = vmatprep.subr.bf16.mxu1 %v11270_v12  ;;  %v11231_v8 = vld [vmem:[%s15121_s13 + $0x15c] ss:$28 sps:$4 sm:$0xff]   ;;  %v11237_v12 = vld [vmem:[%s15121_s13 + $0x194] ss:$28 sps:$4 sm:$0xff]  }
 0x5d6   : > { %5953 = vmatpush1.bf16.msra.mxu0 %v11109_v36  ;;  %v11162_v36 = vld [vmem:[%s15119_s11 + $0x5b4] ss:$24 sps:$4 sm:$0xff]  }
 0x5d7   : > { %5954 = vmatprep.subr.bf16.mxu0 %v11114_v38  ;;  %8273 = vmatpush1.bf16.msra.mxu1 %v11268_v16  ;;  %v11165_v38 = vld [vmem:[%s15119_s11 + $0x5e4] ss:$24 sps:$4 sm:$0xff]   ;;  %v11243_v16 = vld [vmem:[%s15121_s13 + $0x1cc] ss:$28 sps:$4 sm:$0xff]  }
 0x5d8   : > { %8274 = vmatprep.subr.bf16.mxu1 %v11276_v21  ;;  %v11255_v21 = vld [vmem:[%s15121_s13 + $0x23c] ss:$28 sps:$4 sm:$0xff]  }
 0x5da   : > { %5955 = vmatpush1.bf16.msra.mxu0 %v11112_v43  ;;  %v11168_v43 = vld [vmem:[%s15119_s11 + $0x614] ss:$24 sps:$4 sm:$0xff]  }
 0x5db   : > { %5956 = vmatprep.subr.bf16.mxu0 %v11117_v46  ;;  %8275 = vmatpush1.bf16.msra.mxu1 %v11274_v22  ;;  %v11171_v46 = vld [vmem:[%s15119_s11 + $0x644] ss:$24 sps:$4 sm:$0xff]   ;;  %v11253_v22 = vld [vmem:[%s15121_s13 + $0x238] ss:$28 sps:$4 sm:$0xff]  }
 0x5dc   : > { %8276 = vmatprep.subr.bf16.mxu1 %v11282_v3  ;;  %v11267_v3 = vld [vmem:[%s15121_s13 + $0x2ac] ss:$28 sps:$4 sm:$0xff]  }
 0x5de   : > { %5957 = vmatpush1.bf16.msra.mxu0 %v11115_v49  ;;  %v11174_v49 = vld [vmem:[%s15119_s11 + $0x674] ss:$24 sps:$4 sm:$0xff]  }
 0x5df   : > { %5969 = vmatprep.subr.bf16.mxu0 %v11120_v52  ;;  %8277 = vmatpush1.bf16.msra.mxu1 %v11280_v26  ;;  %v11180_v52 = vld [vmem:[%s15119_s11 + $0x6d4] ss:$24 sps:$4 sm:$0xff]   ;;  %v11265_v26 = vld [vmem:[%s15121_s13 + $0x2a8] ss:$28 sps:$4 sm:$0xff]  }
 0x5e0   : > { %8289 = vmatprep.subr.bf16.mxu1 %v11288_v29 }
 0x5e1   : > { %5959 = vmatmul.mubr.bf16.vlgmr.msra.gmra.mrb[28].mxu0 %v13386_v40  ;;  %v11126_v40 = vld [vmem:[%s15119_s11 + $0x374] ss:$24 sps:$4 sm:$0xff]  }
 0x5e2   : > { %5970 = vmatpush1.bf16.msra.mxu0 %v11118_v54  ;;  %6001 = vmatprep.mubr.bf16.mxu0 %v13398_v47  ;;  %v11124_v47 = vld [vmem:[%s15119_s11 + $0x370] ss:$24 sps:$4 sm:$0xff]   ;;  %v11183_v54 = vld [vmem:[%s15119_s11 + $0x704] ss:$24 sps:$4 sm:$0xff]  }
 0x5e3   : > { %5971 = vmatprep.subr.bf16.mxu0 %v11123_v56  ;;  %v11186_v56 = vld [vmem:[%s15119_s11 + $0x734] ss:$24 sps:$4 sm:$0xff]  }
 0x5e6   : > { %5972 = vmatpush1.bf16.msra.mxu0 %v11121_v58  ;;  %v11189_v58 = vld [vmem:[%s15119_s11 + $0x764] ss:$24 sps:$4 sm:$0xff]  }
 0x5e7   : > { %5973 = vmatprep.subr.bf16.mxu0 %v11126_v40  ;;  %v11195_v40 = vld [vmem:[%s15121_s13 + $0xc] ss:$28 sps:$4 sm:$0xff]  }
 0x5ea   : > { %5974 = vmatpush1.bf16.msra.mxu0 %v11124_v47  ;;  %v11201_v47 = vld [vmem:[%s15121_s13 + $0x44] ss:$28 sps:$4 sm:$0xff]  }
 0x5eb   : > { %5975 = vmatprep.subr.bf16.mxu0 %v11129_v2  ;;  %v11207_v2 = vld [vmem:[%s15121_s13 + $0x7c] ss:$28 sps:$4 sm:$0xff]  }
 0x5ee   : > { %5976 = vmatpush1.bf16.msra.mxu0 %v11127_v44  ;;  %v11211_v44 = vld [vmem:[%s15121_s13 + $0xb0] ss:$28 sps:$4 sm:$0xff]  }
 0x5ef   : > { %5977 = vmatprep.subr.bf16.mxu0 %v11132_v4  ;;  %v11217_v4 = vld [vmem:[%s15121_s13 + $0xe8] ss:$28 sps:$4 sm:$0xff]  }
 0x5f2   : > { %5978 = vmatpush1.bf16.msra.mxu0 %v11130_v7  ;;  %v11223_v7 = vld [vmem:[%s15121_s13 + $0x120] ss:$28 sps:$4 sm:$0xff]  }
 0x5f3   : > { %5979 = vmatprep.subr.bf16.mxu0 %v11135_v11  ;;  %v11229_v11 = vld [vmem:[%s15121_s13 + $0x158] ss:$28 sps:$4 sm:$0xff]  }
 0x5f6   : > { %5980 = vmatpush1.bf16.msra.mxu0 %v11133_v14  ;;  %v11235_v14 = vld [vmem:[%s15121_s13 + $0x190] ss:$28 sps:$4 sm:$0xff]  }
 0x5f7   : > { %5981 = vmatprep.subr.bf16.mxu0 %v11138_v18  ;;  %v11241_v18 = vld [vmem:[%s15121_s13 + $0x1c8] ss:$28 sps:$4 sm:$0xff]  }
 0x5fa   : > { %5982 = vmatpush1.bf16.msra.mxu0 %v11136_v19  ;;  %v11249_v19 = vld [vmem:[%s15121_s13 + $0x204] ss:$28 sps:$4 sm:$0xff]  }
 0x5fb   : > { %5983 = vmatprep.subr.bf16.mxu0 %v11141_v20  ;;  %v11247_v20 = vld [vmem:[%s15121_s13 + $0x200] ss:$28 sps:$4 sm:$0xff]  }
 0x5fe   : > { %5984 = vmatpush1.bf16.msra.mxu0 %v11139_v23  ;;  %v11261_v23 = vld [vmem:[%s15121_s13 + $0x274] ss:$28 sps:$4 sm:$0xff]  }
 0x5ff   : > { %5985 = vmatprep.subr.bf16.mxu0 %v11144_v24  ;;  %v11259_v24 = vld [vmem:[%s15121_s13 + $0x270] ss:$28 sps:$4 sm:$0xff]  }
 0x602   : > { %5986 = vmatpush1.bf16.msra.mxu0 %v11142_v27  ;;  %v14121_v27 = vld [vmem:[%s15120_s12] sm:$0x3f] }
 0x603   : > { %5987 = vmatprep.subr.bf16.mxu0 %v11147_v28  ;;  %v11273_v28 = vld [vmem:[%s15121_s13 + $0x2e4] ss:$28 sps:$4 sm:$0xff]   ;;  %v4441_v29 = vrot.slane %v14121_v27, %v11960_v61 }
 0x606   : > { %5988 = vmatpush1.bf16.msra.mxu0 %v11145_v30  ;;  %v4449_v30 = vrot.slane %v14121_v27, %v12163_v25 }
 0x607   : > { %5989 = vmatprep.subr.bf16.mxu0 %v11150_v31  ;;  %v4445_v31 = vrot.slane %v14121_v27, %v11963_v62 }
 0x60a   : > { %5990 = vmatpush1.bf16.msra.mxu0 %v11148_v32  ;;  %v4453_v32 = vrot.slane %v14121_v27, %v12466_v39 }
 0x60b   : > { %5991 = vmatprep.subr.bf16.mxu0 %v11153_v33  ;;  %v11271_v33 = vld [vmem:[%s15121_s13 + $0x2e0] ss:$28 sps:$4 sm:$0xff]  }
 0x60e   : > { %5992 = vmatpush1.bf16.msra.mxu0 %v11151_v13  ;;  %v11279_v13 = vld [vmem:[%s15121_s13 + $0x31c] ss:$28 sps:$4 sm:$0xff]  }
 0x60f   : > { %5993 = vmatprep.subr.bf16.mxu0 %v11156_v34 }
 0x612   : > { %5994 = vmatpush1.bf16.msra.mxu0 %v11154_v17 }
 0x613   : > { %5995 = vmatprep.subr.bf16.mxu0 %v11159_v15 }
 0x616   : > { %5996 = vmatpush1.bf16.msra.mxu0 %v11157_v35 }
 0x617   : > { %5997 = vmatprep.subr.bf16.mxu0 %v11162_v36 }
 0x61a   : > { %5998 = vmatpush1.bf16.msra.mxu0 %v11160_v37 }
 0x61b   : > { %5999 = vmatprep.subr.bf16.mxu0 %v11165_v38 }
 0x61e   : > { %6000 = vmatpush1.bf16.msra.mxu0 %v11163_v42 }
 0x61f   : > { %6012 = vmatprep.subr.bf16.mxu0 %v11168_v43 }
 0x621   : > { %6002 = vmatmul.mubr.bf16.vlgmr.msra.gmra.mrb[28].mxu0 %v13388_v41  ;;  %v11177_v41 = vld [vmem:[%s15119_s11 + $0x6a4] ss:$24 sps:$4 sm:$0xff]  }
 0x622   : > { %6013 = vmatpush1.bf16.msra.mxu0 %v11166_v45  ;;  %6044 = vmatprep.mubr.bf16.mxu0 %v11769_v0  ;;  %v11175_v0 = vld [vmem:[%s15119_s11 + $0x6a0] ss:$24 sps:$4 sm:$0xff]  }
 0x623   : > { %6014 = vmatprep.subr.bf16.mxu0 %v11171_v46  ;;  %v11277_v46 = vld [vmem:[%s15121_s13 + $0x318] ss:$28 sps:$4 sm:$0xff]  }
 0x626   : > { %6015 = vmatpush1.bf16.msra.mxu0 %v11169_v48  ;;  %v11285_v48 = vld [vmem:[%s15121_s13 + $0x354] ss:$28 sps:$4 sm:$0xff]  }
 0x627   : > { %6016 = vmatprep.subr.bf16.mxu0 %v11174_v49 }
 0x62a   : > { %6017 = vmatpush1.bf16.msra.mxu0 %v11172_v51 }
 0x62b   : > { %6018 = vmatprep.subr.bf16.mxu0 %v11177_v41 }
 0x62e   : > { %6019 = vmatpush1.bf16.msra.mxu0 %v11175_v0 }
 0x62f   : > { %6020 = vmatprep.subr.bf16.mxu0 %v11180_v52 }
 0x632   : > { %6021 = vmatpush1.bf16.msra.mxu0 %v11178_v53 }
 0x633   : > { %6022 = vmatprep.subr.bf16.mxu0 %v11183_v54 }
 0x636   : > { %6023 = vmatpush1.bf16.msra.mxu0 %v11181_v55 }
 0x637   : > { %6024 = vmatprep.subr.bf16.mxu0 %v11186_v56 }
 0x63a   : > { %6025 = vmatpush1.bf16.msra.mxu0 %v11184_v57 }
 0x63b   : > { %6026 = vmatprep.subr.bf16.mxu0 %v11189_v58 }
 0x63e   : > { %6027 = vmatpush1.bf16.msra.mxu0 %v11187_v60 }
 0x63f   : > { %8375 = vmatprep.subr.bf16.mxu0 %v11195_v40  ;;  %v11283_v40 = vld [vmem:[%s15121_s13 + $0x350] ss:$28 sps:$4 sm:$0xff]  }
 0x641   : > { %6045 = vmatmul.mubr.bf16.vlgmr.msra.gmra.mrb[28].mxu0 %v13513_v50  ;;  %v11213_v50 = vld [vmem:[%s15121_s13 + $0xb4] ss:$28 sps:$4 sm:$0xff]  }
 0x642   : > { %8376 = vmatpush1.bf16.msra.mxu0 %v11193_v63  ;;  %v11291_v63 = vld [vmem:[%s15121_s13 + $0x38c] ss:$28 sps:$4 sm:$0xff]  }
 0x643   : > { %8377 = vmatprep.subr.bf16.mxu0 %v11201_v47 }
 0x646   : > { %8378 = vmatpush1.bf16.msra.mxu0 %v11199_v1 }
 0x647   : > { %8379 = vmatprep.subr.bf16.mxu0 %v11207_v2 }
 0x64a   : > { %8380 = vmatpush1.bf16.msra.mxu0 %v11205_v9 }
 0x64b   : > { %8381 = vmatprep.subr.bf16.mxu0 %v11213_v50 }
 0x64e   : > { %8382 = vmatpush1.bf16.msra.mxu0 %v11211_v44 }
 0x64f   : > { %8383 = vmatprep.subr.bf16.mxu0 %v11219_v10 }
 0x652   : > { %8384 = vmatpush1.bf16.msra.mxu0 %v11217_v4 }
 0x653   : > { %8385 = vmatprep.subr.bf16.mxu0 %v11225_v6 }
 0x656   : > { %8386 = vmatpush1.bf16.msra.mxu0 %v11223_v7 }
 0x657   : > { %8387 = vmatprep.subr.bf16.mxu0 %v11231_v8 }
 0x65a   : > { %8388 = vmatpush1.bf16.msra.mxu0 %v11229_v11 }
 0x65b   : > { %8389 = vmatprep.subr.bf16.mxu0 %v11237_v12 }
 0x65e   : > { %8390 = vmatpush1.bf16.msra.mxu0 %v11235_v14 }
 0x65f   : > { %8391 = vmatprep.subr.bf16.mxu0 %v11243_v16  ;;  %v11286_v16 = vld [vmem:[%s15121_s13 + $0x380] ss:$28 sps:$4 sm:$0xff]  }
 0x662   : > { %8392 = vmatpush1.bf16.msra.mxu0 %v11241_v18  ;;  %v11289_v18 = vld [vmem:[%s15121_s13 + $0x388] ss:$28 sps:$4 sm:$0xff]  }
 0x663   : > { %8393 = vmatprep.subr.bf16.mxu0 %v11249_v19  ;;  %v11294_v19 = vld [vmem:[%s15121_s13 + $0x3bc] ss:$28 sps:$4 sm:$0xff]  }
 0x666   : > { %8394 = vmatpush1.bf16.msra.mxu0 %v11247_v20  ;;  %v11297_v20 = vld [vmem:[%s15121_s13 + $0x3c4] ss:$28 sps:$4 sm:$0xff]  }
 0x667   : > { %8395 = vmatprep.subr.bf16.mxu0 %v11255_v21  ;;  %v11292_v21 = vld [vmem:[%s15121_s13 + $0x3b8] ss:$28 sps:$4 sm:$0xff]  }
 0x66a   : > { %8396 = vmatpush1.bf16.msra.mxu0 %v11253_v22  ;;  %v11295_v22 = vld [vmem:[%s15121_s13 + $0x3c0] ss:$28 sps:$4 sm:$0xff]  }
 0x66b   : > { %8397 = vmatprep.subr.bf16.mxu0 %v11261_v23  ;;  %v11300_v23 = vld [vmem:[%s15121_s13 + $0x3f4] ss:$28 sps:$4 sm:$0xff]  }
 0x66e   : > { %8398 = vmatpush1.bf16.msra.mxu0 %v11259_v24  ;;  %v11303_v24 = vld [vmem:[%s15121_s13 + $0x3fc] ss:$28 sps:$4 sm:$0xff]  }
 0x66f   : > { %8399 = vmatprep.subr.bf16.mxu0 %v11267_v3  ;;  %v11298_v3 = vld [vmem:[%s15121_s13 + $0x3f0] ss:$28 sps:$4 sm:$0xff]  }
 0x672   : > { %8400 = vmatpush1.bf16.msra.mxu0 %v11265_v26  ;;  %v11301_v26 = vld [vmem:[%s15121_s13 + $0x3f8] ss:$28 sps:$4 sm:$0xff]  }
 0x673   : > { %8401 = vmatprep.subr.bf16.mxu0 %v11273_v28  ;;  %v11306_v28 = vld [vmem:[%s15121_s13 + $0x42c] ss:$28 sps:$4 sm:$0xff]  }
 0x674   : > { %v5788_v34 = vpop.f32.mrb[24].mxu0  ;;  %v5917_v17 = vpop.f32.mrb[20].mxu1 }
 0x675   : > { %v10052_v15 = vadd.f32 %v5788_v34, %v4441_v29  ;;  %v10056_v35 = vadd.f32 %v5917_v17, %v4449_v30  ;;  %v5790_v36 = vpop.f32.mrb[25].mxu0  ;;  %v5919_v37 = vpop.f32.mrb[21].mxu1  ;;  %v11313_v34 = vld [vmem:[%s15121_s13 + $0x468] ss:$28 sps:$4 sm:$0xff]   ;;  %v11318_v17 = vld [vmem:[%s15121_s13 + $0x49c] ss:$28 sps:$4 sm:$0xff]  }
 0x676   : > { %v10053_v38 = vadd.f32 %v5790_v36, %v4445_v31  ;;  %v10057_v42 = vadd.f32 %v5919_v37, %v4453_v32  ;;  %v5792_v43 = vpop.f32.mrb[26].mxu0  ;;  %v5921_v45 = vpop.f32.mrb[22].mxu1  ;;  %8402 = vmatpush1.bf16.msra.mxu0 %v11271_v33  ;;  %v11315_v33 = vld [vmem:[%s15121_s13 + $0x46c] ss:$28 sps:$4 sm:$0xff]   ;;  %v11319_v36 = vld [vmem:[%s15121_s13 + $0x4a0] ss:$28 sps:$4 sm:$0xff]  }
 0x677   : > { %vm6055_vm6 = vcmp.ge.f32.partialorder %v10052_v15, 0.0  ;;  %v6067_v49 = vmul.f32 0.01, %v10052_v15  ;;  %vm6057_vm7 = vcmp.ge.f32.partialorder %v10056_v35, 0.0  ;;  %v6069_v51 = vmul.f32 0.01, %v10056_v35  ;;  %8403 = vmatprep.subr.bf16.mxu0 %v11279_v13 }
 0x678   : > { %vm6056_vm8 = vcmp.ge.f32.partialorder %v10053_v38, 0.0  ;;  %v6068_v41 = vmul.f32 0.01, %v10053_v38  ;;  %vm6058_vm9 = vcmp.ge.f32.partialorder %v10057_v42, 0.0  ;;  %v6070_v0 = vmul.f32 0.01, %v10057_v42 }
 0x679   : > { %v10054_v52 = vadd.f32 %v5792_v43, %v4441_v29  ;;  %v10058_v53 = vadd.f32 %v5921_v45, %v4449_v30  ;;  %v5794_v54 = vpop.f32.mrb[27].mxu0  ;;  %v5923_v55 = vpop.f32.mrb[23].mxu1  ;;  %v6079_v56 = vsel %vm6055_vm6, %v10052_v15, %v6067_v49  ;;  %v6081_v57 = vsel %vm6057_vm7, %v10056_v35, %v6069_v51  ;;  %v11309_v29 = vld [vmem:[%s15121_s13 + $0x434] ss:$28 sps:$4 sm:$0xff]   ;;  %v11304_v30 = vld [vmem:[%s15121_s13 + $0x428] ss:$28 sps:$4 sm:$0xff]  }
 0x67a   : > { %v10055_v58 = vadd.f32 %v5794_v54, %v4445_v31  ;;  %v10059_v60 = vadd.f32 %v5923_v55, %v4453_v32  ;;  %8404 = vmatpush1.bf16.msra.mxu0 %v11277_v46  ;;  %v6080_v50 = vsel %vm6056_vm8, %v10053_v38, %v6068_v41  ;;  %v6082_v44 = vsel %vm6058_vm9, %v10057_v42, %v6070_v0  ;;  %v11307_v31 = vld [vmem:[%s15121_s13 + $0x430] ss:$28 sps:$4 sm:$0xff]   ;;  %v11312_v32 = vld [vmem:[%s15121_s13 + $0x464] ss:$28 sps:$4 sm:$0xff]   ;;  %v11316_v35 = vld [vmem:[%s15121_s13 + $0x498] ss:$28 sps:$4 sm:$0xff]  }
 0x67b   : > { %vm6061_vm10 = vcmp.ge.f32.partialorder %v10054_v52, 0.0  ;;  %v6073_v47 = vmul.f32 0.01, %v10054_v52  ;;  %vm6063_vm11 = vcmp.ge.f32.partialorder %v10058_v53, 0.0  ;;  %v6075_v1 = vmul.f32 0.01, %v10058_v53  ;;  %8405 = vmatprep.subr.bf16.mxu0 %v11285_v48 }
 0x67c   : > { %vm6062_vm12 = vcmp.ge.f32.partialorder %v10055_v58, 0.0  ;;  %v6074_v2 = vmul.f32 0.01, %v10055_v58  ;;  %vm6064_vm13 = vcmp.ge.f32.partialorder %v10059_v60, 0.0  ;;  %v6076_v9 = vmul.f32 0.01, %v10059_v60 }
 0x67d   : > { %v6085_v10 = vsel %vm6061_vm10, %v10054_v52, %v6073_v47  ;;  %v6087_v4 = vsel %vm6063_vm11, %v10058_v53, %v6075_v1  ;;  %v11310_v13 = vld [vmem:[%s15121_s13 + $0x460] ss:$28 sps:$4 sm:$0xff]   ;;  %v11324_v37 = vld [vmem:[%s15121_s13 + $0x4d4] ss:$28 sps:$4 sm:$0xff]   ;;  %v11330_v45 = vld [vmem:[%s15121_s13 + $0x50c] ss:$28 sps:$4 sm:$0xff]  }
 0x67e   : > { %v14154_v6 = vpack.c.bf16 %v6085_v10, %v6079_v56  ;;  %v14156_v7 = vpack.c.bf16 %v6087_v4, %v6081_v57  ;;  %v6086_v8 = vsel %vm6062_vm12, %v10055_v58, %v6074_v2  ;;  %v6088_v11 = vsel %vm6064_vm13, %v10059_v60, %v6076_v9  ;;  %8406 = vmatpush1.bf16.msra.mxu0 %v11283_v40  ;;  %v11321_v15 = vld [vmem:[%s15121_s13 + $0x4a4] ss:$28 sps:$4 sm:$0xff]   ;;  %v11327_v38 = vld [vmem:[%s15121_s13 + $0x4dc] ss:$28 sps:$4 sm:$0xff]   ;;  %v11322_v42 = vld [vmem:[%s15121_s13 + $0x4d0] ss:$28 sps:$4 sm:$0xff]  }
 0x67f   : > { %v14158_v12 = vpack.c.bf16 %v6086_v8, %v6080_v50  ;;  %v14160_v14 = vpack.c.bf16 %v6088_v11, %v6082_v44  ;;  %8418 = vmatprep.subr.bf16.mxu0 %v11291_v63  ;;  %v11325_v43 = vld [vmem:[%s15121_s13 + $0x4d8] ss:$28 sps:$4 sm:$0xff]   ;;  %v11328_v48 = vld [vmem:[%s15121_s13 + $0x508] ss:$28 sps:$4 sm:$0xff]   ;;  %v11331_v49 = vld [vmem:[%s15121_s13 + $0x510] ss:$28 sps:$4 sm:$0xff]  }
 0x680   : > { %v11333_v46 = vld [vmem:[%s15121_s13 + $0x514] ss:$28 sps:$4 sm:$0xff]   ;;  %v11336_v51 = vld [vmem:[%s15121_s13 + $0x544] ss:$28 sps:$4 sm:$0xff]   ;;  %v11339_v41 = vld [vmem:[%s15121_s13 + $0x54c] ss:$28 sps:$4 sm:$0xff]  }
 0x681   : > { %8278 = vmatprep.mubr.bf16.mxu1 %v14158_v12  ;;  %8407 = vmatprep.mubr.bf16.mxu0 %v14158_v12  ;;  %v11334_v0 = vld [vmem:[%s15121_s13 + $0x540] ss:$28 sps:$4 sm:$0xff]   ;;  %v11337_v52 = vld [vmem:[%s15121_s13 + $0x548] ss:$28 sps:$4 sm:$0xff]   ;;  %v11340_v55 = vld [vmem:[%s15121_s13 + $0x578] ss:$28 sps:$4 sm:$0xff]  }
 0x682   : > { %8279 = vmatmul.mubr.bf16.vlgmr.msra.gmra.mrb[24].mxu1 %v14154_v6  ;;  %8408 = vmatmul.mubr.bf16.vlgmr.msra.gmra.mrb[32].mxu0 %v14154_v6  ;;  %v11342_v53 = vld [vmem:[%s15121_s13 + $0x57c] ss:$28 sps:$4 sm:$0xff]   ;;  %v11345_v54 = vld [vmem:[%s15121_s13 + $0x584] ss:$28 sps:$4 sm:$0xff]   ;;  %v11348_v57 = vld [vmem:[%s15121_s13 + $0x5b4] ss:$28 sps:$4 sm:$0xff]  }
 0x683   : > { %8290 = vmatpush1.bf16.msra.mxu1 %v11286_v16  ;;  %8321 = vmatprep.mubr.bf16.mxu1 %v14160_v14  ;;  %v11343_v56 = vld [vmem:[%s15121_s13 + $0x580] ss:$28 sps:$4 sm:$0xff]   ;;  %v11346_v60 = vld [vmem:[%s15121_s13 + $0x5b0] ss:$28 sps:$4 sm:$0xff]   ;;  %v11349_v40 = vld [vmem:[%s15121_s13 + $0x5b8] ss:$28 sps:$4 sm:$0xff]  }
 0x684   : > { %8419 = vmatpush1.bf16.msra.mxu0 %v11289_v18  ;;  %8450 = vmatprep.mubr.bf16.mxu0 %v14160_v14  ;;  %v11351_v58 = vld [vmem:[%s15121_s13 + $0x5bc] ss:$28 sps:$4 sm:$0xff]   ;;  %v11354_v63 = vld [vmem:[%s15121_s13 + $0x5ec] ss:$28 sps:$4 sm:$0xff]   ;;  %v11357_v47 = vld [vmem:[%s15121_s13 + $0x5f4] ss:$28 sps:$4 sm:$0xff]  }
 0x685   : > { %8291 = vmatprep.subr.bf16.mxu1 %v11294_v19  ;;  %8420 = vmatprep.subr.bf16.mxu0 %v11297_v20  ;;  %v11352_v1 = vld [vmem:[%s15121_s13 + $0x5e8] ss:$28 sps:$4 sm:$0xff]   ;;  %v11355_v2 = vld [vmem:[%s15121_s13 + $0x5f0] ss:$28 sps:$4 sm:$0xff]   ;;  %v11358_v44 = vld [vmem:[%s15121_s13 + $0x620] ss:$28 sps:$4 sm:$0xff]  }
 0x686   : > { %v11360_v9 = vld [vmem:[%s15121_s13 + $0x624] ss:$28 sps:$4 sm:$0xff]   ;;  %v11363_v50 = vld [vmem:[%s15121_s13 + $0x62c] ss:$28 sps:$4 sm:$0xff]   ;;  %v11366_v4 = vld [vmem:[%s15121_s13 + $0x65c] ss:$28 sps:$4 sm:$0xff]  }
 0x687   : > { %8292 = vmatpush1.bf16.msra.mxu1 %v11292_v21  ;;  %v11361_v10 = vld [vmem:[%s15121_s13 + $0x628] ss:$28 sps:$4 sm:$0xff]   ;;  %v11364_v11 = vld [vmem:[%s15121_s13 + $0x658] ss:$28 sps:$4 sm:$0xff]   ;;  %v11367_v16 = vld [vmem:[%s15121_s13 + $0x660] ss:$28 sps:$4 sm:$0xff]  }
 0x688   : > { %8421 = vmatpush1.bf16.msra.mxu0 %v11295_v22  ;;  %8293 = vmatprep.subr.bf16.mxu1 %v11300_v23  ;;  %v11369_v8 = vld [vmem:[%s15121_s13 + $0x664] ss:$28 sps:$4 sm:$0xff]   ;;  %v11372_v18 = vld [vmem:[%s15121_s13 + $0x694] ss:$28 sps:$4 sm:$0xff]   ;;  %v11375_v19 = vld [vmem:[%s15121_s13 + $0x69c] ss:$28 sps:$4 sm:$0xff]  }
 0x689   : > { %8422 = vmatprep.subr.bf16.mxu0 %v11303_v24  ;;  %v11370_v20 = vld [vmem:[%s15121_s13 + $0x690] ss:$28 sps:$4 sm:$0xff]   ;;  %v11373_v21 = vld [vmem:[%s15121_s13 + $0x698] ss:$28 sps:$4 sm:$0xff]   ;;  %v11376_v24 = vld [vmem:[%s15121_s13 + $0x6c8] ss:$28 sps:$4 sm:$0xff]  }
 0x68a   : > { %v11378_v22 = vld [vmem:[%s15121_s13 + $0x6cc] ss:$28 sps:$4 sm:$0xff]   ;;  %v11381_v23 = vld [vmem:[%s15121_s13 + $0x6d4] ss:$28 sps:$4 sm:$0xff]  }
 0x68b   : > { %8294 = vmatpush1.bf16.msra.mxu1 %v11298_v3  ;;  %v11379_v3 = vld [vmem:[%s15121_s13 + $0x6d0] ss:$28 sps:$4 sm:$0xff]  }
 0x68c   : > { %8423 = vmatpush1.bf16.msra.mxu0 %v11301_v26  ;;  %8295 = vmatprep.subr.bf16.mxu1 %v11306_v28  ;;  %v11384_v26 = vld [vmem:[%s15121_s13 + $0x704] ss:$28 sps:$4 sm:$0xff]   ;;  %v11387_v28 = vld [vmem:[%s15121_s13 + $0x70c] ss:$28 sps:$4 sm:$0xff]  }
 0x68d   : > { %8424 = vmatprep.subr.bf16.mxu0 %v11309_v29  ;;  %v11382_v29 = vld [vmem:[%s15121_s13 + $0x700] ss:$28 sps:$4 sm:$0xff]  }
 0x68f   : > { %8296 = vmatpush1.bf16.msra.mxu1 %v11304_v30  ;;  %v11385_v30 = vld [vmem:[%s15121_s13 + $0x708] ss:$28 sps:$4 sm:$0xff]  }
 0x690   : > { %8425 = vmatpush1.bf16.msra.mxu0 %v11307_v31  ;;  %8297 = vmatprep.subr.bf16.mxu1 %v11312_v32  ;;  %v11390_v31 = vld [vmem:[%s15121_s13 + $0x73c] ss:$28 sps:$4 sm:$0xff]   ;;  %v11393_v32 = vld [vmem:[%s15121_s13 + $0x744] ss:$28 sps:$4 sm:$0xff]  }
 0x691   : > { %8426 = vmatprep.subr.bf16.mxu0 %v11315_v33  ;;  %v11388_v33 = vld [vmem:[%s15121_s13 + $0x738] ss:$28 sps:$4 sm:$0xff]  }
 0x693   : > { %8298 = vmatpush1.bf16.msra.mxu1 %v11310_v13  ;;  %v11391_v13 = vld [vmem:[%s15121_s13 + $0x740] ss:$28 sps:$4 sm:$0xff]  }
 0x694   : > { %8427 = vmatpush1.bf16.msra.mxu0 %v11313_v34  ;;  %8299 = vmatprep.subr.bf16.mxu1 %v11318_v17  ;;  %v11396_v34 = vld [vmem:[%s15121_s13 + $0x774] ss:$28 sps:$4 sm:$0xff]   ;;  %v11399_v17 = vld [vmem:[%s15121_s13 + $0x77c] ss:$28 sps:$4 sm:$0xff]  }
 0x695   : > { %8428 = vmatprep.subr.bf16.mxu0 %v11321_v15  ;;  %v11394_v15 = vld [vmem:[%s15121_s13 + $0x770] ss:$28 sps:$4 sm:$0xff]  }
 0x697   : > { %8300 = vmatpush1.bf16.msra.mxu1 %v11316_v35  ;;  %v11397_v35 = vld [vmem:[%s15121_s13 + $0x778] ss:$28 sps:$4 sm:$0xff]  }
 0x698   : > { %8429 = vmatpush1.bf16.msra.mxu0 %v11319_v36  ;;  %8301 = vmatprep.subr.bf16.mxu1 %v11324_v37  ;;  %v11402_v36 = vld [vmem:[%s15121_s13 + $0x7ac] ss:$28 sps:$4 sm:$0xff]   ;;  %v11405_v37 = vld [vmem:[%s15121_s13 + $0x7b4] ss:$28 sps:$4 sm:$0xff]  }
 0x699   : > { %8430 = vmatprep.subr.bf16.mxu0 %v11327_v38  ;;  %v11400_v38 = vld [vmem:[%s15121_s13 + $0x7a8] ss:$28 sps:$4 sm:$0xff]  }
 0x69b   : > { %8302 = vmatpush1.bf16.msra.mxu1 %v11322_v42  ;;  %v11403_v42 = vld [vmem:[%s15121_s13 + $0x7b0] ss:$28 sps:$4 sm:$0xff]  }
 0x69c   : > { %8431 = vmatpush1.bf16.msra.mxu0 %v11325_v43  ;;  %8303 = vmatprep.subr.bf16.mxu1 %v11330_v45  ;;  %v11408_v43 = vld [vmem:[%s15121_s13 + $0x7e4] ss:$28 sps:$4 sm:$0xff]   ;;  %v11411_v45 = vld [vmem:[%s15121_s13 + $0x7ec] ss:$28 sps:$4 sm:$0xff]  }
 0x69d   : > { %8432 = vmatprep.subr.bf16.mxu0 %v11333_v46  ;;  %v11406_v46 = vld [vmem:[%s15121_s13 + $0x7e0] ss:$28 sps:$4 sm:$0xff]  }
 0x69f   : > { %8304 = vmatpush1.bf16.msra.mxu1 %v11328_v48  ;;  %v11409_v48 = vld [vmem:[%s15121_s13 + $0x7e8] ss:$28 sps:$4 sm:$0xff]  }
 0x6a0   : > { %8433 = vmatpush1.bf16.msra.mxu0 %v11331_v49  ;;  %8305 = vmatprep.subr.bf16.mxu1 %v11336_v51  ;;  %v11414_v49 = vld [vmem:[%s15121_s13 + $0x81c] ss:$28 sps:$4 sm:$0xff]   ;;  %v11417_v51 = vld [vmem:[%s15121_s13 + $0x824] ss:$28 sps:$4 sm:$0xff]  }
 0x6a1   : > { %8434 = vmatprep.subr.bf16.mxu0 %v11339_v41  ;;  %v11412_v41 = vld [vmem:[%s15121_s13 + $0x818] ss:$28 sps:$4 sm:$0xff]  }
 0x6a3   : > { %8306 = vmatpush1.bf16.msra.mxu1 %v11334_v0  ;;  %v11415_v0 = vld [vmem:[%s15121_s13 + $0x820] ss:$28 sps:$4 sm:$0xff]  }
 0x6a4   : > { %8435 = vmatpush1.bf16.msra.mxu0 %v11337_v52  ;;  %8307 = vmatprep.subr.bf16.mxu1 %v11342_v53  ;;  %v11420_v52 = vld [vmem:[%s15121_s13 + $0x854] ss:$28 sps:$4 sm:$0xff]   ;;  %v11423_v53 = vld [vmem:[%s15121_s13 + $0x85c] ss:$28 sps:$4 sm:$0xff]  }
 0x6a5   : > { %8436 = vmatprep.subr.bf16.mxu0 %v11345_v54  ;;  %v11418_v54 = vld [vmem:[%s15121_s13 + $0x850] ss:$28 sps:$4 sm:$0xff]  }
 0x6a7   : > { %8308 = vmatpush1.bf16.msra.mxu1 %v11340_v55  ;;  %v11421_v55 = vld [vmem:[%s15121_s13 + $0x858] ss:$28 sps:$4 sm:$0xff]  }
 0x6a8   : > { %8437 = vmatpush1.bf16.msra.mxu0 %v11343_v56  ;;  %8309 = vmatprep.subr.bf16.mxu1 %v11348_v57  ;;  %v11426_v56 = vld [vmem:[%s15121_s13 + $0x88c] ss:$28 sps:$4 sm:$0xff]   ;;  %v11429_v57 = vld [vmem:[%s15121_s13 + $0x894] ss:$28 sps:$4 sm:$0xff]  }
 0x6a9   : > { %8438 = vmatprep.subr.bf16.mxu0 %v11351_v58  ;;  %v11424_v58 = vld [vmem:[%s15121_s13 + $0x888] ss:$28 sps:$4 sm:$0xff]  }
 0x6ab   : > { %8310 = vmatpush1.bf16.msra.mxu1 %v11346_v60  ;;  %v11427_v60 = vld [vmem:[%s15121_s13 + $0x890] ss:$28 sps:$4 sm:$0xff]  }
 0x6ac   : > { %8439 = vmatpush1.bf16.msra.mxu0 %v11349_v40  ;;  %8311 = vmatprep.subr.bf16.mxu1 %v11354_v63  ;;  %v11432_v40 = vld [vmem:[%s15121_s13 + $0x8c4] ss:$28 sps:$4 sm:$0xff]   ;;  %v11435_v63 = vld [vmem:[%s15121_s13 + $0x8cc] ss:$28 sps:$4 sm:$0xff]  }
 0x6ad   : > { %8440 = vmatprep.subr.bf16.mxu0 %v11357_v47  ;;  %v11430_v47 = vld [vmem:[%s15121_s13 + $0x8c0] ss:$28 sps:$4 sm:$0xff]  }
 0x6af   : > { %8312 = vmatpush1.bf16.msra.mxu1 %v11352_v1  ;;  %v11433_v1 = vld [vmem:[%s15121_s13 + $0x8c8] ss:$28 sps:$4 sm:$0xff]  }
 0x6b0   : > { %8441 = vmatpush1.bf16.msra.mxu0 %v11355_v2  ;;  %8313 = vmatprep.subr.bf16.mxu1 %v11360_v9  ;;  %v11438_v2 = vld [vmem:[%s15121_s13 + $0x8fc] ss:$28 sps:$4 sm:$0xff]   ;;  %v11441_v9 = vld [vmem:[%s15121_s13 + $0x904] ss:$28 sps:$4 sm:$0xff]  }
 0x6b1   : > { %8442 = vmatprep.subr.bf16.mxu0 %v11363_v50  ;;  %v11436_v50 = vld [vmem:[%s15121_s13 + $0x8f8] ss:$28 sps:$4 sm:$0xff]  }
 0x6b3   : > { %8314 = vmatpush1.bf16.msra.mxu1 %v11358_v44  ;;  %v11439_v44 = vld [vmem:[%s15121_s13 + $0x900] ss:$28 sps:$4 sm:$0xff]  }
 0x6b4   : > { %8443 = vmatpush1.bf16.msra.mxu0 %v11361_v10  ;;  %8315 = vmatprep.subr.bf16.mxu1 %v11366_v4  ;;  %v11444_v10 = vld [vmem:[%s15121_s13 + $0x934] ss:$28 sps:$4 sm:$0xff]   ;;  %v11447_v4 = vld [vmem:[%s15121_s13 + $0x93c] ss:$28 sps:$4 sm:$0xff]  }
 0x6b5   : > { %8444 = vmatprep.subr.bf16.mxu0 %v11369_v8  ;;  %v11442_v8 = vld [vmem:[%s15121_s13 + $0x930] ss:$28 sps:$4 sm:$0xff]  }
 0x6b7   : > { %8316 = vmatpush1.bf16.msra.mxu1 %v11364_v11  ;;  %v11445_v11 = vld [vmem:[%s15121_s13 + $0x938] ss:$28 sps:$4 sm:$0xff]  }
 0x6b8   : > { %8445 = vmatpush1.bf16.msra.mxu0 %v11367_v16  ;;  %8317 = vmatprep.subr.bf16.mxu1 %v11372_v18  ;;  %v11450_v16 = vld [vmem:[%s15121_s13 + $0x96c] ss:$28 sps:$4 sm:$0xff]   ;;  %v11453_v18 = vld [vmem:[%s15121_s13 + $0x974] ss:$28 sps:$4 sm:$0xff]  }
 0x6b9   : > { %8446 = vmatprep.subr.bf16.mxu0 %v11375_v19  ;;  %v11448_v19 = vld [vmem:[%s15121_s13 + $0x968] ss:$28 sps:$4 sm:$0xff]  }
 0x6bb   : > { %8318 = vmatpush1.bf16.msra.mxu1 %v11370_v20  ;;  %v11451_v20 = vld [vmem:[%s15121_s13 + $0x970] ss:$28 sps:$4 sm:$0xff]  }
 0x6bc   : > { %8447 = vmatpush1.bf16.msra.mxu0 %v11373_v21  ;;  %8319 = vmatprep.subr.bf16.mxu1 %v11378_v22  ;;  %v11456_v21 = vld [vmem:[%s15121_s13 + $0x9a4] ss:$28 sps:$4 sm:$0xff]   ;;  %v11459_v22 = vld [vmem:[%s15121_s13 + $0x9ac] ss:$28 sps:$4 sm:$0xff]  }
 0x6bd   : > { %8448 = vmatprep.subr.bf16.mxu0 %v11381_v23  ;;  %v11454_v23 = vld [vmem:[%s15121_s13 + $0x9a0] ss:$28 sps:$4 sm:$0xff]  }
 0x6bf   : > { %8320 = vmatpush1.bf16.msra.mxu1 %v11376_v24  ;;  %v11457_v24 = vld [vmem:[%s15121_s13 + $0x9a8] ss:$28 sps:$4 sm:$0xff]  }
 0x6c0   : > { %8449 = vmatpush1.bf16.msra.mxu0 %v11379_v3  ;;  %8332 = vmatprep.subr.bf16.mxu1 %v11384_v26  ;;  %v11462_v3 = vld [vmem:[%s15121_s13 + $0x9dc] ss:$28 sps:$4 sm:$0xff]   ;;  %v11465_v26 = vld [vmem:[%s15121_s13 + $0x9e4] ss:$28 sps:$4 sm:$0xff]  }
 0x6c1   : > { %8461 = vmatprep.subr.bf16.mxu0 %v11387_v28  ;;  %v11460_v28 = vld [vmem:[%s15121_s13 + $0x9d8] ss:$28 sps:$4 sm:$0xff]  }
 0x6c2   : > { %8322 = vmatmul.mubr.bf16.vlgmr.msra.gmra.mrb[24].mxu1 %v14156_v7 }
 0x6c3   : > { %8451 = vmatmul.mubr.bf16.vlgmr.msra.gmra.mrb[32].mxu0 %v14156_v7  ;;  %8333 = vmatpush1.bf16.msra.mxu1 %v11382_v29  ;;  %v11463_v29 = vld [vmem:[%s15121_s13 + $0x9e0] ss:$28 sps:$4 sm:$0xff]  }
 0x6c4   : > { %8462 = vmatpush1.bf16.msra.mxu0 %v11385_v30  ;;  %8334 = vmatprep.subr.bf16.mxu1 %v11390_v31  ;;  %v11468_v30 = vld [vmem:[%s15121_s13 + $0xa14] ss:$28 sps:$4 sm:$0xff]   ;;  %v11471_v31 = vld [vmem:[%s15121_s13 + $0xa1c] ss:$28 sps:$4 sm:$0xff]  }
 0x6c5   : > { %8463 = vmatprep.subr.bf16.mxu0 %v11393_v32  ;;  %v11466_v32 = vld [vmem:[%s15121_s13 + $0xa10] ss:$28 sps:$4 sm:$0xff]  }
 0x6c7   : > { %8335 = vmatpush1.bf16.msra.mxu1 %v11388_v33  ;;  %v11469_v33 = vld [vmem:[%s15121_s13 + $0xa18] ss:$28 sps:$4 sm:$0xff]  }
 0x6c8   : > { %8464 = vmatpush1.bf16.msra.mxu0 %v11391_v13  ;;  %8336 = vmatprep.subr.bf16.mxu1 %v11396_v34  ;;  %v11474_v13 = vld [vmem:[%s15121_s13 + $0xa4c] ss:$28 sps:$4 sm:$0xff]   ;;  %v11477_v34 = vld [vmem:[%s15121_s13 + $0xa54] ss:$28 sps:$4 sm:$0xff]  }
 0x6c9   : > { %8465 = vmatprep.subr.bf16.mxu0 %v11399_v17  ;;  %v11472_v17 = vld [vmem:[%s15121_s13 + $0xa48] ss:$28 sps:$4 sm:$0xff]  }
 0x6cb   : > { %8337 = vmatpush1.bf16.msra.mxu1 %v11394_v15  ;;  %v11475_v15 = vld [vmem:[%s15121_s13 + $0xa50] ss:$28 sps:$4 sm:$0xff]  }
 0x6cc   : > { %8466 = vmatpush1.bf16.msra.mxu0 %v11397_v35  ;;  %8338 = vmatprep.subr.bf16.mxu1 %v11402_v36  ;;  %v11480_v35 = vld [vmem:[%s15121_s13 + $0x14] ss:$28 sps:$4 sm:$0xff]  }
 0x6cd   : > { %8467 = vmatprep.subr.bf16.mxu0 %v11405_v37  ;;  %v11481_v36 = vld [vmem:[%s15121_s13 + $0x1d8] ss:$28 sps:$4 sm:$0xff]   ;;  %v4460_v37 = vsub.s32 5, %v11954_v59 }
 0x6cf   : > { %8339 = vmatpush1.bf16.msra.mxu1 %v11400_v38  ;;  %v4457_v38 = vrot.slane %v14121_v27, %v13461_v5 }
 0x6d0   : > { %8468 = vmatpush1.bf16.msra.mxu0 %v11403_v42  ;;  %8340 = vmatprep.subr.bf16.mxu1 %v11408_v43  ;;  %v4461_v42 = vrot.slane %v14121_v27, %v4460_v37 }
 0x6d1   : > { %8469 = vmatprep.subr.bf16.mxu0 %v11411_v45 }
 0x6d3   : > { %8341 = vmatpush1.bf16.msra.mxu1 %v11406_v46 }
 0x6d4   : > { %8470 = vmatpush1.bf16.msra.mxu0 %v11409_v48  ;;  %8342 = vmatprep.subr.bf16.mxu1 %v11414_v49 }
 0x6d5   : > { %8471 = vmatprep.subr.bf16.mxu0 %v11417_v51 }
 0x6d7   : > { %8343 = vmatpush1.bf16.msra.mxu1 %v11412_v41 }
 0x6d8   : > { %8472 = vmatpush1.bf16.msra.mxu0 %v11415_v0  ;;  %8344 = vmatprep.subr.bf16.mxu1 %v11420_v52 }
 0x6d9   : > { %8473 = vmatprep.subr.bf16.mxu0 %v11423_v53 }
 0x6db   : > { %8345 = vmatpush1.bf16.msra.mxu1 %v11418_v54 }
 0x6dc   : > { %8474 = vmatpush1.bf16.msra.mxu0 %v11421_v55  ;;  %8346 = vmatprep.subr.bf16.mxu1 %v11426_v56 }
 0x6dd   : > { %8475 = vmatprep.subr.bf16.mxu0 %v11429_v57 }
 0x6df   : > { %8347 = vmatpush1.bf16.msra.mxu1 %v11424_v58 }
 0x6e0   : > { %8476 = vmatpush1.bf16.msra.mxu0 %v11427_v60  ;;  %8348 = vmatprep.subr.bf16.mxu1 %v11432_v40 }
 0x6e1   : > { %8477 = vmatprep.subr.bf16.mxu0 %v11435_v63  ;;  %v11478_v63 = vld [vmem:[%s15121_s13 + $0x10] ss:$28 sps:$4 sm:$0xff]  }
 0x6e3   : > { %8349 = vmatpush1.bf16.msra.mxu1 %v11430_v47  ;;  %v11482_v47 = vld [vmem:[%s15121_s13 + $0x18] ss:$28 sps:$4 sm:$0xff]  }
 0x6e4   : > { %8478 = vmatpush1.bf16.msra.mxu0 %v11433_v1  ;;  %8350 = vmatprep.subr.bf16.mxu1 %v11438_v2  ;;  %v11485_v1 = vld [vmem:[%s15121_s13 + $0x4c] ss:$28 sps:$4 sm:$0xff]  }
 0x6e5   : > { %8479 = vmatprep.subr.bf16.mxu0 %v11441_v9  ;;  %v11486_v2 = vld [vmem:[%s15121_s13 + $0x210] ss:$28 sps:$4 sm:$0xff]   ;;  %v11483_v9 = vld [vmem:[%s15121_s13 + $0x48] ss:$28 sps:$4 sm:$0xff]  }
 0x6e7   : > { %8351 = vmatpush1.bf16.msra.mxu1 %v11436_v50  ;;  %v11487_v50 = vld [vmem:[%s15121_s13 + $0x50] ss:$28 sps:$4 sm:$0xff]  }
 0x6e8   : > { %8480 = vmatpush1.bf16.msra.mxu0 %v11439_v44  ;;  %8352 = vmatprep.subr.bf16.mxu1 %v11444_v10  ;;  %v11490_v44 = vld [vmem:[%s15121_s13 + $0x84] ss:$28 sps:$4 sm:$0xff]  }
 0x6e9   : > { %8481 = vmatprep.subr.bf16.mxu0 %v11447_v4  ;;  %v11491_v10 = vld [vmem:[%s15121_s13 + $0x248] ss:$28 sps:$4 sm:$0xff]   ;;  %v11488_v4 = vld [vmem:[%s15121_s13 + $0x80] ss:$28 sps:$4 sm:$0xff]  }
 0x6eb   : > { %8353 = vmatpush1.bf16.msra.mxu1 %v11442_v8  ;;  %v11495_v8 = vld [vmem:[%s15121_s13 + $0xbc] ss:$28 sps:$4 sm:$0xff]  }
 0x6ec   : > { %8482 = vmatpush1.bf16.msra.mxu0 %v11445_v11  ;;  %8354 = vmatprep.subr.bf16.mxu1 %v11450_v16  ;;  %v11496_v11 = vld [vmem:[%s15121_s13 + $0x280] ss:$28 sps:$4 sm:$0xff]   ;;  %v11493_v16 = vld [vmem:[%s15121_s13 + $0xb8] ss:$28 sps:$4 sm:$0xff]  }
 0x6ed   : > { %8483 = vmatprep.subr.bf16.mxu0 %v11453_v18  ;;  %v11497_v18 = vld [vmem:[%s15121_s13 + $0xc0] ss:$28 sps:$4 sm:$0xff]  }
 0x6ef   : > { %8355 = vmatpush1.bf16.msra.mxu1 %v11448_v19  ;;  %v11500_v19 = vld [vmem:[%s15121_s13 + $0xf4] ss:$28 sps:$4 sm:$0xff]  }
 0x6f0   : > { %8484 = vmatpush1.bf16.msra.mxu0 %v11451_v20  ;;  %8356 = vmatprep.subr.bf16.mxu1 %v11456_v21  ;;  %v11501_v20 = vld [vmem:[%s15121_s13 + $0x2b8] ss:$28 sps:$4 sm:$0xff]   ;;  %v11498_v21 = vld [vmem:[%s15121_s13 + $0xf0] ss:$28 sps:$4 sm:$0xff]  }
 0x6f1   : > { %8485 = vmatprep.subr.bf16.mxu0 %v11459_v22  ;;  %v11502_v22 = vld [vmem:[%s15121_s13 + $0xf8] ss:$28 sps:$4 sm:$0xff]  }
 0x6f3   : > { %8357 = vmatpush1.bf16.msra.mxu1 %v11454_v23  ;;  %v11505_v23 = vld [vmem:[%s15121_s13 + $0x12c] ss:$28 sps:$4 sm:$0xff]  }
 0x6f4   : > { %8486 = vmatpush1.bf16.msra.mxu0 %v11457_v24  ;;  %8358 = vmatprep.subr.bf16.mxu1 %v11462_v3  ;;  %v11506_v24 = vld [vmem:[%s15121_s13 + $0x2f0] ss:$28 sps:$4 sm:$0xff]   ;;  %v11503_v3 = vld [vmem:[%s15121_s13 + $0x128] ss:$28 sps:$4 sm:$0xff]  }
 0x6f5   : > { %8487 = vmatprep.subr.bf16.mxu0 %v11465_v26  ;;  %v11507_v26 = vld [vmem:[%s15121_s13 + $0x130] ss:$28 sps:$4 sm:$0xff]  }
 0x6f7   : > { %8359 = vmatpush1.bf16.msra.mxu1 %v11460_v28  ;;  %v11510_v28 = vld [vmem:[%s15121_s13 + $0x164] ss:$28 sps:$4 sm:$0xff]  }
 0x6f8   : > { %8488 = vmatpush1.bf16.msra.mxu0 %v11463_v29  ;;  %8360 = vmatprep.subr.bf16.mxu1 %v11468_v30  ;;  %v11511_v29 = vld [vmem:[%s15121_s13 + $0x328] ss:$28 sps:$4 sm:$0xff]   ;;  %v11508_v30 = vld [vmem:[%s15121_s13 + $0x160] ss:$28 sps:$4 sm:$0xff]  }
 0x6f9   : > { %8489 = vmatprep.subr.bf16.mxu0 %v11471_v31  ;;  %v11512_v31 = vld [vmem:[%s15121_s13 + $0x168] ss:$28 sps:$4 sm:$0xff]  }
 0x6fb   : > { %8361 = vmatpush1.bf16.msra.mxu1 %v11466_v32  ;;  %v11515_v32 = vld [vmem:[%s15121_s13 + $0x19c] ss:$28 sps:$4 sm:$0xff]  }
 0x6fc   : > { %8490 = vmatpush1.bf16.msra.mxu0 %v11469_v33  ;;  %8362 = vmatprep.subr.bf16.mxu1 %v11474_v13  ;;  %v11516_v33 = vld [vmem:[%s15121_s13 + $0x360] ss:$28 sps:$4 sm:$0xff]   ;;  %v11513_v13 = vld [vmem:[%s15121_s13 + $0x198] ss:$28 sps:$4 sm:$0xff]  }
 0x6fd   : > { %8491 = vmatprep.subr.bf16.mxu0 %v11477_v34  ;;  %v11517_v34 = vld [vmem:[%s15121_s13 + $0x1a0] ss:$28 sps:$4 sm:$0xff]  }
 0x6ff   : > { %8363 = vmatpush1.bf16.msra.mxu1 %v11472_v17  ;;  %v11520_v17 = vld [vmem:[%s15121_s13 + $0x1d4] ss:$28 sps:$4 sm:$0xff]  }
 0x700   : > { %8492 = vmatpush1.bf16.msra.mxu0 %v11475_v15  ;;  %8504 = vmatprep.subr.bf16.mxu1 %v11480_v35  ;;  %v11521_v15 = vld [vmem:[%s15121_s13 + $0x558] ss:$28 sps:$4 sm:$0xff]   ;;  %v11518_v35 = vld [vmem:[%s15121_s13 + $0x1d0] ss:$28 sps:$4 sm:$0xff]  }
 0x701   : > { %9962 = vmatprep.subr.bf16.mxu0 %v11481_v36  ;;  %v11522_v36 = vld [vmem:[%s15121_s13 + $0x398] ss:$28 sps:$4 sm:$0xff]  }
 0x714   : > { %v6046_v43 = vpop.f32.mrb[28].mxu0 }
 0x715   : > { %v10060_v45 = vadd.f32 %v6046_v43, %v4457_v38  ;;  %v6048_v46 = vpop.f32.mrb[29].mxu0  ;;  %v11523_v43 = vld [vmem:[%s15121_s13 + $0x208] ss:$28 sps:$4 sm:$0xff]  }
 0x716   : > { %v10061_v48 = vadd.f32 %v6048_v46, %v4461_v42  ;;  %v6050_v49 = vpop.f32.mrb[30].mxu0  ;;  %v11530_v46 = vld [vmem:[%s15121_s13 + $0x244] ss:$28 sps:$4 sm:$0xff]  }
 0x717   : > { %v6071_v51 = vmul.f32 0.01, %v10060_v45  ;;  %v10062_v41 = vadd.f32 %v6050_v49, %v4457_v38  ;;  %v6052_v0 = vpop.f32.mrb[31].mxu0  ;;  %vm6059_vm14 = vcmp.ge.f32.partialorder %v10060_v45, 0.0  ;;  %v11525_v38 = vld [vmem:[%s15121_s13 + $0x20c] ss:$28 sps:$4 sm:$0xff]  }
 0x718   : > { %v6072_v52 = vmul.f32 0.01, %v10061_v48  ;;  %v10063_v53 = vadd.f32 %v6052_v0, %v4461_v42  ;;  %vm6060_vm15 = vcmp.ge.f32.partialorder %v10061_v48, 0.0  ;;  %v11526_v42 = vld [vmem:[%s15121_s13 + $0x590] ss:$28 sps:$4 sm:$0xff]  }
 0x719   : > { %vm6065_vm0 = vcmp.ge.f32.partialorder %v10062_v41, 0.0  ;;  %v6077_v54 = vmul.f32 0.01, %v10062_v41  ;;  %v6083_v56 = vsel %vm6059_vm14, %v10060_v45, %v6071_v51  ;;  %v11527_v45 = vld [vmem:[%s15121_s13 + $0x3d0] ss:$28 sps:$4 sm:$0xff]  }
 0x71a   : > { %vm6066_vm1 = vcmp.ge.f32.partialorder %v10063_v53, 0.0  ;;  %v6078_v55 = vmul.f32 0.01, %v10063_v53  ;;  %v6084_v58 = vsel %vm6060_vm15, %v10061_v48, %v6072_v52  ;;  %v11531_v48 = vld [vmem:[%s15121_s13 + $0x5c8] ss:$28 sps:$4 sm:$0xff]  }
 0x71b   : > { %v6089_v57 = vsel %vm6065_vm0, %v10062_v41, %v6077_v54  ;;  %v11528_v49 = vld [vmem:[%s15121_s13 + $0x240] ss:$28 sps:$4 sm:$0xff]   ;;  %v11532_v51 = vld [vmem:[%s15121_s13 + $0x408] ss:$28 sps:$4 sm:$0xff]   ;;  %v11533_v52 = vld [vmem:[%s15121_s13 + $0x278] ss:$28 sps:$4 sm:$0xff]  }
 0x71c   : > { %v14560_v27 = vpack.c.bf16 %v6089_v57, %v6083_v56  ;;  %v6090_v60 = vsel %vm6066_vm1, %v10063_v53, %v6078_v55  ;;  %v11535_v41 = vld [vmem:[%s15121_s13 + $0x27c] ss:$28 sps:$4 sm:$0xff]   ;;  %v11540_v54 = vld [vmem:[%s15121_s13 + $0x2b4] ss:$28 sps:$4 sm:$0xff]  }
 0x71d   : > { %v14562_v40 = vpack.c.bf16 %v6090_v60, %v6084_v58  ;;  %v11536_v0 = vld [vmem:[%s15121_s13 + $0x600] ss:$28 sps:$4 sm:$0xff]   ;;  %v11541_v55 = vld [vmem:[%s15121_s13 + $0x638] ss:$28 sps:$4 sm:$0xff]   ;;  %v11538_v56 = vld [vmem:[%s15121_s13 + $0x2b0] ss:$28 sps:$4 sm:$0xff]  }
 0x71e   : > { %v11537_v53 = vld [vmem:[%s15121_s13 + $0x440] ss:$28 sps:$4 sm:$0xff]   ;;  %v11542_v57 = vld [vmem:[%s15121_s13 + $0x478] ss:$28 sps:$4 sm:$0xff]   ;;  %v11545_v58 = vld [vmem:[%s15121_s13 + $0x2ec] ss:$28 sps:$4 sm:$0xff]  }
 0x71f   : > { %8364 = vmatprep.mubr.bf16.mxu1 %v14562_v40  ;;  %8493 = vmatprep.mubr.bf16.mxu0 %v14562_v40  ;;  %v11546_v60 = vld [vmem:[%s15121_s13 + $0x670] ss:$28 sps:$4 sm:$0xff]  }
 0x720   : > { %8365 = vmatmul.mubr.bf16.vlgmr.msra.gmra.mrb[24].mxu1 %v14560_v27  ;;  %8494 = vmatmul.mubr.bf16.vlgmr.msra.gmra.mrb[32].mxu0 %v14560_v27 }
 0x721   : > { %8505 = vmatpush1.bf16.msra.mxu1 %v11478_v63  ;;  %9963 = vmatpush3.bf16.msra.mxu0 %v11482_v47  ;;  %v11543_v63 = vld [vmem:[%s15121_s13 + $0x2e8] ss:$28 sps:$4 sm:$0xff]   ;;  %v11547_v47 = vld [vmem:[%s15121_s13 + $0x4b0] ss:$28 sps:$4 sm:$0xff]  }
 0x722   : > { %8536 = vmatprep.mubr.bf16.mxu1 %v14158_v12  ;;  %8665 = vmatprep.mubr.bf16.mxu0 %v14158_v12  ;;  %v11492_v12 = vld [vmem:[%s15121_s13 + $0x88] ss:$28 sps:$4 sm:$0xff]  }
 0x723   : > { %8506 = vmatprep.subr.bf16.mxu1 %v11485_v1  ;;  %9964 = vmatprep.subr.bf16.mxu0 %v11486_v2  ;;  %v11550_v1 = vld [vmem:[%s15121_s13 + $0x324] ss:$28 sps:$4 sm:$0xff]  }
 0x724   : > { %v11551_v2 = vld [vmem:[%s15121_s13 + $0x6a8] ss:$28 sps:$4 sm:$0xff]  }
 0x725   : > { %8507 = vmatpush1.bf16.msra.mxu1 %v11483_v9  ;;  %9965 = vmatpush3.bf16.msra.mxu0 %v11487_v50  ;;  %v11548_v9 = vld [vmem:[%s15121_s13 + $0x320] ss:$28 sps:$4 sm:$0xff]   ;;  %v11552_v50 = vld [vmem:[%s15121_s13 + $0x4e8] ss:$28 sps:$4 sm:$0xff]  }
 0x726   : > { %8508 = vmatprep.subr.bf16.mxu1 %v11490_v44  ;;  %9966 = vmatprep.subr.bf16.mxu0 %v11491_v10  ;;  %v11555_v44 = vld [vmem:[%s15121_s13 + $0x35c] ss:$28 sps:$4 sm:$0xff]  }
 0x727   : > { %v11556_v10 = vld [vmem:[%s15121_s13 + $0x6e0] ss:$28 sps:$4 sm:$0xff]  }
 0x729   : > { %8509 = vmatpush1.bf16.msra.mxu1 %v11488_v4  ;;  %9967 = vmatpush3.bf16.msra.mxu0 %v11492_v12  ;;  %v11553_v4 = vld [vmem:[%s15121_s13 + $0x358] ss:$28 sps:$4 sm:$0xff]   ;;  %v11557_v12 = vld [vmem:[%s15121_s13 + $0x520] ss:$28 sps:$4 sm:$0xff]  }
 0x72a   : > { %8510 = vmatprep.subr.bf16.mxu1 %v11495_v8  ;;  %9968 = vmatprep.subr.bf16.mxu0 %v11496_v11  ;;  %v11560_v8 = vld [vmem:[%s15121_s13 + $0x394] ss:$28 sps:$4 sm:$0xff]  }
 0x72b   : > { %v11558_v11 = vld [vmem:[%s15121_s13 + $0x390] ss:$28 sps:$4 sm:$0xff]  }
 0x72d   : > { %8511 = vmatpush1.bf16.msra.mxu1 %v11493_v16  ;;  %9969 = vmatpush3.bf16.msra.mxu0 %v11497_v18  ;;  %v11563_v16 = vld [vmem:[%s15121_s13 + $0x3cc] ss:$28 sps:$4 sm:$0xff]  }
 0x72e   : > { %8512 = vmatprep.subr.bf16.mxu1 %v11500_v19  ;;  %9970 = vmatprep.subr.bf16.mxu0 %v11501_v20  ;;  %v11561_v18 = vld [vmem:[%s15121_s13 + $0x3c8] ss:$28 sps:$4 sm:$0xff]   ;;  %v11564_v20 = vld [vmem:[%s15121_s13 + $0x400] ss:$28 sps:$4 sm:$0xff]  }
 0x72f   : > { %v11566_v19 = vld [vmem:[%s15121_s13 + $0x404] ss:$28 sps:$4 sm:$0xff]  }
 0x731   : > { %8513 = vmatpush1.bf16.msra.mxu1 %v11498_v21  ;;  %9971 = vmatpush3.bf16.msra.mxu0 %v11502_v22  ;;  %v11572_v21 = vld [vmem:[%s15121_s13 + $0x474] ss:$28 sps:$4 sm:$0xff]  }
 0x732   : > { %8514 = vmatprep.subr.bf16.mxu1 %v11505_v23  ;;  %9972 = vmatprep.subr.bf16.mxu0 %v11506_v24  ;;  %v11570_v22 = vld [vmem:[%s15121_s13 + $0x470] ss:$28 sps:$4 sm:$0xff]   ;;  %v11573_v24 = vld [vmem:[%s15121_s13 + $0x4a8] ss:$28 sps:$4 sm:$0xff]  }
 0x733   : > { %v11575_v23 = vld [vmem:[%s15121_s13 + $0x4ac] ss:$28 sps:$4 sm:$0xff]  }
 0x735   : > { %8515 = vmatpush1.bf16.msra.mxu1 %v11503_v3  ;;  %9973 = vmatpush3.bf16.msra.mxu0 %v11507_v26  ;;  %v11578_v3 = vld [vmem:[%s15121_s13 + $0x4e4] ss:$28 sps:$4 sm:$0xff]  }
 0x736   : > { %8516 = vmatprep.subr.bf16.mxu1 %v11510_v28  ;;  %9974 = vmatprep.subr.bf16.mxu0 %v11511_v29  ;;  %v11576_v26 = vld [vmem:[%s15121_s13 + $0x4e0] ss:$28 sps:$4 sm:$0xff]   ;;  %v11579_v29 = vld [vmem:[%s15121_s13 + $0x518] ss:$28 sps:$4 sm:$0xff]  }
 0x737   : > { %v11581_v28 = vld [vmem:[%s15121_s13 + $0x51c] ss:$28 sps:$4 sm:$0xff]  }
 0x739   : > { %8517 = vmatpush1.bf16.msra.mxu1 %v11508_v30  ;;  %9975 = vmatpush3.bf16.msra.mxu0 %v11512_v31  ;;  %v11584_v30 = vld [vmem:[%s15121_s13 + $0x554] ss:$28 sps:$4 sm:$0xff]  }
 0x73a   : > { %8518 = vmatprep.subr.bf16.mxu1 %v11515_v32  ;;  %9976 = vmatprep.subr.bf16.mxu0 %v11516_v33  ;;  %v11582_v31 = vld [vmem:[%s15121_s13 + $0x550] ss:$28 sps:$4 sm:$0xff]   ;;  %v11585_v33 = vld [vmem:[%s15121_s13 + $0x588] ss:$28 sps:$4 sm:$0xff]  }
 0x73b   : > { %v11587_v32 = vld [vmem:[%s15121_s13 + $0x58c] ss:$28 sps:$4 sm:$0xff]  }
 0x73d   : > { %8519 = vmatpush1.bf16.msra.mxu1 %v11513_v13  ;;  %9977 = vmatpush3.bf16.msra.mxu0 %v11517_v34  ;;  %v11590_v13 = vld [vmem:[%s15121_s13 + $0x5c4] ss:$28 sps:$4 sm:$0xff]  }
 0x73e   : > { %8520 = vmatprep.subr.bf16.mxu1 %v11520_v17  ;;  %9984 = vmatprep.subr.bf16.mxu0 %v11521_v15  ;;  %v11588_v34 = vld [vmem:[%s15121_s13 + $0x5c0] ss:$28 sps:$4 sm:$0xff]   ;;  %v11591_v15 = vld [vmem:[%s15121_s13 + $0x5f8] ss:$28 sps:$4 sm:$0xff]  }
 0x73f   : > { %v11593_v17 = vld [vmem:[%s15121_s13 + $0x5fc] ss:$28 sps:$4 sm:$0xff]  }
 0x740   : > { %8666 = vmatmul.mubr.bf16.vlgmr.msra.gmra.mrb[36].mxu0 %v14154_v6 }
 0x741   : > { %8521 = vmatpush1.bf16.msra.mxu1 %v11518_v35  ;;  %9985 = vmatpush3.bf16.msra.mxu0 %v11522_v36  ;;  %v11596_v35 = vld [vmem:[%s15121_s13 + $0x634] ss:$28 sps:$4 sm:$0xff]  }
 0x742   : > { %8706 = vmatprep.mubr.bf16.mxu0 %v14160_v14  ;;  %8522 = vmatprep.subr.bf16.mxu1 %v11525_v38  ;;  %v11594_v36 = vld [vmem:[%s15121_s13 + $0x630] ss:$28 sps:$4 sm:$0xff]  }
 0x743   : > { %9986 = vmatprep.subr.bf16.mxu0 %v11526_v42  ;;  %v11599_v38 = vld [vmem:[%s15121_s13 + $0x66c] ss:$28 sps:$4 sm:$0xff]  }
 0x744   : > { %v11597_v42 = vld [vmem:[%s15121_s13 + $0x668] ss:$28 sps:$4 sm:$0xff]  }
 0x745   : > { %8523 = vmatpush1.bf16.msra.mxu1 %v11523_v43  ;;  %9987 = vmatpush3.bf16.msra.mxu0 %v11527_v45  ;;  %v11602_v43 = vld [vmem:[%s15121_s13 + $0x6a4] ss:$28 sps:$4 sm:$0xff]  }
 0x746   : > { %8524 = vmatprep.subr.bf16.mxu1 %v11530_v46  ;;  %9988 = vmatprep.subr.bf16.mxu0 %v11531_v48  ;;  %v11600_v45 = vld [vmem:[%s15121_s13 + $0x6a0] ss:$28 sps:$4 sm:$0xff]   ;;  %v11603_v48 = vld [vmem:[%s15121_s13 + $0x6d8] ss:$28 sps:$4 sm:$0xff]  }
 0x747   : > { %v11605_v46 = vld [vmem:[%s15121_s13 + $0x6dc] ss:$28 sps:$4 sm:$0xff]  }
 0x749   : > { %8525 = vmatpush1.bf16.msra.mxu1 %v11528_v49  ;;  %9989 = vmatpush3.bf16.msra.mxu0 %v11532_v51  ;;  %v11608_v49 = vld [vmem:[%s15121_s13 + $0x714] ss:$28 sps:$4 sm:$0xff]  }
 0x74a   : > { %8526 = vmatprep.subr.bf16.mxu1 %v11535_v41  ;;  %9990 = vmatprep.subr.bf16.mxu0 %v11536_v0  ;;  %v11606_v51 = vld [vmem:[%s15121_s13 + $0x710] ss:$28 sps:$4 sm:$0xff]   ;;  %v11609_v0 = vld [vmem:[%s15121_s13 + $0x748] ss:$28 sps:$4 sm:$0xff]  }
 0x74b   : > { %v11611_v41 = vld [vmem:[%s15121_s13 + $0x74c] ss:$28 sps:$4 sm:$0xff]  }
 0x74d   : > { %8527 = vmatpush1.bf16.msra.mxu1 %v11533_v52  ;;  %9991 = vmatpush3.bf16.msra.mxu0 %v11537_v53  ;;  %v11614_v52 = vld [vmem:[%s15121_s13 + $0x784] ss:$28 sps:$4 sm:$0xff]  }
 0x74e   : > { %8528 = vmatprep.subr.bf16.mxu1 %v11540_v54  ;;  %9992 = vmatprep.subr.bf16.mxu0 %v11541_v55  ;;  %v11612_v53 = vld [vmem:[%s15121_s13 + $0x780] ss:$28 sps:$4 sm:$0xff]   ;;  %v11615_v54 = vld [vmem:[%s15121_s13 + $0x7b8] ss:$28 sps:$4 sm:$0xff]  }
 0x74f   : > { %v11620_v55 = vld [vmem:[%s15121_s13 + $0x7f4] ss:$28 sps:$4 sm:$0xff]  }
 0x751   : > { %8529 = vmatpush1.bf16.msra.mxu1 %v11538_v56  ;;  %9993 = vmatpush3.bf16.msra.mxu0 %v11542_v57  ;;  %v11618_v56 = vld [vmem:[%s15121_s13 + $0x7f0] ss:$28 sps:$4 sm:$0xff]  }
 0x752   : > { %8530 = vmatprep.subr.bf16.mxu1 %v11545_v58  ;;  %9994 = vmatprep.subr.bf16.mxu0 %v11546_v60  ;;  %v11623_v57 = vld [vmem:[%s15121_s13 + $0x82c] ss:$28 sps:$4 sm:$0xff]   ;;  %v11626_v60 = vld [vmem:[%s15121_s13 + $0x864] ss:$28 sps:$4 sm:$0xff]  }
 0x753   : > { %v11621_v58 = vld [vmem:[%s15121_s13 + $0x828] ss:$28 sps:$4 sm:$0xff]  }
 0x755   : > { %8531 = vmatpush1.bf16.msra.mxu1 %v11543_v63  ;;  %9995 = vmatpush3.bf16.msra.mxu0 %v11547_v47  ;;  %v11624_v63 = vld [vmem:[%s15121_s13 + $0x860] ss:$28 sps:$4 sm:$0xff]  }
 0x756   : > { %8532 = vmatprep.subr.bf16.mxu1 %v11550_v1  ;;  %9996 = vmatprep.subr.bf16.mxu0 %v11551_v2  ;;  %v11629_v47 = vld [vmem:[%s15121_s13 + $0x89c] ss:$28 sps:$4 sm:$0xff]   ;;  %v11632_v2 = vld [vmem:[%s15121_s13 + $0x8d4] ss:$28 sps:$4 sm:$0xff]  }
 0x757   : > { %v11627_v1 = vld [vmem:[%s15121_s13 + $0x898] ss:$28 sps:$4 sm:$0xff]  }
 0x759   : > { %8533 = vmatpush1.bf16.msra.mxu1 %v11548_v9  ;;  %9997 = vmatpush3.bf16.msra.mxu0 %v11552_v50  ;;  %v11630_v9 = vld [vmem:[%s15121_s13 + $0x8d0] ss:$28 sps:$4 sm:$0xff]  }
 0x75a   : > { %8534 = vmatprep.subr.bf16.mxu1 %v11555_v44  ;;  %9998 = vmatprep.subr.bf16.mxu0 %v11556_v10  ;;  %v11635_v50 = vld [vmem:[%s15121_s13 + $0x90c] ss:$28 sps:$4 sm:$0xff]   ;;  %v11638_v10 = vld [vmem:[%s15121_s13 + $0x944] ss:$28 sps:$4 sm:$0xff]  }
 0x75b   : > { %v11633_v44 = vld [vmem:[%s15121_s13 + $0x908] ss:$28 sps:$4 sm:$0xff]  }
 0x75d   : > { %8535 = vmatpush1.bf16.msra.mxu1 %v11553_v4  ;;  %9999 = vmatpush3.bf16.msra.mxu0 %v11557_v12  ;;  %v11636_v4 = vld [vmem:[%s15121_s13 + $0x940] ss:$28 sps:$4 sm:$0xff]  }
 0x75e   : > { %8547 = vmatprep.subr.bf16.mxu1 %v11560_v8  ;;  %v11641_v12 = vld [vmem:[%s15121_s13 + $0x97c] ss:$28 sps:$4 sm:$0xff]  }
 0x75f   : > { %v11639_v8 = vld [vmem:[%s15121_s13 + $0x978] ss:$28 sps:$4 sm:$0xff]  }
 0x760   : > { %8537 = vmatmul.mubr.bf16.vlgmr.msra.gmra.mrb[28].mxu1 %v14154_v6  ;;  %8707 = vmatmul.mubr.bf16.vlgmr.msra.gmra.mrb[40].mxu0 %v14156_v7  ;;  %v11569_v6 = vld [vmem:[%s15121_s13 + $0x43c] ss:$28 sps:$4 sm:$0xff]  }
 0x761   : > { %8548 = vmatpush1.bf16.msra.mxu1 %v11558_v11  ;;  %8579 = vmatprep.mubr.bf16.mxu1 %v14160_v14  ;;  %v11567_v14 = vld [vmem:[%s15121_s13 + $0x438] ss:$28 sps:$4 sm:$0xff]  }
 0x762   : > { %8549 = vmatprep.subr.bf16.mxu1 %v11563_v16  ;;  %v11644_v11 = vld [vmem:[%s15121_s13 + $0x9b4] ss:$28 sps:$4 sm:$0xff]  }
 0x763   : > { %v11642_v16 = vld [vmem:[%s15121_s13 + $0x9b0] ss:$28 sps:$4 sm:$0xff]  }
 0x765   : > { %8550 = vmatpush1.bf16.msra.mxu1 %v11561_v18  ;;  %v11647_v18 = vld [vmem:[%s15121_s13 + $0x9ec] ss:$28 sps:$4 sm:$0xff]  }
 0x766   : > { %8551 = vmatprep.subr.bf16.mxu1 %v11566_v19  ;;  %v11645_v19 = vld [vmem:[%s15121_s13 + $0x9e8] ss:$28 sps:$4 sm:$0xff]  }
 0x769   : > { %8552 = vmatpush1.bf16.msra.mxu1 %v11564_v20  ;;  %v11650_v20 = vld [vmem:[%s15121_s13 + $0xa24] ss:$28 sps:$4 sm:$0xff]  }
 0x76a   : > { %8553 = vmatprep.subr.bf16.mxu1 %v11569_v6  ;;  %v11648_v6 = vld [vmem:[%s15121_s13 + $0xa20] ss:$28 sps:$4 sm:$0xff]  }
 0x76d   : > { %8554 = vmatpush1.bf16.msra.mxu1 %v11567_v14  ;;  %v11653_v14 = vld [vmem:[%s15121_s13 + $0xa5c] ss:$28 sps:$4 sm:$0xff]  }
 0x76e   : > { %8555 = vmatprep.subr.bf16.mxu1 %v11572_v21  ;;  %v11651_v21 = vld [vmem:[%s15121_s13 + $0xa58] ss:$28 sps:$4 sm:$0xff]  }
 0x771   : > { %8556 = vmatpush1.bf16.msra.mxu1 %v11570_v22  ;;  %v11654_v22 = vld [vmem:[%s15121_s13 + $0x8d8] ss:$28 sps:$4 sm:$0xff]  }
 0x772   : > { %8557 = vmatprep.subr.bf16.mxu1 %v11575_v23  ;;  %v11655_v23 = vld [vmem:[%s15121_s13 + $0x718] ss:$28 sps:$4 sm:$0xff]  }
 0x775   : > { %8558 = vmatpush1.bf16.msra.mxu1 %v11573_v24  ;;  %v11656_v24 = vld [vmem:[%s15121_s13 + $0x910] ss:$28 sps:$4 sm:$0xff]  }
 0x776   : > { %8559 = vmatprep.subr.bf16.mxu1 %v11578_v3  ;;  %v11657_v3 = vld [vmem:[%s15121_s13 + $0x750] ss:$28 sps:$4 sm:$0xff]  }
 0x779   : > { %8560 = vmatpush1.bf16.msra.mxu1 %v11576_v26  ;;  %v11658_v26 = vld [vmem:[%s15121_s13 + $0x948] ss:$28 sps:$4 sm:$0xff]  }
 0x77a   : > { %8561 = vmatprep.subr.bf16.mxu1 %v11581_v28  ;;  %v11659_v28 = vld [vmem:[%s15121_s13 + $0x788] ss:$28 sps:$4 sm:$0xff]  }
 0x77d   : > { %8562 = vmatpush1.bf16.msra.mxu1 %v11579_v29  ;;  %v11661_v29 = vld [vmem:[%s15121_s13 + $0x7c0] ss:$28 sps:$4 sm:$0xff]  }
 0x77e   : > { %8563 = vmatprep.subr.bf16.mxu1 %v11584_v30  ;;  %v11662_v30 = vld [vmem:[%s15121_s13 + $0x9b8] ss:$28 sps:$4 sm:$0xff]  }
 0x781   : > { %8564 = vmatpush1.bf16.msra.mxu1 %v11582_v31  ;;  %v11663_v31 = vld [vmem:[%s15121_s13 + $0x7f8] ss:$28 sps:$4 sm:$0xff]  }
 0x782   : > { %8565 = vmatprep.subr.bf16.mxu1 %v11587_v32  ;;  %v14991_v32 = vld [vmem:[%s15122_s14] sm:$0x7f] }
 0x785   : > { %8566 = vmatpush1.bf16.msra.mxu1 %v11585_v33  ;;  %v11664_v33 = vld [vmem:[%s15121_s13 + $0x9f0] ss:$28 sps:$4 sm:$0xff]  }
 0x786   : > { %8567 = vmatprep.subr.bf16.mxu1 %v11590_v13  ;;  %v6486_v13 = vrot.slane %v14991_v32, %v11960_v61 }
 0x789   : > { %8568 = vmatpush1.bf16.msra.mxu1 %v11588_v34  ;;  %v6494_v34 = vrot.slane %v14991_v32, %v12163_v25 }
 0x78a   : > { %8569 = vmatprep.subr.bf16.mxu1 %v11593_v17  ;;  %v6490_v17 = vrot.slane %v14991_v32, %v11963_v62 }
 0x78d   : > { %8570 = vmatpush1.bf16.msra.mxu1 %v11591_v15  ;;  %v6498_v15 = vrot.slane %v14991_v32, %v12466_v39 }
 0x78e   : > { %8571 = vmatprep.subr.bf16.mxu1 %v11596_v35  ;;  %v11665_v35 = vld [vmem:[%s15121_s13 + $0x830] ss:$28 sps:$4 sm:$0xff]  }
 0x791   : > { %8572 = vmatpush1.bf16.msra.mxu1 %v11594_v36  ;;  %v11666_v36 = vld [vmem:[%s15121_s13 + $0xa28] ss:$28 sps:$4 sm:$0xff]  }
 0x792   : > { %8573 = vmatprep.subr.bf16.mxu1 %v11599_v38 }
 0x795   : > { %8574 = vmatpush1.bf16.msra.mxu1 %v11597_v42 }
 0x796   : > { %8575 = vmatprep.subr.bf16.mxu1 %v11602_v43 }
 0x799   : > { %8576 = vmatpush1.bf16.msra.mxu1 %v11600_v45 }
 0x79a   : > { %8577 = vmatprep.subr.bf16.mxu1 %v11605_v46 }
 0x79d   : > { %8578 = vmatpush1.bf16.msra.mxu1 %v11603_v48 }
 0x79e   : > { %8590 = vmatprep.subr.bf16.mxu1 %v11608_v49  ;;  %v11667_v49 = vld [vmem:[%s15121_s13 + $0x868] ss:$28 sps:$4 sm:$0xff]  }
 0x7a0   : > { %8580 = vmatmul.mubr.bf16.vlgmr.msra.gmra.mrb[28].mxu1 %v14156_v7  ;;  %v11617_v7 = vld [vmem:[%s15121_s13 + $0x7bc] ss:$28 sps:$4 sm:$0xff]  }
 0x7a1   : > { %8591 = vmatpush1.bf16.msra.mxu1 %v11606_v51  ;;  %8622 = vmatprep.mubr.bf16.mxu1 %v14562_v40 }
 0x7a2   : > { %8592 = vmatprep.subr.bf16.mxu1 %v11611_v41 }
 0x7a5   : > { %8593 = vmatpush1.bf16.msra.mxu1 %v11609_v0 }
 0x7a6   : > { %8594 = vmatprep.subr.bf16.mxu1 %v11614_v52 }
 0x7a9   : > { %8595 = vmatpush1.bf16.msra.mxu1 %v11612_v53  ;;  %v11668_v53 = vld [vmem:[%s15121_s13 + $0xa60] ss:$28 sps:$4 sm:$0xff]  }
 0x7aa   : > { %8596 = vmatprep.subr.bf16.mxu1 %v11617_v7 }
 0x7ad   : > { %8597 = vmatpush1.bf16.msra.mxu1 %v11615_v54 }
 0x7ae   : > { %8598 = vmatprep.subr.bf16.mxu1 %v11620_v55  ;;  %v11669_v55 = vld [vmem:[%s15121_s13 + $0x8a0] ss:$28 sps:$4 sm:$0xff]  }
 0x7b1   : > { %8599 = vmatpush1.bf16.msra.mxu1 %v11618_v56 }
 0x7b2   : > { %8600 = vmatprep.subr.bf16.mxu1 %v11623_v57 }
 0x7b5   : > { %8601 = vmatpush1.bf16.msra.mxu1 %v11621_v58 }
 0x7b6   : > { %8602 = vmatprep.subr.bf16.mxu1 %v11626_v60 }
 0x7b9   : > { %8603 = vmatpush1.bf16.msra.mxu1 %v11624_v63 }
 0x7ba   : > { %8604 = vmatprep.subr.bf16.mxu1 %v11629_v47 }
 0x7bd   : > { %8605 = vmatpush1.bf16.msra.mxu1 %v11627_v1  ;;  %v6509_v1 = vsub.s32 6, %v11954_v59 }
 0x7be   : > { %8606 = vmatprep.subr.bf16.mxu1 %v11632_v2 }
 0x7bf   : > { %v6510_v2 = vrot.slane %v14991_v32, %v6509_v1 }
 0x7c1   : > { %8607 = vmatpush1.bf16.msra.mxu1 %v11630_v9 }
 0x7c2   : > { %8608 = vmatprep.subr.bf16.mxu1 %v11635_v50 }
 0x7c5   : > { %8609 = vmatpush1.bf16.msra.mxu1 %v11633_v44 }
 0x7c6   : > { %8610 = vmatprep.subr.bf16.mxu1 %v11638_v10 }
 0x7c9   : > { %8611 = vmatpush1.bf16.msra.mxu1 %v11636_v4 }
 0x7ca   : > { %8612 = vmatprep.subr.bf16.mxu1 %v11641_v12 }
 0x7cd   : > { %8613 = vmatpush1.bf16.msra.mxu1 %v11639_v8 }
 0x7ce   : > { %8614 = vmatprep.subr.bf16.mxu1 %v11644_v11 }
 0x7d1   : > { %8615 = vmatpush1.bf16.msra.mxu1 %v11642_v16 }
 0x7d2   : > { %8616 = vmatprep.subr.bf16.mxu1 %v11647_v18  ;;  %v6502_v18 = vrot.slane %v14991_v32, %v13461_v5 }
 0x7d5   : > { %8617 = vmatpush1.bf16.msra.mxu1 %v11645_v19  ;;  %v6506_v19 = vrot.slane %v14991_v32, %v4460_v37 }
 0x7d6   : > { %8618 = vmatprep.subr.bf16.mxu1 %v11650_v20 }
 0x7d9   : > { %8619 = vmatpush1.bf16.msra.mxu1 %v11648_v6 }
 0x7da   : > { %8620 = vmatprep.subr.bf16.mxu1 %v11653_v14 }
 0x7dd   : > { %8621 = vmatpush1.bf16.msra.mxu1 %v11651_v21 }
 0x7de   : > { %10006 = vmatprep.subr.bf16.mxu1 %v11654_v22 }
 0x7e0   : > { %8623 = vmatmul.mubr.bf16.vlgmr.msra.gmra.mrb[28].mxu1 %v14560_v27 }
 0x7e1   : > { %10007 = vmatpush3.bf16.msra.mxu1 %v11655_v23  ;;  %8747 = vmatprep.mubr.bf16.mxu1 %v14562_v40  ;;  %v11660_v40 = vld [vmem:[%s15121_s13 + $0x980] ss:$28 sps:$4 sm:$0xff]  }
 0x7e2   : > { %10008 = vmatprep.subr.bf16.mxu1 %v11656_v24 }
 0x7e5   : > { %10009 = vmatpush3.bf16.msra.mxu1 %v11657_v3 }
 0x7e6   : > { %10010 = vmatprep.subr.bf16.mxu1 %v11658_v26 }
 0x7e9   : > { %10011 = vmatpush3.bf16.msra.mxu1 %v11659_v28 }
 0x7ea   : > { %10012 = vmatprep.subr.bf16.mxu1 %v11660_v40 }
 0x7ed   : > { %10013 = vmatpush3.bf16.msra.mxu1 %v11661_v29 }
 0x7ee   : > { %10014 = vmatprep.subr.bf16.mxu1 %v11662_v30 }
 0x7f1   : > { %10015 = vmatpush3.bf16.msra.mxu1 %v11663_v31 }
 0x7f2   : > { %10016 = vmatprep.subr.bf16.mxu1 %v11664_v33 }
 0x7f3   : > { %v8366_v61 = vpop.f32.mrb[24].mxu1  ;;  %v8495_v38 = vpop.f32.mrb[32].mxu0 }
 0x7f4   : > { %v10064_v42 = vadd.f32 %v8366_v61, %v6486_v13  ;;  %v10068_v25 = vadd.f32 %v8495_v38, %v6494_v34  ;;  %v8368_v43 = vpop.f32.mrb[25].mxu1  ;;  %v8497_v45 = vpop.f32.mrb[33].mxu0 }
 0x7f5   : > { %v10065_v46 = vadd.f32 %v8368_v43, %v6490_v17  ;;  %v10069_v62 = vadd.f32 %v8497_v45, %v6498_v15  ;;  %10017 = vmatpush3.bf16.msra.mxu1 %v11665_v35  ;;  %v8370_v48 = vpop.f32.mrb[26].mxu1  ;;  %v8499_v39 = vpop.f32.mrb[34].mxu0 }
 0x7f6   : > { %8756 = vst [vmem:[%s15015_s27] sm:$0xff] %v10064_v42  ;;  %8758 = vst [vmem:[%s15015_s27 + $0x10] sm:$0xff] %v10068_v25  ;;  %v10066_v51 = vadd.f32 %v8370_v48, %v6486_v13  ;;  %v10070_v41 = vadd.f32 %v8499_v39, %v6494_v34  ;;  %v8372_v0 = vpop.f32.mrb[27].mxu1  ;;  %v8501_v52 = vpop.f32.mrb[35].mxu0  ;;  %10018 = vmatprep.subr.bf16.mxu1 %v11666_v36 }
 0x7f7   : > { %8757 = vst [vmem:[%s15015_s27 + $0x8] sm:$0xff] %v10065_v46  ;;  %8759 = vst [vmem:[%s15015_s27 + $0x18] sm:$0xff] %v10069_v62  ;;  %v10067_v7 = vadd.f32 %v8372_v0, %v6490_v17  ;;  %v10071_v54 = vadd.f32 %v8501_v52, %v6498_v15 }
 0x7f8   : > { %8764 = vst [vmem:[%s15015_s27 + $0x38] sm:$0xff] %v10066_v51  ;;  %8766 = vst [vmem:[%s15015_s27 + $0x48] sm:$0xff] %v10070_v41 }
 0x7f9   : > { %8765 = vst [vmem:[%s15015_s27 + $0x40] sm:$0xff] %v10067_v7  ;;  %8767 = vst [vmem:[%s15015_s27 + $0x50] sm:$0xff] %v10071_v54  ;;  %10019 = vmatpush3.bf16.msra.mxu1 %v11667_v49 }
 0x7fa   : > { %10020 = vmatprep.subr.bf16.mxu1 %v11668_v53 }
 0x7fd   : > { %10021 = vmatpush3.bf16.msra.mxu1 %v11669_v55 }
 0x800   : > { %8748 = vmatmul.mubr.bf16.vlgmr.msra.gmra.mrb[32].mxu1 %v14560_v27 }
 0x813   : > { %v9978_v56 = vpop.f32.mrb[36].mxu0 }
 0x814   : > { %v9979_v57 = vpop.f32.mrb[37].mxu0 }
 0x815   : > { %v9980_v58 = vadd.f32 %v9979_v57, %v9978_v56  ;;  %v9981_v60 = vpop.f32.mrb[38].mxu0 }
 0x816   : > { %v9982_v63 = vpop.f32.mrb[39].mxu0 }
 0x817   : > { %v9983_v47 = vadd.f32 %v9982_v63, %v9981_v60  ;;  %v8668_v44 = vadd.f32 %v9980_v58, %v6510_v2 }
 0x819   : > { %v8671_v8 = vadd.f32 %v9983_v47, %v6510_v2 }
 0x833   : > { %v10000_v9 = vpop.f32.mrb[40].mxu0 }
 0x834   : > { %v10001_v50 = vpop.f32.mrb[41].mxu0 }
 0x835   : > { %v10002_v10 = vadd.f32 %v10001_v50, %v10000_v9  ;;  %v10003_v4 = vpop.f32.mrb[42].mxu0 }
 0x836   : > { %v10004_v12 = vpop.f32.mrb[43].mxu0 }
 0x837   : > { %v8709_v27 = vadd.f32 %v10002_v10, %v8668_v44  ;;  %v10005_v11 = vadd.f32 %v10004_v12, %v10003_v4 }
 0x839   : > { %v8712_v16 = vadd.f32 %v10005_v11, %v8671_v8 }
 0x8b3   : > { %v8624_v20 = vpop.f32.mrb[28].mxu1 }
 0x8b4   : > { %v10072_v6 = vadd.f32 %v8624_v20, %v6502_v18  ;;  %v8626_v14 = vpop.f32.mrb[29].mxu1 }
 0x8b5   : > { %v10073_v21 = vadd.f32 %v8626_v14, %v6506_v19  ;;  %v8628_v22 = vpop.f32.mrb[30].mxu1 }
 0x8b6   : > { %8760 = vst [vmem:[%s15015_s27 + $0x20] sm:$0xff] %v10072_v6  ;;  %v10074_v23 = vadd.f32 %v8628_v22, %v6502_v18  ;;  %v8630_v24 = vpop.f32.mrb[31].mxu1 }
 0x8b7   : > { %8761 = vst [vmem:[%s15015_s27 + $0x28] sm:$0xff] %v10073_v21  ;;  %v10075_v3 = vadd.f32 %v8630_v24, %v6506_v19 }
 0x8b8   : > { %8768 = vst [vmem:[%s15015_s27 + $0x58] sm:$0xff] %v10074_v23 }
 0x8b9   : > { %8769 = vst [vmem:[%s15015_s27 + $0x60] sm:$0xff] %v10075_v3 }
 0x8d3   : > { %v10022_v5 = vpop.f32.mrb[32].mxu1 }
 0x8d4   : > { %v10023_v26 = vpop.f32.mrb[33].mxu1 }
 0x8d5   : > { %v10024_v59 = vadd.f32 %v10023_v26, %v10022_v5  ;;  %v10025_v28 = vpop.f32.mrb[34].mxu1  ;;  %8778 = sbr.rel (!%p15145_p6) target bundleno = 2297 (0x8f9), region = 88 }
 0x8d6   : > { %v10026_v37 = vpop.f32.mrb[35].mxu1 }
 0x8d7   : > { %v8750_v40 = vadd.f32 %v10024_v59, %v8709_v27  ;;  %v10027_v29 = vadd.f32 %v10026_v37, %v10025_v28 }
 0x8d9   : > { %8763 = vst.msk [vmem:[%s15015_s27 + $0x30] sm:$0xff] %vm8762_vm2, %v8750_v40  ;;  %v8753_v30 = vadd.f32 %v10027_v29, %v8712_v16 }
 0x8db   : > { %8770 = vst.msk [vmem:[%s15015_s27 + $0x68] sm:$0xff] %vm8762_vm2, %v8753_v30 }
 0x8dc   : > { %s15155_s20 = smov (!%p8781_p9, %s8780_s20), 2 }
 0x8dd   : > { %s15052_s25 = smul.u32 896, %s15155_s20 }
 0x8df   : > { %s8786_s26 = ssub.s32 1792, %s15052_s25 }
 0x8e0   : > { %8787 = vsyncadd %s15047_s24, %s8786_s26  ;;  %p9890_p10 = scmp.ne.s32.totalorder %s15052_s25, 0  ;;  %s10149_s29 = smul.u32 1792, %s11874_s22 }
 0x8e1   : > { %s8793_s17 = sshll.u32 %s15015_s27, 4  ;;  %s11770_s16 = smov [#allocation5]   ;;  %s15064_s17 = int_to_ptr.vmem [resolvable:$true] %s8793_s17 }
 0x8e2   : > { %s15062_s23 = scalar_lea.hbm %s15123_s15, %s10149_s29  ;;  %s11698_s18 = scalar_lea.vmem %s15064_s17, %s15052_s25 }
 0x8e3   : > { %p11699_p12 = scmp.ne.s32.totalorder %s15064_s17, %s11698_s18  ;;  %s11702_s20 = sshll.u32 %s11770_s16, 4  ;;  %s11703_s20 = int_to_ptr.vmem [resolvable:$false] %s11702_s20 }
 0x8e4   : > { %s11704_s22 = scalar_lea.vmem %s11703_s20, 3584  ;;  %p11705_p4 = scmp.lt.s32.totalorder %s15064_s17, %s11703_s20 }
 0x8e5   : > { %p11700_p2 = pnand %p11699_p12, %p9890_p10  ;;  %p11706_p7 = scmp.lt.s32.totalorder %s11704_s22, %s11698_s18 }
 0x8e7   : > { %p11701_p3 = pneg %p11700_p2  ;;  %p11707_p8 = por %p11706_p7, %p11705_p4 }
 0x8e9   : > { %p11708_p11 = pnand %p11707_p8, %p11701_p3 }
 0x8eb   : > { %11711 = shalt.err (!%p11708_p11)
}
 0x8ec   : > { %s11712_s27 = scalar_lea.hbm %s15062_s23, %s15052_s25  ;;  %s11716_s28 = scalar_lea.hbm %s15123_s15, 2688 }
 0x8ed   : > { %p11713_p13 = scmp.ne.s32.totalorder %s15062_s23, %s11712_s27  ;;  %p11717_p5 = scmp.lt.u32.totalorder %s15062_s23, %s15123_s15 }
 0x8ee   : > { %p11718_p6 = scmp.lt.u32.totalorder %s11716_s28, %s11712_s27  ;;  %p11720_p12 = scmp.lt.u32.totalorder %s11712_s27, %s15062_s23 }
 0x8ef   : > { %p11714_p1 = pnand %p11713_p13, %p9890_p10 }
 0x8f0   : > { %p11719_p9 = por %p11718_p6, %p11717_p5 }
 0x8f1   : > { %p11715_p0 = pneg %p11714_p1 }
 0x8f2   : > { %p11721_p2 = por %p11720_p12, %p11719_p9 }
 0x8f4   : > { %p11722_p3 = pnand %p11721_p2, %p11715_p0 }
 0x8f6   : > { %11725 = shalt.err (!%p11722_p3)
}
 0x8f7   : > { %s11771_s16 = smov 896   ;;  %s11772_s20 = smov 56  }
 0x8f8   : > { %8799 = dma.vmem_to_hbm [thread:$0]  (%p9890_p10), %s15064_s17, %s15052_s25, %s15062_s23, %s15047_s24, %s11771_s16, %s11771_s16, %s11772_s20  }
 0x8f9 PF: > { %s15146_s22 = sld [smem:[#allocation8_spill]]  ;;  %s15147_s26 = sld [smem:[#allocation12_spill]] }
 0x8fa   : > { %p10165_p4 = scmp.ge.s32.totalorder %s11764_s21, 2 }
 0x8ff   : > { %s8808_s29 = sand.u32 1, %s15146_s22   ;;  %p15148_p7 = scmp.ne.s32.totalorder %s15147_s26, 0 }
 0x900   : > { %s8809_s27 = scalar_lea.sflag [#allocation4], %s8808_s29 }
 0x901   : > { %p10160_p8 = pnand %p10165_p4, %p15148_p7 }
 0x903   : > { %11747 = dma.done.wait (!%p10160_p8), %s8809_s27, 1792  }
 0x904   : > { %11749 = vsyncadd (!%p10160_p8), %s8809_s27, 4294965504  ;;  %s15149_s21 = sld [smem:[#allocation10_spill]]  ;;  %s15150_s28 = sld [smem:[#allocation9_spill]] }
 0x905   : > { %s15151_s20 = sld [smem:[#allocation11_spill]]  ;;  %s15152_s18 = smov %s11756_s19 }
 0x90a   : > { %p26_p11 = scmp.ge.s32.totalorder %s15149_s21, 4   ;;  %s15153_s19 = smov %s15150_s28 }
 0x90c   :  { %28 = sbr.rel (!%p26_p11) target bundleno = 4 (0x4), region = 120 }
 0x913   :  { %8814 = vsyncpa [#allocation3], 1 }
 0x914   :  { %8816 = vsyncpa [#allocation3 + $0x1], 1 }
 0x915   :  { %8817 = vsyncpa [#allocation4], 1 }
 0x916   :  { %8819 = vsyncpa [#allocation4 + $0x1], 1 }

</bundles_post_ra>
